<compile_context>
chip_gen: v7x
topology: tpu7x:2x2x1
jax: 0.10.0
libtpu: 0.0.40
codegen_flags: <defaults>
</compile_context>

<pallas_src>
import functools

import jax
import jax.numpy as jnp
from jax import lax
from jax.experimental import pallas as pl
from jax.experimental.pallas import tpu as pltpu


# ----------------------------------------------------------------------------
# Pallas kernel: fused LowRankECC hot path + mean over K neighbours
# ----------------------------------------------------------------------------

def _ecc_kernel(lbl_ref, w0_ref, b0_ref, wcat_ref, o_ref, *,
                rank, cin, cout, K, sLp, sRp, delta, leak, ew_dtype):
    """One (Cout, tm) output tile; loops over the K neighbours in-kernel.

    lbl_ref  : (K, Cin, tm)  bf16 edge labels (channels on sublanes)
    w0_ref   : (Cin+1, Cin)  bf16 [W0 ; 0]  (zero row -> ones row of theta)
    b0_ref   : (Cin+1, 1)    f32  [b0 ; 1]
    wcat_ref : (Pp, Cin+1)   bf16 fused [FCL|bL ; FCR|bR ; FCk|bk], rank-major
                             rows, each segment padded to a multiple of 8 rows
    o_ref    : (Cout, tm)    f32  output tile (lane-dense store)
    """
    tm = o_ref.shape[-1]
    nL = rank * cout
    nR = rank * cin

    # loop-invariant loads / constants hoisted out of the k loop
    w0 = w0_ref[...]
    b0 = b0_ref[...]
    wcat = wcat_ref[...]
    neg_inv_delta = jnp.float32(-1.0 / delta)
    leak_f = jnp.float32(leak)

    def body(k, acc):
        lbl = lbl_ref[k]                                          # (Cin, tm) bf16

        # theta_aug = LeakyReLU([W0;0] @ lbl + [b0;1]); its last row is exactly
        # 1, which turns wcat's bias column into the bias add (no (P,tm)
        # broadcast-add needed).
        pre = jnp.dot(w0, lbl, preferred_element_type=jnp.float32) + b0
        theta = jnp.maximum(pre, leak_f * pre)                    # (Cin+1, tm) f32

        # single fused projection for thetaL / thetaR / kappa (+ biases)
        proj = jnp.dot(wcat, theta.astype(wcat.dtype),
                       preferred_element_type=jnp.float32)        # (Pp, tm) f32
        proj = proj.astype(ew_dtype)

        L3 = proj[:nL].reshape(rank, cout, tm)                    # [r, o, m]
        R3 = proj[sLp:sLp + nR].reshape(rank, cin, tm)            # [r, c, m]
        kap = proj[sLp + sRp:sLp + sRp + rank]                    # (rank, tm)

        # Faithful to the reference code: mb_vertex = label.
        vert = lbl.astype(ew_dtype)
        tmp = jnp.sum(R3 * vert[None, :, :], axis=1)              # (rank, tm)
        out = jnp.sum(L3 * (kap * tmp)[:, None, :], axis=0)       # (Cout, tm)

        lf = lbl.astype(jnp.float32)
        gamma = jnp.exp(jnp.sum(lf * lf, axis=0, keepdims=True) * neg_inv_delta)
        return acc + gamma * out.astype(jnp.float32)

    acc = lax.fori_loop(0, K, body, jnp.zeros((cout, tm), jnp.float32),
                        unroll=True)
    o_ref[...] = (acc * jnp.float32(1.0 / K)).astype(o_ref.dtype)


# ----------------------------------------------------------------------------
# Wrapper: graph gather (JAX) + pallas_call
# ----------------------------------------------------------------------------

def _round_up(x, m):
    return ((x + m - 1) // m) * m


def _vmem_capacity_bytes(default=128 * 1024 * 1024):
    try:
        cap = getattr(pltpu.get_tpu_info(), "vmem_capacity_bytes", None)
        if cap:
            return int(cap)
    except Exception:
        pass
    return default


def lowrank_ecc(h, edge, params, *, rank, cout=None, delta=10.0, leak=0.2,
                tm=2048, ew_dtype=jnp.bfloat16):
    """h: (B, Cin, H, W), edge: (B, K, H, W) int indices into the flat H*W
    grid.  Returns (B, Cout, H, W).  On v5e pass ew_dtype=jnp.float32."""
    B, cin, H, W = h.shape
    K = edge.shape[1]
    N = H * W
    BN = B * N
    cout = cin if cout is None else cout

    # --- getLabelVertex (reconstructed): label = h_j - h_i --------------------
    # Gather directly in (K, Cin, B, N) order so the (K, Cin, B*N) slab needs
    # no extra transpose pass in HBM; cast to bf16 (halves label HBM traffic).
    hf = h.reshape(B, cin, N)
    e = edge.reshape(B, K, N).astype(jnp.int32)
    bidx = jnp.arange(B)[None, None, :, None]
    cidx = jnp.arange(cin)[None, :, None, None]
    eidx = e.transpose(1, 0, 2)[:, None, :, :]                    # (K,1,B,N)
    vertex_t = hf[bidx, cidx, eidx]                               # (K,Cin,B,N)
    label_t = (vertex_t - hf.transpose(1, 0, 2)[None]).astype(jnp.bfloat16)
    label_t = label_t.reshape(K, cin, BN)

    # --- generation-aware lane tiling ------------------------------------------
    Pp = params['wcat'].shape[0]
    ewb = jnp.dtype(ew_dtype).itemsize
    vmem_limit = max(32 << 20, min(_vmem_capacity_bytes() * 3 // 4, 64 << 20))
    vmem_budget = vmem_limit // 2
    # rough per-lane-column VMEM bytes: double-buffered blocks + ~2 live
    # k-iterations worth of projection / elementwise temporaries.
    bytes_per_col = (2 * K * cin * 2 + 2 * cout * 4 + 3 * cout * 4
                     + 2 * ((cin + 1) * 6 + Pp * (4 + ewb)
                            + rank * (cin + cout + 2) * ewb))
    tm_budget = max(128, vmem_budget // bytes_per_col)
    bn_pad = _round_up(BN, 128)
    # ensure >= 2 row tiles when possible so the "parallel" axis can shard
    # across both v7x TensorCores
    tm_two = _round_up(-(-bn_pad // 2), 128) if bn_pad > 128 else bn_pad
    tm_eff = max(128, (min(tm, tm_budget, tm_two, bn_pad) // 128) * 128)
    ntiles = -(-bn_pad // tm_eff)
    bnp = ntiles * tm_eff
    if bnp > BN:
        # zero-padded columns are independent and sliced off afterwards
        label_t = jnp.pad(label_t, ((0, 0), (0, 0), (0, bnp - BN)))

    kern = functools.partial(
        _ecc_kernel, rank=rank, cin=cin, cout=cout, K=K,
        sLp=params['sLp'], sRp=params['sRp'],
        delta=float(delta), leak=float(leak), ew_dtype=ew_dtype)

    out_t = pl.pallas_call(
        kern,
        out_shape=jax.ShapeDtypeStruct((cout, bnp), jnp.float32),
        grid=(ntiles,),
        in_specs=[
            pl.BlockSpec((K, cin, tm_eff), lambda i: (0, 0, i)),
            pl.BlockSpec(params['w0'].shape, lambda i: (0, 0)),
            pl.BlockSpec(params['b0'].shape, lambda i: (0, 0)),
            pl.BlockSpec(params['wcat'].shape, lambda i: (0, 0)),
        ],
        out_specs=pl.BlockSpec((cout, tm_eff), lambda i: (0, i)),
        compiler_params=pltpu.CompilerParams(
            dimension_semantics=("parallel",),
            vmem_limit_bytes=int(vmem_limit)),
    )(label_t, params['w0'], params['b0'], params['wcat'])

    out = out_t[:, :BN].reshape(cout, B, N).transpose(1, 0, 2)
    return out.reshape(B, cout, H, W)


# ----------------------------------------------------------------------------
# Parameters (synthetic, matching the PyTorch initialisers) + kernel packing
# ----------------------------------------------------------------------------

def init_lowrank_ecc(key, cin, cout, rank):
    ks = jax.random.split(key, 8)
    bnd = cin ** -0.5                                   # nn.Linear default bias bound
    W0 = jax.random.normal(ks[0], (cin, cin), jnp.float32) * (1.0 / cin) ** 0.5
    b0 = jax.random.uniform(ks[1], (cin,), jnp.float32, -1.0, 1.0) * bnd
    WL = jax.random.normal(ks[2], (rank * cout, cin), jnp.float32) * (1.0 / (cin * rank * cout)) ** 0.5
    bL = jax.random.uniform(ks[3], (rank * cout,), jnp.float32, -1.0, 1.0) * bnd
    WR = jax.random.normal(ks[4], (rank * cin, cin), jnp.float32) * (1.0 / (cin * rank * cin)) ** 0.5
    bR = jax.random.uniform(ks[5], (rank * cin,), jnp.float32, -1.0, 1.0) * bnd
    Wk = jax.random.normal(ks[6], (rank, cin), jnp.float32) * (2.0 / rank) ** 0.5
    bk = jax.random.uniform(ks[7], (rank,), jnp.float32, -1.0, 1.0) * bnd
    return dict(W0=W0, b0=b0, WL=WL, bL=bL, WR=WR, bR=bR, Wk=Wk, bk=bk)


def pack_ecc_params(raw, cin, cout, rank):
    """Fold biases into the matmuls, re-layout FCL/FCR rank-major, pad each
    segment to a multiple of 8 rows, and cast the MXU operands to bf16."""
    # FC0: append a zero row whose folded bias is 1 -> after LeakyReLU the
    # extra theta row is exactly 1 and drives the bias column of wcat.
    w0 = jnp.concatenate([raw['W0'], jnp.zeros((1, cin), jnp.float32)], axis=0)
    b0 = jnp.concatenate([raw['b0'], jnp.ones((1,), jnp.float32)]).reshape(cin + 1, 1)

    # PyTorch reshapes FCL/FCR outputs as (.., Cout, rank) / (.., Cin, rank),
    # i.e. output index o*rank + r.  Kernel wants row (r*Cout + o) = thetaL[o, r].
    WL_rm = raw['WL'].reshape(cout, rank, cin).transpose(1, 0, 2).reshape(rank * cout, cin)
    bL_rm = raw['bL'].reshape(cout, rank).T.reshape(rank * cout)
    WR_rm = raw['WR'].reshape(cin, rank, cin).transpose(1, 0, 2).reshape(rank * cin, cin)
    bR_rm = raw['bR'].reshape(cin, rank).T.reshape(rank * cin)

    def seg(Wmat, bvec):
        Wb = jnp.concatenate([Wmat, bvec[:, None]], axis=1)   # fold bias column
        pad = (-Wb.shape[0]) % 8                              # sublane-align segment
        if pad:
            Wb = jnp.pad(Wb, ((0, pad), (0, 0)))
        return Wb, Wb.shape[0]

    segL, sLp = seg(WL_rm, bL_rm)
    segR, sRp = seg(WR_rm, bR_rm)
    segK, sKp = seg(raw['Wk'], raw['bk'])
    wcat = jnp.concatenate([segL, segR, segK], axis=0)        # (Pp, Cin+1)
    return dict(w0=w0.astype(jnp.bfloat16), b0=b0,
                wcat=wcat.astype(jnp.bfloat16), sLp=sLp, sRp=sRp, sKp=sKp)


# ----------------------------------------------------------------------------
# Pure-JAX f32 reference (mirrors the PyTorch forward, incl. mb_vertex = label)
# ----------------------------------------------------------------------------

def lowrank_ecc_ref(h, edge, raw, *, rank, cout, delta=10.0, leak=0.2):
    B, cin, H, W = h.shape
    K = edge.shape[1]
    N = H * W
    hf = h.reshape(B, cin, N)
    e = edge.reshape(B, K, N).astype(jnp.int32)
    bidx = jnp.arange(B)[:, None, None, None]
    cidx = jnp.arange(cin)[None, None, :, None]
    vertex = hf[bidx, cidx, e[:, :, None, :]]            # (B, K, Cin, N)
    label = (vertex - hf[:, None, :, :]).transpose(0, 1, 3, 2)   # (B, K, N, Cin)

    theta = label @ raw['W0'].T + raw['b0']
    theta = jnp.where(theta >= 0, theta, leak * theta)
    thL = (theta @ raw['WL'].T + raw['bL']).reshape(B, K, N, cout, rank)
    thR = (theta @ raw['WR'].T + raw['bR']).reshape(B, K, N, cin, rank)
    kap = theta @ raw['Wk'].T + raw['bk']                # (B, K, N, rank)
    vert = label                                         # reference: mb_vertex = label
    tmp = jnp.einsum('bkncr,bknc->bknr', thR, vert)
    out = jnp.einsum('bknor,bknr->bkno', thL, kap * tmp)
    gamma = jnp.exp(-jnp.sum(label * label, axis=-1, keepdims=True) / delta)
    out = (gamma * out).mean(axis=1)                     # (B, N, Cout)
    return out.transpose(0, 2, 1).reshape(B, cout, H, W)


# ----------------------------------------------------------------------------

if __name__ == "__main__":
    key = jax.random.PRNGKey(0)
    B, Cin, H, W = 2, 8, 16, 16
    Cout, K, rank = 8, 4, 12
    delta, leak = 10.0, 0.2

    kh, ke, kp = jax.random.split(key, 3)
    h = jax.random.normal(kh, (B, Cin, H, W), jnp.float32)
    edge = jax.random.randint(ke, (B, K, H, W), 0, H * W, dtype=jnp.int32)

    raw = init_lowrank_ecc(kp, Cin, Cout, rank)
    packed = pack_ecc_params(raw, Cin, Cout, rank)

    y = lowrank_ecc(h, edge, packed, rank=rank, cout=Cout, delta=delta, leak=leak)
    y = jax.block_until_ready(y)

    assert y.shape == (B, Cout, H, W), y.shape
    assert bool(jnp.all(jnp.isfinite(y)))

    # Reference is pure f32; the kernel intentionally runs its labels/weights
    # and the post-projection elementwise stage in bf16 (per the perf review),
    # so use a correspondingly looser tolerance on the max-relative metric.
    y_ref = lowrank_ecc_ref(h, edge, raw, rank=rank, cout=Cout, delta=delta, leak=leak)
    err = float(jnp.max(jnp.abs(y - y_ref)) / (jnp.max(jnp.abs(y_ref)) + 1e-12))
    assert err < 5e-2, f"mismatch vs reference: rel-max err {err}"

    print("KERNEL_OK")
</pallas_src>

<mosaic_0001>
module attributes {stable_mosaic.version = 11 : i64} {
  func.func @_ecc_kernel(%arg0: i32, %arg1: memref<4x8x256xbf16, #tpu.memory_space<vmem>>, %arg2: memref<9x8xbf16, #tpu.memory_space<vmem>>, %arg3: memref<9x1xf32, #tpu.memory_space<vmem>>, %arg4: memref<208x9xbf16, #tpu.memory_space<vmem>>, %arg5: memref<8x256xf32, #tpu.memory_space<vmem>>) attributes {dimension_semantics = [#tpu.dimension_semantics<parallel>], iteration_bounds = array<i64: 2>, scalar_prefetch = 0 : i64, scratch_operands = 0 : i64, tpu.core_type = #tpu.core_type<tc>, window_params = [{transform_indices = @transform_0, window_bounds = array<i64: 4, 8, 256>}, {pipeline_mode = #tpu.pipeline_mode<synchronous>, transform_indices = @transform_1, window_bounds = array<i64: 9, 8>}, {pipeline_mode = #tpu.pipeline_mode<synchronous>, transform_indices = @transform_2, window_bounds = array<i64: 9, 1>}, {pipeline_mode = #tpu.pipeline_mode<synchronous>, transform_indices = @transform_3, window_bounds = array<i64: 208, 9>}, {transform_indices = @transform_4, window_bounds = array<i64: 8, 256>}]} {
    %c0 = arith.constant 0 : index
    %c0_0 = arith.constant 0 : index
    %0 = vector.load %arg2[%c0, %c0_0] : memref<9x8xbf16, #tpu.memory_space<vmem>>, vector<9x8xbf16>
    %c0_1 = arith.constant 0 : index
    %c0_2 = arith.constant 0 : index
    %1 = vector.load %arg3[%c0_1, %c0_2] : memref<9x1xf32, #tpu.memory_space<vmem>>, vector<9x1xf32>
    %c0_3 = arith.constant 0 : index
    %c0_4 = arith.constant 0 : index
    %2 = vector.load %arg4[%c0_3, %c0_4] : memref<208x9xbf16, #tpu.memory_space<vmem>>, vector<208x9xbf16>
    %cst = arith.constant 0.000000e+00 : f32
    %3 = vector.broadcast %cst : f32 to vector<8x256xf32>
    %cst_5 = arith.constant 2.000000e-01 : f32
    %cst_6 = arith.constant -1.000000e-01 : f32
    %c0_i32 = arith.constant 0 : i32
    %4 = arith.index_cast %c0_i32 : i32 to index
    %c0_7 = arith.constant 0 : index
    %c0_8 = arith.constant 0 : index
    %5 = vector.load %arg1[%4, %c0_7, %c0_8] : memref<4x8x256xbf16, #tpu.memory_space<vmem>>, vector<1x8x256xbf16>
    %6 = vector.shape_cast %5 : vector<1x8x256xbf16> to vector<8x256xbf16>
    %cst_9 = arith.constant dense<0.000000e+00> : vector<9x256xf32>
    %7 = tpu.matmul %0, %6, %cst_9 {dimension_numbers = #tpu.dot_dimension_numbers<[1], [0], [0], [1], [0, 0, 1, 1], [], []>} : vector<9x8xbf16>, vector<8x256xbf16>, vector<9x256xf32> -> vector<9x256xf32>
    %8 = vector.broadcast %1 : vector<9x1xf32> to vector<9x256xf32>
    %9 = arith.addf %7, %8 : vector<9x256xf32>
    %10 = vector.broadcast %cst_5 : f32 to vector<9x256xf32>
    %11 = arith.mulf %10, %9 : vector<9x256xf32>
    %12 = arith.maximumf %9, %11 : vector<9x256xf32>
    %13 = arith.truncf %12 : vector<9x256xf32> to vector<9x256xbf16>
    %cst_10 = arith.constant dense<0.000000e+00> : vector<208x256xf32>
    %14 = tpu.matmul %2, %13, %cst_10 {dimension_numbers = #tpu.dot_dimension_numbers<[1], [0], [0], [1], [0, 0, 1, 1], [], []>} : vector<208x9xbf16>, vector<9x256xbf16>, vector<208x256xf32> -> vector<208x256xf32>
    %15 = arith.truncf %14 : vector<208x256xf32> to vector<208x256xbf16>
    %16 = vector.extract_strided_slice %15 {offsets = [0, 0], sizes = [96, 256], strides = [1, 1]} : vector<208x256xbf16> to vector<96x256xbf16>
    %17 = vector.shape_cast %16 : vector<96x256xbf16> to vector<12x8x256xbf16>
    %18 = vector.extract_strided_slice %15 {offsets = [96, 0], sizes = [96, 256], strides = [1, 1]} : vector<208x256xbf16> to vector<96x256xbf16>
    %19 = vector.shape_cast %18 : vector<96x256xbf16> to vector<12x8x256xbf16>
    %20 = vector.extract_strided_slice %15 {offsets = [192, 0], sizes = [12, 256], strides = [1, 1]} : vector<208x256xbf16> to vector<12x256xbf16>
    %21 = vector.shape_cast %6 : vector<8x256xbf16> to vector<1x8x256xbf16>
    %22 = vector.broadcast %21 : vector<1x8x256xbf16> to vector<12x8x256xbf16>
    %23 = arith.mulf %19, %22 : vector<12x8x256xbf16>
    %24 = arith.extf %23 : vector<12x8x256xbf16> to vector<12x8x256xf32>
    %cst_11 = arith.constant dense<0.000000e+00> : vector<12x256xf32>
    %25 = vector.multi_reduction <add>, %24, %cst_11 [1] : vector<12x8x256xf32> to vector<12x256xf32>
    %26 = arith.truncf %25 : vector<12x256xf32> to vector<12x256xbf16>
    %27 = arith.mulf %20, %26 : vector<12x256xbf16>
    %28 = vector.shape_cast %27 : vector<12x256xbf16> to vector<12x1x256xbf16>
    %29 = vector.broadcast %28 : vector<12x1x256xbf16> to vector<12x8x256xbf16>
    %30 = arith.mulf %17, %29 : vector<12x8x256xbf16>
    %31 = arith.extf %30 : vector<12x8x256xbf16> to vector<12x8x256xf32>
    %cst_12 = arith.constant dense<0.000000e+00> : vector<8x256xf32>
    %32 = vector.multi_reduction <add>, %31, %cst_12 [0] : vector<12x8x256xf32> to vector<8x256xf32>
    %33 = arith.truncf %32 : vector<8x256xf32> to vector<8x256xbf16>
    %34 = arith.extf %6 : vector<8x256xbf16> to vector<8x256xf32>
    %35 = arith.mulf %34, %34 : vector<8x256xf32>
    %cst_13 = arith.constant dense<0.000000e+00> : vector<256xf32>
    %36 = vector.multi_reduction <add>, %35, %cst_13 [0] : vector<8x256xf32> to vector<256xf32>
    %37 = vector.shape_cast %36 : vector<256xf32> to vector<1x256xf32>
    %38 = vector.broadcast %cst_6 : f32 to vector<1x256xf32>
    %39 = arith.mulf %37, %38 : vector<1x256xf32>
    %40 = math.exp %39 : vector<1x256xf32>
    %41 = arith.extf %33 : vector<8x256xbf16> to vector<8x256xf32>
    %42 = vector.broadcast %40 : vector<1x256xf32> to vector<8x256xf32>
    %43 = arith.mulf %42, %41 : vector<8x256xf32>
    %44 = arith.addf %3, %43 : vector<8x256xf32>
    %c1_i32 = arith.constant 1 : i32
    %45 = arith.index_cast %c1_i32 : i32 to index
    %c0_14 = arith.constant 0 : index
    %c0_15 = arith.constant 0 : index
    %46 = vector.load %arg1[%45, %c0_14, %c0_15] : memref<4x8x256xbf16, #tpu.memory_space<vmem>>, vector<1x8x256xbf16>
    %47 = vector.shape_cast %46 : vector<1x8x256xbf16> to vector<8x256xbf16>
    %cst_16 = arith.constant dense<0.000000e+00> : vector<9x256xf32>
    %48 = tpu.matmul %0, %47, %cst_16 {dimension_numbers = #tpu.dot_dimension_numbers<[1], [0], [0], [1], [0, 0, 1, 1], [], []>} : vector<9x8xbf16>, vector<8x256xbf16>, vector<9x256xf32> -> vector<9x256xf32>
    %49 = vector.broadcast %1 : vector<9x1xf32> to vector<9x256xf32>
    %50 = arith.addf %48, %49 : vector<9x256xf32>
    %51 = vector.broadcast %cst_5 : f32 to vector<9x256xf32>
    %52 = arith.mulf %51, %50 : vector<9x256xf32>
    %53 = arith.maximumf %50, %52 : vector<9x256xf32>
    %54 = arith.truncf %53 : vector<9x256xf32> to vector<9x256xbf16>
    %cst_17 = arith.constant dense<0.000000e+00> : vector<208x256xf32>
    %55 = tpu.matmul %2, %54, %cst_17 {dimension_numbers = #tpu.dot_dimension_numbers<[1], [0], [0], [1], [0, 0, 1, 1], [], []>} : vector<208x9xbf16>, vector<9x256xbf16>, vector<208x256xf32> -> vector<208x256xf32>
    %56 = arith.truncf %55 : vector<208x256xf32> to vector<208x256xbf16>
    %57 = vector.extract_strided_slice %56 {offsets = [0, 0], sizes = [96, 256], strides = [1, 1]} : vector<208x256xbf16> to vector<96x256xbf16>
    %58 = vector.shape_cast %57 : vector<96x256xbf16> to vector<12x8x256xbf16>
    %59 = vector.extract_strided_slice %56 {offsets = [96, 0], sizes = [96, 256], strides = [1, 1]} : vector<208x256xbf16> to vector<96x256xbf16>
    %60 = vector.shape_cast %59 : vector<96x256xbf16> to vector<12x8x256xbf16>
    %61 = vector.extract_strided_slice %56 {offsets = [192, 0], sizes = [12, 256], strides = [1, 1]} : vector<208x256xbf16> to vector<12x256xbf16>
    %62 = vector.shape_cast %47 : vector<8x256xbf16> to vector<1x8x256xbf16>
    %63 = vector.broadcast %62 : vector<1x8x256xbf16> to vector<12x8x256xbf16>
    %64 = arith.mulf %60, %63 : vector<12x8x256xbf16>
    %65 = arith.extf %64 : vector<12x8x256xbf16> to vector<12x8x256xf32>
    %cst_18 = arith.constant dense<0.000000e+00> : vector<12x256xf32>
    %66 = vector.multi_reduction <add>, %65, %cst_18 [1] : vector<12x8x256xf32> to vector<12x256xf32>
    %67 = arith.truncf %66 : vector<12x256xf32> to vector<12x256xbf16>
    %68 = arith.mulf %61, %67 : vector<12x256xbf16>
    %69 = vector.shape_cast %68 : vector<12x256xbf16> to vector<12x1x256xbf16>
    %70 = vector.broadcast %69 : vector<12x1x256xbf16> to vector<12x8x256xbf16>
    %71 = arith.mulf %58, %70 : vector<12x8x256xbf16>
    %72 = arith.extf %71 : vector<12x8x256xbf16> to vector<12x8x256xf32>
    %cst_19 = arith.constant dense<0.000000e+00> : vector<8x256xf32>
    %73 = vector.multi_reduction <add>, %72, %cst_19 [0] : vector<12x8x256xf32> to vector<8x256xf32>
    %74 = arith.truncf %73 : vector<8x256xf32> to vector<8x256xbf16>
    %75 = arith.extf %47 : vector<8x256xbf16> to vector<8x256xf32>
    %76 = arith.mulf %75, %75 : vector<8x256xf32>
    %cst_20 = arith.constant dense<0.000000e+00> : vector<256xf32>
    %77 = vector.multi_reduction <add>, %76, %cst_20 [0] : vector<8x256xf32> to vector<256xf32>
    %78 = vector.shape_cast %77 : vector<256xf32> to vector<1x256xf32>
    %79 = vector.broadcast %cst_6 : f32 to vector<1x256xf32>
    %80 = arith.mulf %78, %79 : vector<1x256xf32>
    %81 = math.exp %80 : vector<1x256xf32>
    %82 = arith.extf %74 : vector<8x256xbf16> to vector<8x256xf32>
    %83 = vector.broadcast %81 : vector<1x256xf32> to vector<8x256xf32>
    %84 = arith.mulf %83, %82 : vector<8x256xf32>
    %85 = arith.addf %44, %84 : vector<8x256xf32>
    %c2_i32 = arith.constant 2 : i32
    %86 = arith.index_cast %c2_i32 : i32 to index
    %c0_21 = arith.constant 0 : index
    %c0_22 = arith.constant 0 : index
    %87 = vector.load %arg1[%86, %c0_21, %c0_22] : memref<4x8x256xbf16, #tpu.memory_space<vmem>>, vector<1x8x256xbf16>
    %88 = vector.shape_cast %87 : vector<1x8x256xbf16> to vector<8x256xbf16>
    %cst_23 = arith.constant dense<0.000000e+00> : vector<9x256xf32>
    %89 = tpu.matmul %0, %88, %cst_23 {dimension_numbers = #tpu.dot_dimension_numbers<[1], [0], [0], [1], [0, 0, 1, 1], [], []>} : vector<9x8xbf16>, vector<8x256xbf16>, vector<9x256xf32> -> vector<9x256xf32>
    %90 = vector.broadcast %1 : vector<9x1xf32> to vector<9x256xf32>
    %91 = arith.addf %89, %90 : vector<9x256xf32>
    %92 = vector.broadcast %cst_5 : f32 to vector<9x256xf32>
    %93 = arith.mulf %92, %91 : vector<9x256xf32>
    %94 = arith.maximumf %91, %93 : vector<9x256xf32>
    %95 = arith.truncf %94 : vector<9x256xf32> to vector<9x256xbf16>
    %cst_24 = arith.constant dense<0.000000e+00> : vector<208x256xf32>
    %96 = tpu.matmul %2, %95, %cst_24 {dimension_numbers = #tpu.dot_dimension_numbers<[1], [0], [0], [1], [0, 0, 1, 1], [], []>} : vector<208x9xbf16>, vector<9x256xbf16>, vector<208x256xf32> -> vector<208x256xf32>
    %97 = arith.truncf %96 : vector<208x256xf32> to vector<208x256xbf16>
    %98 = vector.extract_strided_slice %97 {offsets = [0, 0], sizes = [96, 256], strides = [1, 1]} : vector<208x256xbf16> to vector<96x256xbf16>
    %99 = vector.shape_cast %98 : vector<96x256xbf16> to vector<12x8x256xbf16>
    %100 = vector.extract_strided_slice %97 {offsets = [96, 0], sizes = [96, 256], strides = [1, 1]} : vector<208x256xbf16> to vector<96x256xbf16>
    %101 = vector.shape_cast %100 : vector<96x256xbf16> to vector<12x8x256xbf16>
    %102 = vector.extract_strided_slice %97 {offsets = [192, 0], sizes = [12, 256], strides = [1, 1]} : vector<208x256xbf16> to vector<12x256xbf16>
    %103 = vector.shape_cast %88 : vector<8x256xbf16> to vector<1x8x256xbf16>
    %104 = vector.broadcast %103 : vector<1x8x256xbf16> to vector<12x8x256xbf16>
    %105 = arith.mulf %101, %104 : vector<12x8x256xbf16>
    %106 = arith.extf %105 : vector<12x8x256xbf16> to vector<12x8x256xf32>
    %cst_25 = arith.constant dense<0.000000e+00> : vector<12x256xf32>
    %107 = vector.multi_reduction <add>, %106, %cst_25 [1] : vector<12x8x256xf32> to vector<12x256xf32>
    %108 = arith.truncf %107 : vector<12x256xf32> to vector<12x256xbf16>
    %109 = arith.mulf %102, %108 : vector<12x256xbf16>
    %110 = vector.shape_cast %109 : vector<12x256xbf16> to vector<12x1x256xbf16>
    %111 = vector.broadcast %110 : vector<12x1x256xbf16> to vector<12x8x256xbf16>
    %112 = arith.mulf %99, %111 : vector<12x8x256xbf16>
    %113 = arith.extf %112 : vector<12x8x256xbf16> to vector<12x8x256xf32>
    %cst_26 = arith.constant dense<0.000000e+00> : vector<8x256xf32>
    %114 = vector.multi_reduction <add>, %113, %cst_26 [0] : vector<12x8x256xf32> to vector<8x256xf32>
    %115 = arith.truncf %114 : vector<8x256xf32> to vector<8x256xbf16>
    %116 = arith.extf %88 : vector<8x256xbf16> to vector<8x256xf32>
    %117 = arith.mulf %116, %116 : vector<8x256xf32>
    %cst_27 = arith.constant dense<0.000000e+00> : vector<256xf32>
    %118 = vector.multi_reduction <add>, %117, %cst_27 [0] : vector<8x256xf32> to vector<256xf32>
    %119 = vector.shape_cast %118 : vector<256xf32> to vector<1x256xf32>
    %120 = vector.broadcast %cst_6 : f32 to vector<1x256xf32>
    %121 = arith.mulf %119, %120 : vector<1x256xf32>
    %122 = math.exp %121 : vector<1x256xf32>
    %123 = arith.extf %115 : vector<8x256xbf16> to vector<8x256xf32>
    %124 = vector.broadcast %122 : vector<1x256xf32> to vector<8x256xf32>
    %125 = arith.mulf %124, %123 : vector<8x256xf32>
    %126 = arith.addf %85, %125 : vector<8x256xf32>
    %c3_i32 = arith.constant 3 : i32
    %127 = arith.index_cast %c3_i32 : i32 to index
    %c0_28 = arith.constant 0 : index
    %c0_29 = arith.constant 0 : index
    %128 = vector.load %arg1[%127, %c0_28, %c0_29] : memref<4x8x256xbf16, #tpu.memory_space<vmem>>, vector<1x8x256xbf16>
    %129 = vector.shape_cast %128 : vector<1x8x256xbf16> to vector<8x256xbf16>
    %cst_30 = arith.constant dense<0.000000e+00> : vector<9x256xf32>
    %130 = tpu.matmul %0, %129, %cst_30 {dimension_numbers = #tpu.dot_dimension_numbers<[1], [0], [0], [1], [0, 0, 1, 1], [], []>} : vector<9x8xbf16>, vector<8x256xbf16>, vector<9x256xf32> -> vector<9x256xf32>
    %131 = vector.broadcast %1 : vector<9x1xf32> to vector<9x256xf32>
    %132 = arith.addf %130, %131 : vector<9x256xf32>
    %133 = vector.broadcast %cst_5 : f32 to vector<9x256xf32>
    %134 = arith.mulf %133, %132 : vector<9x256xf32>
    %135 = arith.maximumf %132, %134 : vector<9x256xf32>
    %136 = arith.truncf %135 : vector<9x256xf32> to vector<9x256xbf16>
    %cst_31 = arith.constant dense<0.000000e+00> : vector<208x256xf32>
    %137 = tpu.matmul %2, %136, %cst_31 {dimension_numbers = #tpu.dot_dimension_numbers<[1], [0], [0], [1], [0, 0, 1, 1], [], []>} : vector<208x9xbf16>, vector<9x256xbf16>, vector<208x256xf32> -> vector<208x256xf32>
    %138 = arith.truncf %137 : vector<208x256xf32> to vector<208x256xbf16>
    %139 = vector.extract_strided_slice %138 {offsets = [0, 0], sizes = [96, 256], strides = [1, 1]} : vector<208x256xbf16> to vector<96x256xbf16>
    %140 = vector.shape_cast %139 : vector<96x256xbf16> to vector<12x8x256xbf16>
    %141 = vector.extract_strided_slice %138 {offsets = [96, 0], sizes = [96, 256], strides = [1, 1]} : vector<208x256xbf16> to vector<96x256xbf16>
    %142 = vector.shape_cast %141 : vector<96x256xbf16> to vector<12x8x256xbf16>
    %143 = vector.extract_strided_slice %138 {offsets = [192, 0], sizes = [12, 256], strides = [1, 1]} : vector<208x256xbf16> to vector<12x256xbf16>
    %144 = vector.shape_cast %129 : vector<8x256xbf16> to vector<1x8x256xbf16>
    %145 = vector.broadcast %144 : vector<1x8x256xbf16> to vector<12x8x256xbf16>
    %146 = arith.mulf %142, %145 : vector<12x8x256xbf16>
    %147 = arith.extf %146 : vector<12x8x256xbf16> to vector<12x8x256xf32>
    %cst_32 = arith.constant dense<0.000000e+00> : vector<12x256xf32>
    %148 = vector.multi_reduction <add>, %147, %cst_32 [1] : vector<12x8x256xf32> to vector<12x256xf32>
    %149 = arith.truncf %148 : vector<12x256xf32> to vector<12x256xbf16>
    %150 = arith.mulf %143, %149 : vector<12x256xbf16>
    %151 = vector.shape_cast %150 : vector<12x256xbf16> to vector<12x1x256xbf16>
    %152 = vector.broadcast %151 : vector<12x1x256xbf16> to vector<12x8x256xbf16>
    %153 = arith.mulf %140, %152 : vector<12x8x256xbf16>
    %154 = arith.extf %153 : vector<12x8x256xbf16> to vector<12x8x256xf32>
    %cst_33 = arith.constant dense<0.000000e+00> : vector<8x256xf32>
    %155 = vector.multi_reduction <add>, %154, %cst_33 [0] : vector<12x8x256xf32> to vector<8x256xf32>
    %156 = arith.truncf %155 : vector<8x256xf32> to vector<8x256xbf16>
    %157 = arith.extf %129 : vector<8x256xbf16> to vector<8x256xf32>
    %158 = arith.mulf %157, %157 : vector<8x256xf32>
    %cst_34 = arith.constant dense<0.000000e+00> : vector<256xf32>
    %159 = vector.multi_reduction <add>, %158, %cst_34 [0] : vector<8x256xf32> to vector<256xf32>
    %160 = vector.shape_cast %159 : vector<256xf32> to vector<1x256xf32>
    %161 = vector.broadcast %cst_6 : f32 to vector<1x256xf32>
    %162 = arith.mulf %160, %161 : vector<1x256xf32>
    %163 = math.exp %162 : vector<1x256xf32>
    %164 = arith.extf %156 : vector<8x256xbf16> to vector<8x256xf32>
    %165 = vector.broadcast %163 : vector<1x256xf32> to vector<8x256xf32>
    %166 = arith.mulf %165, %164 : vector<8x256xf32>
    %167 = arith.addf %126, %166 : vector<8x256xf32>
    %c4_i32 = arith.constant 4 : i32
    %cst_35 = arith.constant 2.500000e-01 : f32
    %168 = vector.broadcast %cst_35 : f32 to vector<8x256xf32>
    %169 = arith.mulf %167, %168 : vector<8x256xf32>
    %c0_36 = arith.constant 0 : index
    %c0_37 = arith.constant 0 : index
    %170 = vector.load %arg5[%c0_36, %c0_37] : memref<8x256xf32, #tpu.memory_space<vmem>>, vector<8x256xf32>
    tpu.vector_store %arg5[%c0_36, %c0_37], %169 {strides = array<i32>} : memref<8x256xf32, #tpu.memory_space<vmem>>, vector<8x256xf32>,
    return
  }
  func.func @transform_0(%arg0: i32) -> (i32, i32, i32) {
    %c0_i32 = arith.constant 0 : i32
    %c0_i32_0 = arith.constant 0 : i32
    %c0_i32_1 = arith.constant 0 : i32
    return %c0_i32, %c0_i32_0, %arg0 : i32, i32, i32
  }
  func.func @transform_1(%arg0: i32) -> (i32, i32) {
    %c0_i32 = arith.constant 0 : i32
    %c0_i32_0 = arith.constant 0 : i32
    %c0_i32_1 = arith.constant 0 : i32
    return %c0_i32, %c0_i32_0 : i32, i32
  }
  func.func @transform_2(%arg0: i32) -> (i32, i32) {
    %c0_i32 = arith.constant 0 : i32
    %c0_i32_0 = arith.constant 0 : i32
    %c0_i32_1 = arith.constant 0 : i32
    return %c0_i32, %c0_i32_0 : i32, i32
  }
  func.func @transform_3(%arg0: i32) -> (i32, i32) {
    %c0_i32 = arith.constant 0 : i32
    %c0_i32_0 = arith.constant 0 : i32
    %c0_i32_1 = arith.constant 0 : i32
    return %c0_i32, %c0_i32_0 : i32, i32
  }
  func.func @transform_4(%arg0: i32) -> (i32, i32) {
    %c0_i32 = arith.constant 0 : i32
    %c0_i32_0 = arith.constant 0 : i32
    return %c0_i32, %arg0 : i32, i32
  }
}

</mosaic_0001>

<bundles_post_ra>
// kernel: tpu_custom_call.1
= control target key start
LH: loop header
LB: loop body
LE: loop exit
PB: predicated region body
PF: predicated region fallthrough
CT: control target
= control target key end

     0   :  { %s7952_s0 = inlined_call_operand.hbm [shape: bf16[4,8,512], index: 0, kind: input, shape index: {}]   ;;  %s7953_s1 = inlined_call_operand.hbm [shape: bf16[9,8], index: 1, kind: input, shape index: {}]   ;;  %s7954_s2 = inlined_call_operand.hbm [shape: f32[9,1], index: 2, kind: input, shape index: {}]   ;;  %s7955_s3 = inlined_call_operand.hbm [shape: bf16[208,9], index: 3, kind: input, shape index: {}]   ;;  %s7956_s4 = inlined_call_operand.hbm [shape: f32[8,512], index: 4, kind: output, shape index: {}]  }
   0x1   :  { %8078 = sst [smem:[#allocation89_spill]] %s7953_s1 }
   0x2   :  { %9 = vsyncpa [#allocation3], 0 }
   0x3   :  { %11 = vsyncpa [#allocation3 + $0x1], 0 }
   0x4   :  { %12 = vsyncpa [#allocation6], 0 }
   0x5   :  { %13 = vsyncpa [#allocation9], 0 }
   0x6   :  { %14 = vsyncpa [#allocation4], 0 }
   0x7   :  { %16 = vsyncpa [#allocation4 + $0x1], 0  ;;  %s5917_s15 = smov 0   ;;  %s5919_s16 = smov 0  }
   0x8   :  { %s5921_s17 = smov 0   ;;  %s5923_s18 = smov 0  }
   0x9 LB: > { %s5938_s19 = sadd.s32 4294967295, %s5877_s18   ;;  %s5173_s20 = sadd.s32 4294967294, %s5877_s18   ;;  %s5877_s18 = sphi %s5923_s18, %s8440_s18   ;;  %s5873_s17 = sphi %s5921_s17, %s8444_s17   ;;  %s5869_s16 = sphi %s5919_s16, %s8443_s16   ;;  %s5865_s15 = sphi %s5917_s15, %s8442_s15  }
   0xa   : > { %s5942_s21 = sadd.s32 1, %s5877_s18   ;;  %s29_s22 = sadd.s32 1, %s5873_s17 }
   0xb   : > { %8079 = sst [smem:[#allocation15_spill]] %s5942_s21  ;;  %s26_s23 = ssub.s32 %s5877_s18, %s5942_s21 }
   0xc   : > { %p36_p0 = scmp.ne.s32.totalorder %s5873_s17, %s5869_s16  ;;  %p27_p1 = scmp.eq.s32.totalorder %s26_s23, 0 }
   0xd   : > { %p37_p2 = scmp.eq.s32.totalorder %s5877_s18, 0  ;;  %p42_p3 = scmp.ne.s32.totalorder %s5869_s16, %s5865_s15 }
   0xe   : > { %p7957_p4 = scmp.eq.s32.totalorder %s5938_s19, 0  ;;  %p129_p7 = scmp.eq.s32.totalorder %s5938_s19, 1 }
   0xf   : > { %s5954_s24 = scalar_select %p27_p1, %s5873_s17, %s29_s22  }
  0x10   : > { %p5956_p5 = por %p37_p2, %p36_p0  ;;  %p5962_p6 = por %p7957_p4, %p42_p3 }
  0x11   : > { %8080 = sst [smem:[#allocation16_spill]] %s5954_s24  ;;  %p135_p8 = scmp.eq.s32.totalorder %s5173_s20, 1 }
  0x12   : > { %s8081_s25 = scalar_select %p5956_p5, 1, 0 }
  0x13   : > { %s8082_s26 = scalar_select %p5962_p6, 1, 0 }
  0x14   : > { %p5174_p9 = scmp.ge.s32.totalorder %s5877_s18, 1  ;;  %p142_p10 = scmp.lt.s32.totalorder %s5877_s18, 3 }
  0x15   : > { %p5969_p11 = por %p129_p7, %p36_p0  ;;  %p5973_p12 = por %p135_p8, %p42_p3 }
  0x16   : > { %p5977_p13 = pnand %p5174_p9, %p142_p10  ;;  %s5879_s30 = smov [#allocation5]  }
  0x17   : > { %s8083_s27 = scalar_select %p5969_p11, 1, 0 }
  0x18   : > { %s8084_s28 = scalar_select %p5973_p12, 1, 0 }
  0x19   : > { %s8085_s29 = scalar_select %p5977_p13, 1, 0 }
  0x1a   : > { %p5560_p1 = pneg %p5977_p13  ;;  %s154_s5 = sshll.u32 %s5879_s30, 4  ;;  %s155_s5 = int_to_ptr.vmem [resolvable:$true] %s154_s5 }
  0x1b   : > { %s5880_s7 = smov [#allocation7]   ;;  %s8087_s1 = sld [smem:[#allocation89_spill]] }
  0x1c   : > { %p5985_p2 = pnand %p5560_p1, %p7957_p4  ;;  %s167_s8 = sshll.u32 %s5880_s7, 4  ;;  %s168_s8 = int_to_ptr.vmem [resolvable:$true] %s167_s8 }
  0x1e   : > { %p5999_p8 = pneg %p5985_p2 }
  0x21   : > { %s5689_s11 = scalar_lea.hbm %s8087_s1, 128 }
  0x22   : > { %p5690_p7 = scmp.ne.s32.totalorder %s8087_s1, %s5689_s11  ;;  %p5696_p1 = scmp.lt.u32.totalorder %s5689_s11, %s8087_s1 }
  0x24   : > { %p5692_p9 = pnand %p5999_p8, %p5690_p7 }
  0x26   : > { %p5693_p10 = pneg %p5692_p9 }
  0x28   : > { %p5698_p0 = pnand %p5696_p1, %p5693_p10 }
  0x2a   : > { %5701 = shalt.err (!%p5698_p0)
}
  0x2b   : > { %s5702_s23 = scalar_lea.vmem %s155_s5, 128  ;;  %p5710_p11 = scmp.lt.s32.totalorder %s155_s5, %s155_s5 }
  0x2c   : > { %p5703_p4 = scmp.ne.s32.totalorder %s155_s5, %s5702_s23  ;;  %p5711_p6 = scmp.lt.s32.totalorder %s5702_s23, %s5702_s23 }
  0x2e   : > { %p5705_p3 = pnand %p5703_p4, %p5999_p8  ;;  %p5712_p13 = por %p5711_p6, %p5710_p11 }
  0x30   : > { %p5706_p12 = pneg %p5705_p3 }
  0x32   : > { %p5713_p5 = pnand %p5712_p13, %p5706_p12 }
  0x34   : > { %5716 = shalt.err (!%p5713_p5)
}
  0x35   : > { %s7962_s30 = smov 64   ;;  %s7963_s7 = smov 4  }
  0x36   : > { %5563 = dma.hbm_to_vmem [thread:$0]  (!%p5985_p2), %s8087_s1, 128, %s155_s5, [#allocation6], %s7962_s30, %s7962_s30, %s7963_s7  }
  0x37   : > { %p8089_p4 = scmp.ne.s32.totalorder %s8081_s25, 0  ;;  %p8090_p0 = scmp.lt.s32.totalorder %s5877_s18, 2 }
  0x38   : > { %s5717_s20 = scalar_lea.hbm %s7954_s2, 256 }
  0x39   : > { %p6022_p3 = pnand %p8090_p0, %p8089_p4  ;;  %p5718_p5 = scmp.ne.s32.totalorder %s7954_s2, %s5717_s20 }
  0x3a   : > { %p5724_p12 = scmp.lt.u32.totalorder %s5717_s20, %s7954_s2 }
  0x3b   : > { %s8091_s11 = scalar_select %p6022_p3, 1, 0 }
  0x3c   : > { %p5720_p6 = pnand %p5718_p5, %p5999_p8 }
  0x3e   : > { %p5721_p11 = pneg %p5720_p6 }
  0x40   : > { %p5726_p13 = pnand %p5724_p12, %p5721_p11 }
  0x42   : > { %5729 = shalt.err (!%p5726_p13)
}
  0x43   : > { %s5730_s25 = scalar_lea.vmem %s168_s8, 256  ;;  %p5738_p1 = scmp.lt.s32.totalorder %s168_s8, %s168_s8 }
  0x44   : > { %p5731_p7 = scmp.ne.s32.totalorder %s168_s8, %s5730_s25  ;;  %p5739_p4 = scmp.lt.s32.totalorder %s5730_s25, %s5730_s25 }
  0x46   : > { %p5733_p9 = pnand %p5731_p7, %p5999_p8  ;;  %p5740_p0 = por %p5739_p4, %p5738_p1 }
  0x48   : > { %p5734_p10 = pneg %p5733_p9 }
  0x4a   : > { %p5741_p3 = pnand %p5740_p0, %p5734_p10 }
  0x4c   : > { %5744 = shalt.err (!%p5741_p3)
}
  0x4d   : > { %s5883_s10 = smov 128   ;;  %s5884_s12 = smov 8  }
  0x4e   : > { %5566 = dma.hbm_to_vmem [thread:$0]  (!%p5985_p2), %s7954_s2, 256, %s168_s8, [#allocation6], %s5883_s10, %s5883_s10, %s5884_s12  }
  0x4f   : > { %s5885_s22 = smov [#allocation8]   ;;  %s194_s9 = sand.u32 1, %s5873_s17  }
  0x50   : > { %s180_s23 = sshll.u32 %s5885_s22, 4  ;;  %s5745_s30 = scalar_lea.hbm %s7955_s3, 1664  ;;  %s181_s23 = int_to_ptr.vmem [resolvable:$true] %s180_s23 }
  0x51   : > { %p5746_p3 = scmp.ne.s32.totalorder %s7955_s3, %s5745_s30  ;;  %p5752_p11 = scmp.lt.u32.totalorder %s5745_s30, %s7955_s3 }
  0x53   : > { %p5748_p5 = pnand %p5746_p3, %p5999_p8 }
  0x55   : > { %p5749_p6 = pneg %p5748_p5 }
  0x57   : > { %p5754_p12 = pnand %p5752_p11, %p5749_p6 }
  0x59   : > { %5757 = shalt.err (!%p5754_p12)
}
  0x5a   : > { %s5758_s8 = scalar_lea.vmem %s181_s23, 1664  ;;  %p5766_p10 = scmp.lt.s32.totalorder %s181_s23, %s181_s23 }
  0x5b   : > { %p5759_p13 = scmp.ne.s32.totalorder %s181_s23, %s5758_s8  ;;  %p5767_p1 = scmp.lt.s32.totalorder %s5758_s8, %s5758_s8 }
  0x5d   : > { %p5761_p7 = pnand %p5759_p13, %p5999_p8  ;;  %p5768_p4 = por %p5767_p1, %p5766_p10 }
  0x5f   : > { %p5762_p9 = pneg %p5761_p7 }
  0x61   : > { %p5769_p0 = pnand %p5768_p4, %p5762_p9 }
  0x63   : > { %5772 = shalt.err (!%p5769_p0)
}
  0x64   : > { %s8092_s1 = smov 4   ;;  %s8093_s7 = smov 64  }
  0x65   : > { %5569 = dma.hbm_to_vmem [thread:$0]  (!%p5985_p2), %s7955_s3, 1664, %s181_s23, [#allocation9], %s8093_s7, %s8093_s7, %s8092_s1  }
  0x66   : > { %s5179_s14 = sshll.u32 %s194_s9, 5  ;;  %s5446_s30 = sshll.u32 %s5877_s18, 7 }
  0x67   : > { %s6073_s22 = scalar_lea.hbm %s7952_s0, %s5446_s30  ;;  %s198_s6 = scalar_lea.vmem [#allocation2], %s5179_s14 }
  0x68   : > { %s205_s5 = sshll.u32 %s198_s6, 4  ;;  %s6077_s25 = scalar_lea.sflag [#allocation3], %s194_s9  ;;  %s6075_s5 = int_to_ptr.vmem [resolvable:$true] %s205_s5 }
  0x69   : > { %s5773_s8 = scalar_lea.hbm %s6073_s22, 512  ;;  %p8094_p2 = scmp.ne.s32.totalorder %s8091_s11, 0 }
  0x6a   : > { %p5774_p8 = scmp.ne.s32.totalorder %s6073_s22, %s5773_s8  ;;  %s5778_s7 = scalar_lea.hbm %s7952_s0, 1024 }
  0x6b   : > { %p5775_p3 = pneg %p8094_p2  ;;  %p5779_p11 = scmp.lt.u32.totalorder %s6073_s22, %s7952_s0 }
  0x6c   : > { %p5780_p12 = scmp.lt.u32.totalorder %s5778_s7, %s5773_s8  ;;  %p5782_p7 = scmp.lt.u32.totalorder %s5773_s8, %s6073_s22 }
  0x6d   : > { %p5776_p5 = pnand %p5775_p3, %p5774_p8 }
  0x6e   : > { %p5781_p13 = por %p5780_p12, %p5779_p11 }
  0x6f   : > { %p5777_p6 = pneg %p5776_p5 }
  0x70   : > { %p5783_p9 = por %p5782_p7, %p5781_p13 }
  0x72   : > { %p5784_p10 = pnand %p5783_p9, %p5777_p6 }
  0x74   : > { %5787 = shalt.err (!%p5784_p10)
}
  0x75   : > { %s5788_s9 = scalar_lea.vmem %s6075_s5, 512  ;;  %s5886_s14 = smov [#allocation2]  }
  0x76   : > { %p5789_p1 = scmp.ne.s32.totalorder %s6075_s5, %s5788_s9  ;;  %s5793_s30 = sshll.u32 %s5886_s14, 4  ;;  %s5794_s30 = int_to_ptr.vmem [resolvable:$false] %s5793_s30 }
  0x77   : > { %s5795_s13 = scalar_lea.vmem %s5794_s30, 1024  ;;  %p5796_p8 = scmp.lt.s32.totalorder %s6075_s5, %s5794_s30 }
  0x78   : > { %p5791_p4 = pnand %p5789_p1, %p5775_p3  ;;  %p5797_p5 = scmp.lt.s32.totalorder %s5795_s13, %s5788_s9 }
  0x7a   : > { %p5792_p0 = pneg %p5791_p4  ;;  %p5798_p11 = por %p5797_p5, %p5796_p8 }
  0x7c   : > { %p5799_p12 = pnand %p5798_p11, %p5792_p0 }
  0x7e   : > { %5802 = shalt.err (!%p5799_p12)
}
  0x7f   : > { %s5887_s20 = smov 256   ;;  %p8095_p3 = scmp.ne.s32.totalorder %s8085_s29, 0 }
  0x80   : > { %5573 = dma.hbm_to_vmem [thread:$0]  (!%p8094_p2), %s6073_s22, 512, %s6075_s5, %s6077_s25, %s5887_s20, %s5883_s10, %s5884_s12  }
  0x81   : > { %217 = sbr.rel (%p8095_p3) target bundleno = 1418 (0x58a), region = 36 }
  0x88   : > { %s6110_s6 = sand.u32 1, %s5869_s16   ;;  %p8096_p6 = scmp.ne.s32.totalorder %s8082_s26, 0 }
  0x89   : > { %s5183_s8 = sshll.u32 %s6110_s6, 5  ;;  %s220_s23 = scalar_lea.sflag [#allocation3], %s6110_s6 }
  0x8a   : > { %s6114_s1 = scalar_lea.vmem [#allocation2], %s5183_s8 }
  0x8b   : > { %5848 = dma.done.wait (%p8096_p6), %s220_s23, 512  }
  0x8c   : > { %5850 = vsyncadd (%p8096_p6), %s220_s23, 4294966784  ;;  %p8097_p2 = scmp.eq.s32.totalorder %s5938_s19, 0 }
  0x8e   : > { %5852 = dma.done.wait (%p8097_p2), [#allocation6], 384   ;;  %p8098_p13 = pmov %p8097_p2 }
  0x8f   : > { %p8099_p7 = pmov %p8097_p2 }
  0x90   : > { %5854 = vsyncadd (%p8098_p13), [#allocation6], 4294966912 }
  0x91   : > { %5856 = dma.done.wait (%p8099_p7), [#allocation9], 1664   ;;  %p8100_p9 = pmov %p8097_p2 }
  0x92   : > { %v7966_v0 = vmov 0   ;;  %v6132_v1 = vld [vmem:[%s6114_s1] sm:$0xff]  ;;  %vm318_vm0 = vcmask 1043456   ;;  %v6135_v2 = vld [vmem:[%s6114_s1 + $0x8] sm:$0xff]  ;;  %vm314_vm1 = vcmask 64512   ;;  %vm483_vm2 = vcmask 1044480  }
  0x93   : > { %5858 = vsyncadd (%p8100_p9), [#allocation9], 4294965632  ;;  %357 = vmatprep.mubr.bf16.mxu1 %v7966_v0  ;;  %1629 = vmatprep.mubr.bf16.mxu0 %v7966_v0  ;;  %v5190_v3 = vcombine.high %v6132_v1, %v6132_v1  ;;  %v5263_v4 = vcombine.high %v6135_v2, %v6135_v2  ;;  %v5189_v5 = vcombine.low %v6132_v1, %v6132_v1  ;;  %v6145_v7 = vld [vmem:[#allocation5] sm:$0x1f]   ;;  %v265_v8 = vld [vmem:[#allocation7] sm:$0xff]  ;;  %v5889_v36 = vmov 65535  }
  0x94   : > { %5629 = vset.pattern.permute.xlu0 %v7966_v0  ;;  %v5262_v6 = vcombine.low %v6135_v2, %v6135_v2  ;;  %v266_v9 = vld [vmem:[#allocation7 + $0x8] sm:$0x1]  ;;  %v484_v37 = vsel %vm318_vm0, 4294967295, %v5889_v36  ;;  %v5381_v52 = vld [vmem:[%s6114_s1 + $0x18] sm:$0xff]  ;;  %vm443_vm3 = vcmask 72704   ;;  %vm1053_vm4 = vcmask 1041409  }
  0x95   : > { %296 = vperm.xlu0 %5629, %v265_v8   ;;  %5191 = vmatprep.subr.msk.bf16.mxu1 %vm318_vm0, %v5190_v3  ;;  %v320_v10 = vsel %vm318_vm0, %v5189_v5, 0  ;;  %v5321_v48 = vld [vmem:[%s6114_s1 + $0x10] sm:$0xff]  ;;  %v6171_v50 = vsel %vm483_vm2, %v484_v37, 0  ;;  %v5383_v59 = vcombine.high %v5381_v52, %v5381_v52  ;;  %v5382_v62 = vcombine.low %v5381_v52, %v5381_v52  ;;  %v5635_v63 = vld [vmem:[#allocation8] sm:$0xff]   ;;  %v5640_v5 = vld [vmem:[#allocation8 + $0x8] sm:$0xff]   ;;  %s5187_s26 = sshll.u32 %s6110_s6, 4 }
  0x96   : > { %5264 = vmatprep.subr.msk.bf16.mxu0 %vm318_vm0, %v5263_v4  ;;  %v1592_v11 = vsel %vm318_vm0, %v5262_v6, 0  ;;  %326 = vmatpush1.bf16.msra.mxu1 %v320_v10  ;;  %8103 = vst [vmem:[#allocation19_spill] sm:$0xff] %v6171_v50  ;;  %v5323_v55 = vcombine.high %v5321_v48, %v5321_v48  ;;  %v5322_v58 = vcombine.low %v5321_v48, %v5321_v48  ;;  %v5641_v6 = vld [vmem:[#allocation8 + $0x10] sm:$0xff]   ;;  %v5642_v8 = vld [vmem:[#allocation8 + $0x18] sm:$0xff]   ;;  %v5644_v10 = vld [vmem:[#allocation8 + $0x28] sm:$0xff]   ;;  %vm1055_vm5 = vcmask 1042434  }
  0x97   : > { %1598 = vmatpush1.bf16.msra.mxu0 %v1592_v11  ;;  %v3906_v4 = vsel %vm318_vm0, %v5382_v62, 0  ;;  %v5645_v11 = vld [vmem:[#allocation8 + $0x30] sm:$0xff]   ;;  %vm1057_vm6 = vcmask 1043459   ;;  %vm1059_vm7 = vcmask 1044484   ;;  %vm1061_vm8 = vcmask 1045509   ;;  %s5543_s29 = sshll.u32 %s5938_s19, 8 }
  0x98   : > { %v2749_v3 = vsel %vm318_vm0, %v5322_v58, 0  ;;  %vm1063_vm9 = vcmask 1046534   ;;  %vm1065_vm10 = vcmask 1047559   ;;  %s259_s11 = scalar_lea.vmem [#allocation10], %s5187_s26  ;;  %s7908_s5 = scalar_lea.hbm %s7956_s4, %s5543_s29 }
  0x99   : > { %301 = vperm.xlu0 %5629, %v266_v9   ;;  %5192 = vmatmul.mubr.msk.bf16.vlgmr.msra.gmra.mrb[0].mxu1 %vm314_vm1, %v6145_v7  ;;  %v5643_v9 = vld [vmem:[#allocation8 + $0x20] sm:$0xff]   ;;  %s5074_s10 = sshll.u32 %s259_s11, 4  ;;  %s5060_s25 = scalar_lea.sflag [#allocation4], %s6110_s6  ;;  %s7910_s10 = int_to_ptr.vmem [resolvable:$true] %s5074_s10 }
  0x9a   : > { %5265 = vmatmul.mubr.msk.bf16.vlgmr.msra.gmra.mrb[0].mxu0 %vm314_vm1, %v6145_v7  ;;  %524 = vmatprep.mubr.bf16.mxu1 %v7966_v0  ;;  %s5803_s7 = scalar_lea.vmem %s7910_s10, 256  ;;  %p8437_p1 = scmp.ne.s32.totalorder %s8083_s27, 0 }
  0x9b   : > { %1688 = vmatprep.mubr.bf16.mxu0 %v7966_v0  ;;  %p5804_p10 = scmp.ne.s32.totalorder %s7910_s10, %s5803_s7  ;;  %s5891_s19 = smov [#allocation10]  }
  0x9c   : > { %s5807_s21 = sshll.u32 %s5891_s19, 4  ;;  %s5808_s21 = int_to_ptr.vmem [resolvable:$false] %s5807_s21 }
  0x9d   : > { %p5805_p4 = pnand %p5804_p10, %p8437_p1  ;;  %s5809_s24 = scalar_lea.vmem %s5808_s21, 512 }
  0x9e   : > { %p5810_p8 = scmp.lt.s32.totalorder %s7910_s10, %s5808_s21  ;;  %p5811_p5 = scmp.lt.s32.totalorder %s5809_s24, %s5803_s7 }
  0x9f   : > { %p5806_p0 = pneg %p5805_p4 }
  0xa0   : > { %p5812_p11 = por %p5811_p5, %p5810_p8 }
  0xa2   : > { %p5813_p12 = pnand %p5812_p11, %p5806_p0 }
 0x114   : > { %v6157_v12 = vpop.permute.xlu0 %296 }
 0x115   : > { %8101 = vst [vmem:[#allocation17_spill] sm:$0xff] %v6157_v12 }
 0x118   : > { %v6159_v13 = vpop.permute.xlu0 %301 }
 0x119   : > { %8102 = vst [vmem:[#allocation18_spill] sm:$0xff] %v6159_v13 }
 0x16c   : > { %v359_v14 = vpop.f32.mrb[0].mxu1 }
 0x16d   : > { %v1631_v15 = vpop.f32.mrb[0].mxu0  ;;  %v360_v16 = vadd.f32 %v359_v14, %v6157_v12  ;;  %v361_v18 = vpop.f32.mrb[1].mxu1  ;;  %v5646_v14 = vld [vmem:[#allocation8 + $0x38] sm:$0xff]  }
 0x16e   : > { %v1632_v17 = vadd.f32 %v1631_v15, %v6157_v12  ;;  %v1633_v19 = vpop.f32.mrb[1].mxu0  ;;  %v362_v20 = vadd.f32 %v361_v18, %v6157_v12  ;;  %v363_v22 = vpop.f32.mrb[2].mxu1  ;;  %v5647_v15 = vld [vmem:[#allocation8 + $0x40] sm:$0xff]   ;;  %v5650_v18 = vld [vmem:[#allocation8 + $0x58] sm:$0xff]  }
 0x16f   : > { %v1634_v21 = vadd.f32 %v1633_v19, %v6157_v12  ;;  %v1635_v23 = vpop.f32.mrb[2].mxu0  ;;  %v368_v24 = vmul.f32 0.2, %v360_v16  ;;  %v364_v26 = vadd.f32 %v363_v22, %v6159_v13  ;;  %v365_v28 = vpop.f32.mrb[3].mxu1  ;;  %v5651_v19 = vld [vmem:[#allocation8 + $0x60] sm:$0xff]  }
 0x170   : > { %v1640_v25 = vmul.f32 0.2, %v1632_v17  ;;  %v1636_v27 = vadd.f32 %v1635_v23, %v6159_v13  ;;  %v1637_v29 = vpop.f32.mrb[3].mxu0  ;;  %v369_v30 = vmul.f32 0.2, %v362_v20  ;;  %v366_v32 = vadd.f32 %v365_v28, %v6159_v13 }
 0x171   : > { %v1641_v31 = vmul.f32 0.2, %v1634_v21  ;;  %v1638_v33 = vadd.f32 %v1637_v29, %v6159_v13  ;;  %v370_v34 = vmul.f32 0.2, %v364_v26  ;;  %v372_v40 = vmax.f32 %v360_v16, %v368_v24  ;;  %v5648_v16 = vld [vmem:[#allocation8 + $0x48] sm:$0xff]  }
 0x172   : > { %v1642_v35 = vmul.f32 0.2, %v1636_v27  ;;  %v371_v38 = vmul.f32 0.2, %v366_v32  ;;  %v1644_v41 = vmax.f32 %v1632_v17, %v1640_v25  ;;  %v373_v44 = vmax.f32 %v362_v20, %v369_v30  ;;  %v5649_v17 = vld [vmem:[#allocation8 + $0x50] sm:$0xff]  }
 0x173   : > { %v1643_v39 = vmul.f32 0.2, %v1638_v33  ;;  %v374_v42 = vmax.f32 %v364_v26, %v370_v34  ;;  %v1645_v45 = vmax.f32 %v1634_v21, %v1641_v31 }
 0x174   : > { %v1646_v43 = vmax.f32 %v1636_v27, %v1642_v35  ;;  %v375_v46 = vmax.f32 %v366_v32, %v371_v38 }
 0x175   : > { %v1647_v47 = vmax.f32 %v1638_v33, %v1643_v39  ;;  %v376_v49 = vpack.c.bf16 %v374_v42, %v372_v40 }
 0x176   : > { %v1648_v51 = vpack.c.bf16 %v1646_v43, %v1644_v41  ;;  %v377_v53 = vpack.c.bf16 %v375_v46, %v373_v44 }
 0x177   : > { %v1649_v54 = vpack.c.bf16 %v1647_v47, %v1645_v45  ;;  %v487_v60 = vand.u32 %v6171_v50, %v376_v49 }
 0x178   : > { %v490_v56 = vand.u32 %v6171_v50, %v377_v53  ;;  %v1651_v61 = vand.u32 %v1648_v51, %v6171_v50 }
 0x179   : > { %v1654_v57 = vand.u32 %v1649_v54, %v6171_v50 }
 0x17a   : > { %492 = vmatprep.subr.bf16.mxu1 %v490_v56 }
 0x17b   : > { %1656 = vmatprep.subr.bf16.mxu0 %v1654_v57  ;;  %493 = vmatpush1.bf16.msra.mxu1 %v487_v60 }
 0x17c   : > { %1657 = vmatpush1.bf16.msra.mxu0 %v1651_v61  ;;  %5324 = vmatprep.subr.msk.bf16.mxu1 %vm318_vm0, %v5323_v55 }
 0x17d   : > { %5384 = vmatprep.subr.msk.bf16.mxu0 %vm318_vm0, %v5383_v59 }
 0x17e   : > { %5206 = vmatmul.mubr.msk.bf16.vlgmr.msra.gmra.mrb[4].mxu1 %vm443_vm3, %v5635_v63 }
 0x17f   : > { %5266 = vmatmul.mubr.msk.bf16.vlgmr.msra.gmra.mrb[4].mxu0 %vm443_vm3, %v5635_v63  ;;  %2755 = vmatpush1.bf16.msra.mxu1 %v2749_v3 }
 0x180   : > { %534 = vmatprep.mubr.bf16.mxu1 %v7966_v0  ;;  %1698 = vmatprep.mubr.bf16.mxu0 %v7966_v0 }
 0x181   : > { %3912 = vmatpush1.bf16.msra.mxu0 %v3906_v4 }
 0x186   : > { %5207 = vmatmul.mubr.msk.bf16.gmra.mrb[8].mxu1 %vm443_vm3, %v5640_v5 }
 0x187   : > { %5267 = vmatmul.mubr.msk.bf16.gmra.mrb[8].mxu0 %vm443_vm3, %v5640_v5  ;;  %544 = vmatprep.mubr.bf16.mxu1 %v7966_v0 }
 0x188   : > { %1708 = vmatprep.mubr.bf16.mxu0 %v7966_v0 }
 0x18e   : > { %5208 = vmatmul.mubr.msk.bf16.gmra.mrb[12].mxu1 %vm443_vm3, %v5641_v6 }
 0x18f   : > { %5268 = vmatmul.mubr.msk.bf16.gmra.mrb[12].mxu0 %vm443_vm3, %v5641_v6  ;;  %554 = vmatprep.mubr.bf16.mxu1 %v7966_v0 }
 0x190   : > { %1718 = vmatprep.mubr.bf16.mxu0 %v7966_v0 }
 0x196   : > { %5209 = vmatmul.mubr.msk.bf16.gmra.mrb[16].mxu1 %vm443_vm3, %v5642_v8 }
 0x197   : > { %5269 = vmatmul.mubr.msk.bf16.gmra.mrb[16].mxu0 %vm443_vm3, %v5642_v8  ;;  %564 = vmatprep.mubr.bf16.mxu1 %v7966_v0 }
 0x198   : > { %1728 = vmatprep.mubr.bf16.mxu0 %v7966_v0 }
 0x19e   : > { %5210 = vmatmul.mubr.msk.bf16.gmra.mrb[20].mxu1 %vm443_vm3, %v5643_v9 }
 0x19f   : > { %5270 = vmatmul.mubr.msk.bf16.gmra.mrb[20].mxu0 %vm443_vm3, %v5643_v9  ;;  %574 = vmatprep.mubr.bf16.mxu1 %v7966_v0 }
 0x1a0   : > { %1738 = vmatprep.mubr.bf16.mxu0 %v7966_v0 }
 0x1a6   : > { %5211 = vmatmul.mubr.msk.bf16.gmra.mrb[24].mxu1 %vm443_vm3, %v5644_v10 }
 0x1a7   : > { %5271 = vmatmul.mubr.msk.bf16.gmra.mrb[24].mxu0 %vm443_vm3, %v5644_v10  ;;  %584 = vmatprep.mubr.bf16.mxu1 %v7966_v0 }
 0x1a8   : > { %1748 = vmatprep.mubr.bf16.mxu0 %v7966_v0 }
 0x1ae   : > { %5212 = vmatmul.mubr.msk.bf16.gmra.mrb[28].mxu1 %vm443_vm3, %v5645_v11 }
 0x1af   : > { %5272 = vmatmul.mubr.msk.bf16.gmra.mrb[28].mxu0 %vm443_vm3, %v5645_v11  ;;  %594 = vmatprep.mubr.bf16.mxu1 %v7966_v0 }
 0x1b0   : > { %1758 = vmatprep.mubr.bf16.mxu0 %v7966_v0 }
 0x1b6   : > { %5213 = vmatmul.mubr.msk.bf16.gmra.mrb[32].mxu1 %vm443_vm3, %v5646_v14 }
 0x1b7   : > { %5273 = vmatmul.mubr.msk.bf16.gmra.mrb[32].mxu0 %vm443_vm3, %v5646_v14  ;;  %604 = vmatprep.mubr.bf16.mxu1 %v7966_v0 }
 0x1b8   : > { %1768 = vmatprep.mubr.bf16.mxu0 %v7966_v0 }
 0x1be   : > { %5214 = vmatmul.mubr.msk.bf16.gmra.mrb[36].mxu1 %vm443_vm3, %v5647_v15 }
 0x1bf   : > { %5274 = vmatmul.mubr.msk.bf16.gmra.mrb[36].mxu0 %vm443_vm3, %v5647_v15  ;;  %614 = vmatprep.mubr.bf16.mxu1 %v7966_v0 }
 0x1c0   : > { %1778 = vmatprep.mubr.bf16.mxu0 %v7966_v0 }
 0x1c6   : > { %5215 = vmatmul.mubr.msk.bf16.gmra.mrb[40].mxu1 %vm443_vm3, %v5648_v16 }
 0x1c7   : > { %5275 = vmatmul.mubr.msk.bf16.gmra.mrb[40].mxu0 %vm443_vm3, %v5648_v16  ;;  %624 = vmatprep.mubr.bf16.mxu1 %v7966_v0 }
 0x1c8   : > { %1788 = vmatprep.mubr.bf16.mxu0 %v7966_v0 }
 0x1ce   : > { %5216 = vmatmul.mubr.msk.bf16.gmra.mrb[44].mxu1 %vm443_vm3, %v5649_v17 }
 0x1cf   : > { %5276 = vmatmul.mubr.msk.bf16.gmra.mrb[44].mxu0 %vm443_vm3, %v5649_v17  ;;  %634 = vmatprep.mubr.bf16.mxu1 %v7966_v0 }
 0x1d0   : > { %1798 = vmatprep.mubr.bf16.mxu0 %v7966_v0 }
 0x1d6   : > { %5217 = vmatmul.mubr.msk.bf16.gmra.mrb[48].mxu1 %vm443_vm3, %v5650_v18 }
 0x1d7   : > { %5277 = vmatmul.mubr.msk.bf16.gmra.mrb[48].mxu0 %vm443_vm3, %v5650_v18  ;;  %644 = vmatprep.mubr.bf16.mxu1 %v7966_v0 }
 0x1d8   : > { %1808 = vmatprep.mubr.bf16.mxu0 %v7966_v0 }
 0x1de   : > { %5218 = vmatmul.mubr.msk.bf16.gmra.mrb[52].mxu1 %vm443_vm3, %v5651_v19 }
 0x1df   : > { %5278 = vmatmul.mubr.msk.bf16.gmra.mrb[52].mxu0 %vm443_vm3, %v5651_v19  ;;  %2786 = vmatprep.mubr.bf16.mxu1 %v7966_v0 }
 0x1e0   : > { %3943 = vmatprep.mubr.bf16.mxu0 %v7966_v0 }
 0x1e6   : > { %5325 = vmatmul.mubr.msk.bf16.vlgmr.msra.gmra.mrb[56].mxu1 %vm314_vm1, %v6145_v7 }
 0x1e7   : > { %5385 = vmatmul.mubr.msk.bf16.vlgmr.msra.gmra.mrb[56].mxu0 %vm314_vm1, %v6145_v7  ;;  %2845 = vmatprep.mubr.bf16.mxu1 %v7966_v0 }
 0x1e8   : > { %4002 = vmatprep.mubr.bf16.mxu0 %v7966_v0 }
 0x251   : > { %v6240_v20 = vpop.f32.mrb[4].mxu1 }
 0x252   : > { %8104 = vst [vmem:[#allocation20_spill] sm:$0xff] %v6240_v20  ;;  %v6242_v21 = vpop.f32.mrb[4].mxu0  ;;  %v6244_v22 = vpop.f32.mrb[5].mxu1 }
 0x253   : > { %8105 = vst [vmem:[#allocation21_spill] sm:$0xff] %v6242_v21  ;;  %8106 = vst [vmem:[#allocation22_spill] sm:$0xff] %v6244_v22  ;;  %v6246_v23 = vpop.f32.mrb[5].mxu0  ;;  %v6252_v26 = vpop.f32.mrb[6].mxu1 }
 0x254   : > { %8107 = vst [vmem:[#allocation23_spill] sm:$0xff] %v6246_v23  ;;  %8108 = vst [vmem:[#allocation24_spill] sm:$0xff] %v6252_v26  ;;  %v6254_v7 = vpop.f32.mrb[6].mxu0  ;;  %v6256_v27 = vpop.f32.mrb[7].mxu1 }
 0x255   : > { %8109 = vst [vmem:[#allocation25_spill] sm:$0xff] %v6254_v7  ;;  %8110 = vst [vmem:[#allocation26_spill] sm:$0xff] %v6256_v27  ;;  %v6258_v28 = vpop.f32.mrb[7].mxu0 }
 0x256   : > { %8111 = vst [vmem:[#allocation27_spill] sm:$0xff] %v6258_v28 }
 0x259   : > { %v6264_v31 = vpop.f32.mrb[8].mxu1 }
 0x25a   : > { %8112 = vst [vmem:[#allocation28_spill] sm:$0xff] %v6264_v31  ;;  %v6266_v32 = vpop.f32.mrb[8].mxu0  ;;  %v6268_v33 = vpop.f32.mrb[9].mxu1 }
 0x25b   : > { %8113 = vst [vmem:[#allocation29_spill] sm:$0xff] %v6266_v32  ;;  %8114 = vst [vmem:[#allocation30_spill] sm:$0xff] %v6268_v33  ;;  %v6270_v34 = vpop.f32.mrb[9].mxu0  ;;  %v6276_v37 = vpop.f32.mrb[10].mxu1 }
 0x25c   : > { %8115 = vst [vmem:[#allocation31_spill] sm:$0xff] %v6270_v34  ;;  %8116 = vst [vmem:[#allocation32_spill] sm:$0xff] %v6276_v37  ;;  %v6278_v38 = vpop.f32.mrb[10].mxu0  ;;  %v6280_v39 = vpop.f32.mrb[11].mxu1 }
 0x25d   : > { %8117 = vst [vmem:[#allocation33_spill] sm:$0xff] %v6278_v38  ;;  %8118 = vst [vmem:[#allocation34_spill] sm:$0xff] %v6280_v39  ;;  %v6282_v40 = vpop.f32.mrb[11].mxu0 }
 0x25e   : > { %8119 = vst [vmem:[#allocation35_spill] sm:$0xff] %v6282_v40 }
 0x261   : > { %v6288_v43 = vpop.f32.mrb[12].mxu1 }
 0x262   : > { %8120 = vst [vmem:[#allocation36_spill] sm:$0xff] %v6288_v43  ;;  %v6290_v44 = vpop.f32.mrb[12].mxu0  ;;  %v6292_v45 = vpop.f32.mrb[13].mxu1 }
 0x263   : > { %8121 = vst [vmem:[#allocation37_spill] sm:$0xff] %v6290_v44  ;;  %8122 = vst [vmem:[#allocation38_spill] sm:$0xff] %v6292_v45  ;;  %v6294_v46 = vpop.f32.mrb[13].mxu0  ;;  %v6300_v49 = vpop.f32.mrb[14].mxu1 }
 0x264   : > { %8123 = vst [vmem:[#allocation39_spill] sm:$0xff] %v6294_v46  ;;  %8124 = vst [vmem:[#allocation40_spill] sm:$0xff] %v6300_v49  ;;  %v6302_v51 = vpop.f32.mrb[14].mxu0  ;;  %v6304_v52 = vpop.f32.mrb[15].mxu1 }
 0x265   : > { %8125 = vst [vmem:[#allocation41_spill] sm:$0xff] %v6302_v51  ;;  %8126 = vst [vmem:[#allocation42_spill] sm:$0xff] %v6304_v52  ;;  %v6306_v53 = vpop.f32.mrb[15].mxu0 }
 0x266   : > { %8127 = vst [vmem:[#allocation43_spill] sm:$0xff] %v6306_v53 }
 0x269   : > { %v6312_v56 = vpop.f32.mrb[16].mxu1 }
 0x26a   : > { %8128 = vst [vmem:[#allocation44_spill] sm:$0xff] %v6312_v56  ;;  %v6314_v57 = vpop.f32.mrb[16].mxu0  ;;  %v6316_v58 = vpop.f32.mrb[17].mxu1 }
 0x26b   : > { %8129 = vst [vmem:[#allocation45_spill] sm:$0xff] %v6314_v57  ;;  %8130 = vst [vmem:[#allocation46_spill] sm:$0xff] %v6316_v58  ;;  %v6318_v59 = vpop.f32.mrb[17].mxu0  ;;  %v6324_v62 = vpop.f32.mrb[18].mxu1 }
 0x26c   : > { %8131 = vst [vmem:[#allocation47_spill] sm:$0xff] %v6318_v59  ;;  %8132 = vst [vmem:[#allocation48_spill] sm:$0xff] %v6324_v62  ;;  %v6326_v63 = vpop.f32.mrb[18].mxu0  ;;  %v6328_v3 = vpop.f32.mrb[19].mxu1 }
 0x26d   : > { %8133 = vst [vmem:[#allocation49_spill] sm:$0xff] %v6326_v63  ;;  %8134 = vst [vmem:[#allocation50_spill] sm:$0xff] %v6328_v3  ;;  %v6330_v4 = vpop.f32.mrb[19].mxu0 }
 0x26e   : > { %8135 = vst [vmem:[#allocation51_spill] sm:$0xff] %v6330_v4 }
 0x271   : > { %v6336_v8 = vpop.f32.mrb[20].mxu1 }
 0x272   : > { %8136 = vst [vmem:[#allocation52_spill] sm:$0xff] %v6336_v8  ;;  %v6338_v9 = vpop.f32.mrb[20].mxu0  ;;  %v6340_v10 = vpop.f32.mrb[21].mxu1 }
 0x273   : > { %8137 = vst [vmem:[#allocation53_spill] sm:$0xff] %v6338_v9  ;;  %8138 = vst [vmem:[#allocation54_spill] sm:$0xff] %v6340_v10  ;;  %v6342_v11 = vpop.f32.mrb[21].mxu0  ;;  %v6348_v16 = vpop.f32.mrb[22].mxu1 }
 0x274   : > { %8139 = vst [vmem:[#allocation55_spill] sm:$0xff] %v6342_v11  ;;  %8140 = vst [vmem:[#allocation56_spill] sm:$0xff] %v6348_v16  ;;  %v6350_v17 = vpop.f32.mrb[22].mxu0  ;;  %v6352_v18 = vpop.f32.mrb[23].mxu1 }
 0x275   : > { %8141 = vst [vmem:[#allocation57_spill] sm:$0xff] %v6350_v17  ;;  %8142 = vst [vmem:[#allocation58_spill] sm:$0xff] %v6352_v18  ;;  %v6354_v19 = vpop.f32.mrb[23].mxu0 }
 0x276   : > { %8143 = vst [vmem:[#allocation59_spill] sm:$0xff] %v6354_v19 }
 0x279   : > { %v6360_v61 = vpop.f32.mrb[24].mxu1 }
 0x27a   : > { %8144 = vst [vmem:[#allocation60_spill] sm:$0xff] %v6360_v61  ;;  %v6362_v55 = vpop.f32.mrb[24].mxu0  ;;  %v6364_v48 = vpop.f32.mrb[25].mxu1 }
 0x27b   : > { %8145 = vst [vmem:[#allocation61_spill] sm:$0xff] %v6362_v55  ;;  %8146 = vst [vmem:[#allocation62_spill] sm:$0xff] %v6364_v48  ;;  %v6366_v15 = vpop.f32.mrb[25].mxu0  ;;  %v6372_v30 = vpop.f32.mrb[26].mxu1 }
 0x27c   : > { %8147 = vst [vmem:[#allocation63_spill] sm:$0xff] %v6366_v15  ;;  %8148 = vst [vmem:[#allocation64_spill] sm:$0xff] %v6372_v30  ;;  %v6374_v25 = vpop.f32.mrb[26].mxu0  ;;  %v6376_v0 = vpop.f32.mrb[27].mxu1 }
 0x27d   : > { %8149 = vst [vmem:[#allocation65_spill] sm:$0xff] %v6374_v25  ;;  %8150 = vst [vmem:[#allocation66_spill] sm:$0xff] %v6376_v0  ;;  %v6378_v6 = vpop.f32.mrb[27].mxu0 }
 0x27e   : > { %8151 = vst [vmem:[#allocation67_spill] sm:$0xff] %v6378_v6 }
 0x281   : > { %v586_v60 = vpop.f32.mrb[28].mxu1 }
 0x282   : > { %v1750_v54 = vpop.f32.mrb[28].mxu0  ;;  %v588_v42 = vpop.f32.mrb[29].mxu1 }
 0x283   : > { %v1752_v47 = vpop.f32.mrb[29].mxu0  ;;  %v5459_v41 = vpack.c.bf16 %v588_v42, %v586_v60  ;;  %v590_v35 = vpop.f32.mrb[30].mxu1 }
 0x284   : > { %v5483_v36 = vpack.c.bf16 %v1752_v47, %v1750_v54  ;;  %v1754_v29 = vpop.f32.mrb[30].mxu0  ;;  %v592_v24 = vpop.f32.mrb[31].mxu1 }
 0x285   : > { %v1756_v50 = vpop.f32.mrb[31].mxu0  ;;  %v801_v55 = vmul.bf16 %v5459_v41, %v6132_v1  ;;  %v5460_v17 = vpack.c.bf16 %v592_v24, %v590_v35 }
 0x286   : > { %v1965_v15 = vmul.bf16 %v5483_v36, %v6135_v2  ;;  %v5484_v19 = vpack.c.bf16 %v1756_v50, %v1754_v29 }
 0x287   : > { %v813_v14 = vunpack.c.l.bf16 %v801_v55  ;;  %v814_v9 = vunpack.c.h.bf16 %v801_v55  ;;  %v802_v25 = vmul.bf16 %v5460_v17, %v6132_v1 }
 0x288   : > { %v1977_v11 = vunpack.c.l.bf16 %v1965_v15  ;;  %v1978_v5 = vunpack.c.h.bf16 %v1965_v15  ;;  %v1966_v6 = vmul.bf16 %v5484_v19, %v6135_v2 }
 0x289   : > { %v837_v42 = vrot.slane %v813_v14, 4  ;;  %v843_v47 = vrot.slane %v814_v9, 4  ;;  %v6388_v63 = vpop.f32.mrb[32].mxu1  ;;  %v815_v41 = vunpack.c.l.bf16 %v802_v25  ;;  %v816_v36 = vunpack.c.h.bf16 %v802_v25 }
 0x28a   : > { %v2001_v54 = vrot.slane %v1977_v11, 4  ;;  %v2007_v60 = vrot.slane %v1978_v5, 4  ;;  %v6390_v4 = vpop.f32.mrb[32].mxu0  ;;  %v1979_v24 = vunpack.c.l.bf16 %v1966_v6  ;;  %v1980_v50 = vunpack.c.h.bf16 %v1966_v6  ;;  %v6392_v29 = vpop.f32.mrb[33].mxu1 }
 0x28b   : > { %v6394_v35 = vpop.f32.mrb[33].mxu0  ;;  %v838_v55 = vadd.f32 %v837_v42, %v813_v14  ;;  %v844_v15 = vadd.f32 %v843_v47, %v814_v9  ;;  %v6396_v57 = vpop.f32.mrb[34].mxu1  ;;  %v849_v51 = vrot.slane %v815_v41, 4  ;;  %v855_v53 = vrot.slane %v816_v36, 4 }
 0x28c   : > { %v2002_v17 = vadd.f32 %v2001_v54, %v1977_v11  ;;  %v2008_v19 = vadd.f32 %v2007_v60, %v1978_v5  ;;  %v6398_v59 = vpop.f32.mrb[34].mxu0  ;;  %v2013_v44 = vrot.slane %v1979_v24, 4  ;;  %v2019_v46 = vrot.slane %v1980_v50, 4  ;;  %v6400_v38 = vpop.f32.mrb[35].mxu1 }
 0x28d   : > { %v6402_v25 = vpop.f32.mrb[35].mxu0  ;;  %v839_v6 = vrot.slane %v838_v55, 2  ;;  %v845_v40 = vrot.slane %v844_v15, 2  ;;  %v850_v14 = vadd.f32 %v849_v51, %v815_v41  ;;  %v856_v9 = vadd.f32 %v855_v53, %v816_v36 }
 0x28e   : > { %v2003_v32 = vrot.slane %v2002_v17, 2  ;;  %v2009_v34 = vrot.slane %v2008_v19, 2  ;;  %v2014_v11 = vadd.f32 %v2013_v44, %v1979_v24  ;;  %v2020_v5 = vadd.f32 %v2019_v46, %v1980_v50 }
 0x28f   : > { %v840_v42 = vadd.f32 %v839_v6, %v838_v55  ;;  %v846_v47 = vadd.f32 %v845_v40, %v844_v15  ;;  %v851_v7 = vrot.slane %v850_v14, 2  ;;  %v857_v28 = vrot.slane %v856_v9, 2 }
 0x290   : > { %v2004_v54 = vadd.f32 %v2003_v32, %v2002_v17  ;;  %v2010_v60 = vadd.f32 %v2009_v34, %v2008_v19  ;;  %v2015_v21 = vrot.slane %v2014_v11, 2  ;;  %v2021_v23 = vrot.slane %v2020_v5, 2 }
 0x291   : > { %v841_v13 = vrot.slane %v840_v42, 1  ;;  %v847_v12 = vrot.slane %v846_v47, 1  ;;  %v6404_v61 = vpop.f32.mrb[36].mxu1  ;;  %v852_v51 = vadd.f32 %v851_v7, %v850_v14  ;;  %v858_v44 = vadd.f32 %v857_v28, %v856_v9 }
 0x292   : > { %v2005_v30 = vrot.slane %v2004_v54, 1  ;;  %v2011_v0 = vrot.slane %v2010_v60, 1  ;;  %v6406_v48 = vpop.f32.mrb[36].mxu0  ;;  %v2016_v46 = vadd.f32 %v2015_v21, %v2014_v11  ;;  %v2022_v53 = vadd.f32 %v2021_v23, %v2020_v5  ;;  %v6408_v40 = vpop.f32.mrb[37].mxu1 }
 0x293   : > { %v6410_v32 = vpop.f32.mrb[37].mxu0  ;;  %v842_v34 = vadd.f32 %v841_v13, %v840_v42  ;;  %v848_v41 = vadd.f32 %v847_v12, %v846_v47  ;;  %v6412_v50 = vpop.f32.mrb[38].mxu1  ;;  %v853_v15 = vrot.slane %v852_v51, 1  ;;  %v859_v17 = vrot.slane %v858_v44, 1 }
 0x294   : > { %v2006_v36 = vadd.f32 %v2005_v30, %v2004_v54  ;;  %v2012_v24 = vadd.f32 %v2011_v0, %v2010_v60  ;;  %v6414_v55 = vpop.f32.mrb[38].mxu0  ;;  %v2017_v19 = vrot.slane %v2016_v46, 1  ;;  %v2023_v6 = vrot.slane %v2022_v53, 1  ;;  %v6416_v7 = vpop.f32.mrb[39].mxu1 }
 0x295   : > { %v6418_v21 = vpop.f32.mrb[39].mxu0  ;;  %v981_v23 = vpack.c.bf16 %v842_v34, %v842_v34  ;;  %v982_v28 = vpack.c.bf16 %v848_v41, %v848_v41  ;;  %v854_v13 = vadd.f32 %v853_v15, %v852_v51  ;;  %v860_v12 = vadd.f32 %v859_v17, %v858_v44 }
 0x296   : > { %v2145_v14 = vpack.c.bf16 %v2006_v36, %v2006_v36  ;;  %v2146_v9 = vpack.c.bf16 %v2012_v24, %v2012_v24  ;;  %v2018_v30 = vadd.f32 %v2017_v19, %v2016_v46  ;;  %v2024_v0 = vadd.f32 %v2023_v6, %v2022_v53 }
 0x297   : > { %v1029_v11 = vunpack.c.l.b16 %v981_v23  ;;  %v1030_v5 = vunpack.c.l.b16 %v982_v28  ;;  %v983_v54 = vpack.c.bf16 %v854_v13, %v854_v13  ;;  %v984_v60 = vpack.c.bf16 %v860_v12, %v860_v12 }
 0x298   : > { %v2193_v42 = vunpack.c.l.b16 %v2145_v14  ;;  %v2194_v47 = vunpack.c.l.b16 %v2146_v9  ;;  %v2147_v16 = vpack.c.bf16 %v2018_v30, %v2018_v30  ;;  %v2148_v18 = vpack.c.bf16 %v2024_v0, %v2024_v0 }
 0x299   : > { %v5461_v8 = vpack.c.bf16 %v6392_v29, %v6388_v63  ;;  %v5485_v34 = vpack.c.bf16 %v6394_v35, %v6390_v4  ;;  %v5462_v51 = vpack.c.bf16 %v6400_v38, %v6396_v57  ;;  %v5486_v44 = vpack.c.bf16 %v6402_v25, %v6398_v59  ;;  %v6428_v46 = vpop.f32.mrb[40].mxu1 }
 0x29a   : > { %v6430_v53 = vpop.f32.mrb[40].mxu0  ;;  %v1031_v41 = vunpack.c.l.b16 %v983_v54  ;;  %v1032_v36 = vunpack.c.l.b16 %v984_v60  ;;  %v2195_v24 = vunpack.c.l.b16 %v2147_v16  ;;  %v2196_v15 = vunpack.c.l.b16 %v2148_v18  ;;  %v6432_v17 = vpop.f32.mrb[41].mxu1 }
 0x29b   : > { %v6434_v63 = vpop.f32.mrb[41].mxu0  ;;  %v803_v4 = vmul.bf16 %v5461_v8, %v6132_v1  ;;  %v1967_v29 = vmul.bf16 %v5485_v34, %v6135_v2  ;;  %v804_v38 = vmul.bf16 %v5462_v51, %v6132_v1  ;;  %v1968_v57 = vmul.bf16 %v5486_v44, %v6135_v2  ;;  %v6440_v59 = vpop.f32.mrb[42].mxu1 }
 0x29c   : > { %v6442_v35 = vpop.f32.mrb[42].mxu0  ;;  %v6445_v25 = vsel %vm1053_vm4, %v1031_v41, %v1029_v11  ;;  %v6448_v16 = vsel %vm1053_vm4, %v1032_v36, %v1030_v5  ;;  %v6451_v18 = vsel %vm1053_vm4, %v2195_v24, %v2193_v42  ;;  %v6454_v8 = vsel %vm1053_vm4, %v2196_v15, %v2194_v47  ;;  %v6456_v19 = vpop.f32.mrb[43].mxu1 }
 0x29d   : > { %v6458_v6 = vpop.f32.mrb[43].mxu0  ;;  %v817_v23 = vunpack.c.l.bf16 %v803_v4  ;;  %v818_v28 = vunpack.c.h.bf16 %v803_v4  ;;  %v1981_v14 = vunpack.c.l.bf16 %v1967_v29  ;;  %v1982_v9 = vunpack.c.h.bf16 %v1967_v29 }
 0x29e   : > { %v819_v13 = vunpack.c.l.bf16 %v804_v38  ;;  %v820_v12 = vunpack.c.h.bf16 %v804_v38  ;;  %v1983_v30 = vunpack.c.l.bf16 %v1968_v57  ;;  %v1984_v0 = vunpack.c.h.bf16 %v1968_v57 }
 0x29f   : > { %v861_v11 = vrot.slane %v817_v23, 4  ;;  %v867_v5 = vrot.slane %v818_v28, 4  ;;  %v2025_v54 = vrot.slane %v1981_v14, 4  ;;  %v2031_v42 = vrot.slane %v1982_v9, 4 }
 0x2a0   : > { %v873_v60 = vrot.slane %v819_v13, 4  ;;  %v879_v34 = vrot.slane %v820_v12, 4  ;;  %v2037_v47 = vrot.slane %v1983_v30, 4  ;;  %v2043_v51 = vrot.slane %v1984_v0, 4 }
 0x2a1   : > { %v862_v44 = vadd.f32 %v861_v11, %v817_v23  ;;  %v868_v41 = vadd.f32 %v867_v5, %v818_v28  ;;  %v2026_v36 = vadd.f32 %v2025_v54, %v1981_v14  ;;  %v2032_v24 = vadd.f32 %v2031_v42, %v1982_v9  ;;  %v6460_v15 = vpop.f32.mrb[44].mxu1 }
 0x2a2   : > { %v6462_v4 = vpop.f32.mrb[44].mxu0  ;;  %v874_v29 = vadd.f32 %v873_v60, %v819_v13  ;;  %v880_v38 = vadd.f32 %v879_v34, %v820_v12  ;;  %v2038_v10 = vadd.f32 %v2037_v47, %v1983_v30  ;;  %v2044_v57 = vadd.f32 %v2043_v51, %v1984_v0  ;;  %v6464_v62 = vpop.f32.mrb[45].mxu1 }
 0x2a3   : > { %v6466_v3 = vpop.f32.mrb[45].mxu0  ;;  %v863_v56 = vrot.slane %v862_v44, 2  ;;  %v869_v58 = vrot.slane %v868_v41, 2  ;;  %v2027_v49 = vrot.slane %v2026_v36, 2  ;;  %v2033_v52 = vrot.slane %v2032_v24, 2  ;;  %v6468_v23 = vpop.f32.mrb[46].mxu1 }
 0x2a4   : > { %v6470_v28 = vpop.f32.mrb[46].mxu0  ;;  %v875_v14 = vrot.slane %v874_v29, 2  ;;  %v881_v9 = vrot.slane %v880_v38, 2  ;;  %v2039_v11 = vrot.slane %v2038_v10, 2  ;;  %v2045_v5 = vrot.slane %v2044_v57, 2  ;;  %v6472_v13 = vpop.f32.mrb[47].mxu1 }
 0x2a5   : > { %8152 = vst [vmem:[#allocation68_spill] sm:$0xff] %v6470_v28  ;;  %v6474_v12 = vpop.f32.mrb[47].mxu0  ;;  %v864_v30 = vadd.f32 %v863_v56, %v862_v44  ;;  %v870_v0 = vadd.f32 %v869_v58, %v868_v41  ;;  %v2028_v54 = vadd.f32 %v2027_v49, %v2026_v36  ;;  %v2034_v42 = vadd.f32 %v2033_v52, %v2032_v24 }
 0x2a6   : > { %8153 = vst [vmem:[#allocation69_spill] sm:$0xff] %v6474_v12  ;;  %v876_v60 = vadd.f32 %v875_v14, %v874_v29  ;;  %v882_v34 = vadd.f32 %v881_v9, %v880_v38  ;;  %v2040_v47 = vadd.f32 %v2039_v11, %v2038_v10  ;;  %v2046_v51 = vadd.f32 %v2045_v5, %v2044_v57 }
 0x2a7   : > { %v865_v43 = vrot.slane %v864_v30, 1  ;;  %v871_v45 = vrot.slane %v870_v0, 1  ;;  %v2029_v37 = vrot.slane %v2028_v54, 1  ;;  %v2035_v39 = vrot.slane %v2034_v42, 1 }
 0x2a8   : > { %v877_v31 = vrot.slane %v876_v60, 1  ;;  %v883_v33 = vrot.slane %v882_v34, 1  ;;  %v2041_v26 = vrot.slane %v2040_v47, 1  ;;  %v2047_v27 = vrot.slane %v2046_v51, 1 }
 0x2a9   : > { %v866_v20 = vadd.f32 %v865_v43, %v864_v30  ;;  %v872_v22 = vadd.f32 %v871_v45, %v870_v0  ;;  %v2030_v28 = vadd.f32 %v2029_v37, %v2028_v54  ;;  %v2036_v12 = vadd.f32 %v2035_v39, %v2034_v42  ;;  %v6476_v56 = vpop.f32.mrb[48].mxu1 }
 0x2aa   : > { %v6478_v49 = vpop.f32.mrb[48].mxu0  ;;  %v878_v52 = vadd.f32 %v877_v31, %v876_v60  ;;  %v884_v58 = vadd.f32 %v883_v33, %v882_v34  ;;  %v2042_v10 = vadd.f32 %v2041_v26, %v2040_v47  ;;  %v2048_v44 = vadd.f32 %v2047_v27, %v2046_v51  ;;  %v6480_v41 = vpop.f32.mrb[49].mxu1 }
 0x2ab   : > { %v6482_v36 = vpop.f32.mrb[49].mxu0  ;;  %v985_v24 = vpack.c.bf16 %v866_v20, %v866_v20  ;;  %v986_v29 = vpack.c.bf16 %v872_v22, %v872_v22  ;;  %v2149_v38 = vpack.c.bf16 %v2030_v28, %v2030_v28  ;;  %v2150_v57 = vpack.c.bf16 %v2036_v12, %v2036_v12  ;;  %v6484_v43 = vpop.f32.mrb[50].mxu1 }
 0x2ac   : > { %v6486_v37 = vpop.f32.mrb[50].mxu0  ;;  %v987_v39 = vpack.c.bf16 %v878_v52, %v878_v52  ;;  %v988_v45 = vpack.c.bf16 %v884_v58, %v884_v58  ;;  %v2151_v14 = vpack.c.bf16 %v2042_v10, %v2042_v10  ;;  %v6488_v31 = vpop.f32.mrb[51].mxu1  ;;  %v2152_v28 = vpack.c.bf16 %v2048_v44, %v2048_v44 }
 0x2ad   : > { %v6490_v26 = vpop.f32.mrb[51].mxu0  ;;  %v1033_v27 = vunpack.c.l.b16 %v985_v24  ;;  %v1034_v33 = vunpack.c.l.b16 %v986_v29  ;;  %v2197_v9 = vunpack.c.l.b16 %v2149_v38  ;;  %v2198_v11 = vunpack.c.l.b16 %v2150_v57 }
 0x2ae   : > { %v6492_v20 = vunpack.c.l.b16 %v987_v39  ;;  %v6494_v22 = vunpack.c.l.b16 %v988_v45  ;;  %v6496_v5 = vunpack.c.l.b16 %v2151_v14  ;;  %v5463_v42 = vpack.c.bf16 %v6408_v40, %v6404_v61 }
 0x2af   : > { %v6500_v12 = vsel %vm1055_vm5, %v1033_v27, %v6445_v25  ;;  %v6504_v30 = vsel %vm1055_vm5, %v1034_v33, %v6448_v16  ;;  %v6508_v0 = vsel %vm1055_vm5, %v2197_v9, %v6451_v18  ;;  %v6512_v54 = vsel %vm1055_vm5, %v2198_v11, %v6454_v8 }
 0x2b0   : > { %8154 = vst [vmem:[#allocation70_spill] sm:$0xff] %v6494_v22  ;;  %8155 = vst [vmem:[#allocation71_spill] sm:$0xff] %v6504_v30  ;;  %v5487_v60 = vpack.c.bf16 %v6410_v32, %v6406_v48  ;;  %v5464_v25 = vpack.c.bf16 %v6416_v7, %v6412_v50  ;;  %v5488_v16 = vpack.c.bf16 %v6418_v21, %v6414_v55 }
 0x2b1   : > { %8156 = vst [vmem:[#allocation72_spill] sm:$0xff] %v6512_v54  ;;  %v5465_v18 = vpack.c.bf16 %v6432_v17, %v6428_v46  ;;  %v5489_v34 = vpack.c.bf16 %v6434_v63, %v6430_v53  ;;  %v5466_v8 = vpack.c.bf16 %v6456_v19, %v6440_v59  ;;  %v6530_v40 = vpop.f32.mrb[52].mxu1  ;;  %v805_v32 = vmul.bf16 %v5463_v42, %v6132_v1 }
 0x2b2   : > { %v6532_v48 = vpop.f32.mrb[52].mxu0  ;;  %v1969_v50 = vmul.bf16 %v5487_v60, %v6135_v2  ;;  %v806_v55 = vmul.bf16 %v5464_v25, %v6132_v1  ;;  %v1970_v7 = vmul.bf16 %v5488_v16, %v6135_v2  ;;  %v6538_v21 = vpop.f32.mrb[53].mxu1  ;;  %v6542_v53 = vunpack.c.l.b16 %v2152_v28 }
 0x2b3   : > { %v6540_v46 = vpop.f32.mrb[53].mxu0  ;;  %v6545_v17 = vmul.bf16 %v5465_v18, %v6132_v1  ;;  %v6548_v63 = vmul.bf16 %v5489_v34, %v6135_v2  ;;  %v6551_v59 = vmul.bf16 %v5466_v8, %v6132_v1  ;;  %v6553_v19 = vpop.f32.mrb[54].mxu1  ;;  %v821_v51 = vunpack.c.l.bf16 %v805_v32 }
 0x2b4   : > { %8157 = vst [vmem:[#allocation73_spill] sm:$0xff] %v6540_v46  ;;  %8158 = vst [vmem:[#allocation74_spill] sm:$0xff] %v6542_v53  ;;  %v6555_v47 = vpop.f32.mrb[54].mxu0  ;;  %v822_v52 = vunpack.c.h.bf16 %v805_v32  ;;  %v1985_v58 = vunpack.c.l.bf16 %v1969_v50  ;;  %v1986_v10 = vunpack.c.h.bf16 %v1969_v50  ;;  %v6557_v44 = vpop.f32.mrb[55].mxu1  ;;  %v823_v29 = vunpack.c.l.bf16 %v806_v55 }
 0x2b5   : > { %8159 = vst [vmem:[#allocation75_spill] sm:$0xff] %v6557_v44  ;;  %v6559_v24 = vpop.f32.mrb[55].mxu0  ;;  %v824_v38 = vunpack.c.h.bf16 %v806_v55  ;;  %v1987_v57 = vunpack.c.l.bf16 %v1970_v7  ;;  %v1988_v2 = vunpack.c.h.bf16 %v1970_v7  ;;  %v885_v39 = vrot.slane %v821_v51, 4 }
 0x2b6   : > { %8160 = vst [vmem:[#allocation76_spill] sm:$0xff] %v6559_v24  ;;  %v891_v45 = vrot.slane %v822_v52, 4  ;;  %v2049_v1 = vrot.slane %v1985_v58, 4  ;;  %v2055_v14 = vrot.slane %v1986_v10, 4  ;;  %v897_v27 = vrot.slane %v823_v29, 4 }
 0x2b7   : > { %v903_v33 = vrot.slane %v824_v38, 4  ;;  %v2061_v9 = vrot.slane %v1987_v57, 4  ;;  %v2067_v11 = vrot.slane %v1988_v2, 4  ;;  %v886_v28 = vadd.f32 %v885_v39, %v821_v51 }
 0x2b8   : > { %v892_v42 = vadd.f32 %v891_v45, %v822_v52  ;;  %v2050_v60 = vadd.f32 %v2049_v1, %v1985_v58  ;;  %v2056_v25 = vadd.f32 %v2055_v14, %v1986_v10  ;;  %v898_v16 = vadd.f32 %v897_v27, %v823_v29 }
 0x2b9   : > { %v904_v18 = vadd.f32 %v903_v33, %v824_v38  ;;  %v2062_v34 = vadd.f32 %v2061_v9, %v1987_v57  ;;  %v2068_v8 = vadd.f32 %v2067_v11, %v1988_v2  ;;  %v887_v32 = vrot.slane %v886_v28, 2  ;;  %v6561_v39 = vpop.f32.mrb[56].mxu1 }
 0x2ba   : > { %v893_v50 = vrot.slane %v892_v42, 2  ;;  %v2051_v55 = vrot.slane %v2050_v60, 2  ;;  %v2057_v7 = vrot.slane %v2056_v25, 2  ;;  %v899_v61 = vrot.slane %v898_v16, 2  ;;  %8161 = vst [vmem:[#allocation77_spill] sm:$0xff] %v6561_v39  ;;  %v6563_v45 = vpop.f32.mrb[56].mxu0 }
 0x2bb   : > { %v905_v53 = vrot.slane %v904_v18, 2  ;;  %v2063_v54 = vrot.slane %v2062_v34, 2  ;;  %v2069_v24 = vrot.slane %v2068_v8, 2  ;;  %v888_v46 = vadd.f32 %v887_v32, %v886_v28  ;;  %8162 = vst [vmem:[#allocation78_spill] sm:$0xff] %v6563_v45  ;;  %v6565_v9 = vpop.f32.mrb[57].mxu1  ;;  %v6567_v11 = vpop.f32.mrb[57].mxu0 }
 0x2bc   : > { %v894_v22 = vadd.f32 %v893_v50, %v892_v42  ;;  %v2052_v30 = vadd.f32 %v2051_v55, %v2050_v60  ;;  %v2058_v44 = vadd.f32 %v2057_v7, %v2056_v25  ;;  %v900_v51 = vadd.f32 %v899_v61, %v898_v16  ;;  %8163 = vst [vmem:[#allocation79_spill] sm:$0xff] %v6565_v9  ;;  %v6569_v28 = vpop.f32.mrb[58].mxu1 }
 0x2bd   : > { %v906_v52 = vadd.f32 %v905_v53, %v904_v18  ;;  %v2064_v58 = vadd.f32 %v2063_v54, %v2062_v34  ;;  %v2070_v10 = vadd.f32 %v2069_v24, %v2068_v8  ;;  %v889_v29 = vrot.slane %v888_v46, 1  ;;  %8164 = vst [vmem:[#allocation80_spill] sm:$0xff] %v6567_v11  ;;  %8165 = vst [vmem:[#allocation81_spill] sm:$0xff] %v6569_v28  ;;  %v6574_v11 = vld [vmem:[%s6114_s1 + $0x8] sm:$0xff] }
 0x2be   : > { %v895_v38 = vrot.slane %v894_v22, 1  ;;  %v2053_v57 = vrot.slane %v2052_v30, 1  ;;  %v2059_v2 = vrot.slane %v2058_v44, 1  ;;  %v901_v1 = vrot.slane %v900_v51, 1 }
 0x2bf   : > { %v907_v14 = vrot.slane %v906_v52, 1  ;;  %v2065_v27 = vrot.slane %v2064_v58, 1  ;;  %v2071_v33 = vrot.slane %v2070_v10, 1  ;;  %v890_v61 = vadd.f32 %v889_v29, %v888_v46 }
 0x2c0   : > { %v896_v54 = vadd.f32 %v895_v38, %v894_v22  ;;  %v2054_v53 = vadd.f32 %v2053_v57, %v2052_v30  ;;  %v2060_v24 = vadd.f32 %v2059_v2, %v2058_v44  ;;  %v902_v42 = vadd.f32 %v901_v1, %v900_v51 }
 0x2c1   : > { %v908_v60 = vadd.f32 %v907_v14, %v906_v52  ;;  %v2066_v25 = vadd.f32 %v2065_v27, %v2064_v58  ;;  %v6571_v16 = vadd.f32 %v2071_v33, %v2070_v10  ;;  %v989_v18 = vpack.c.bf16 %v890_v61, %v890_v61 }
 0x2c2   : > { %v990_v34 = vpack.c.bf16 %v896_v54, %v896_v54  ;;  %v2153_v8 = vpack.c.bf16 %v2054_v53, %v2054_v53  ;;  %v2154_v32 = vpack.c.bf16 %v2060_v24, %v2060_v24  ;;  %v991_v50 = vpack.c.bf16 %v902_v42, %v902_v42 }
 0x2c3   : > { %v992_v55 = vpack.c.bf16 %v908_v60, %v908_v60  ;;  %v2155_v7 = vpack.c.bf16 %v2066_v25, %v2066_v25  ;;  %v8166_v22 = vpack.c.bf16 %v6458_v6, %v6442_v35  ;;  %v6580_v46 = vunpack.c.l.b16 %v989_v18 }
 0x2c4   : > { %v6582_v44 = vunpack.c.l.b16 %v990_v34  ;;  %v6584_v51 = vunpack.c.l.b16 %v2153_v8  ;;  %v2156_v52 = vpack.c.bf16 %v6571_v16, %v6571_v16  ;;  %v6588_v58 = vunpack.c.l.b16 %v2154_v32 }
 0x2c5   : > { %v1972_v30 = vmul.bf16 %v6574_v11, %v8166_v22  ;;  %v6590_v10 = vunpack.c.l.b16 %v991_v50  ;;  %v6592_v29 = vunpack.c.l.b16 %v992_v55  ;;  %v6594_v38 = vunpack.c.l.b16 %v2155_v7 }
 0x2c6   : > { %8167 = vst [vmem:[#allocation82_spill] sm:$0xff] %v6582_v44  ;;  %8168 = vst [vmem:[#allocation83_spill] sm:$0xff] %v6588_v58  ;;  %v825_v35 = vunpack.c.l.bf16 %v6545_v17  ;;  %v826_v6 = vunpack.c.h.bf16 %v6545_v17  ;;  %v1989_v57 = vunpack.c.l.bf16 %v6548_v63  ;;  %v1990_v2 = vunpack.c.h.bf16 %v6548_v63 }
 0x2c7   : > { %8169 = vst [vmem:[#allocation84_spill] sm:$0xff] %v6592_v29  ;;  %8170 = vst [vmem:[#allocation85_spill] sm:$0xff] %v6594_v38  ;;  %v827_v1 = vunpack.c.l.bf16 %v6551_v59  ;;  %v828_v14 = vunpack.c.h.bf16 %v6551_v59  ;;  %v1991_v27 = vunpack.c.l.bf16 %v1972_v30  ;;  %v1992_v33 = vunpack.c.h.bf16 %v1972_v30 }
 0x2c8   : > { %v909_v61 = vrot.slane %v825_v35, 4  ;;  %v915_v54 = vrot.slane %v826_v6, 4  ;;  %v2073_v53 = vrot.slane %v1989_v57, 4  ;;  %v2079_v24 = vrot.slane %v1990_v2, 4 }
 0x2c9   : > { %v921_v42 = vrot.slane %v827_v1, 4  ;;  %v927_v60 = vrot.slane %v828_v14, 4  ;;  %v2085_v25 = vrot.slane %v1991_v27, 4  ;;  %v2091_v16 = vrot.slane %v1992_v33, 4 }
 0x2ca   : > { %v910_v18 = vadd.f32 %v909_v61, %v825_v35  ;;  %v916_v17 = vadd.f32 %v915_v54, %v826_v6  ;;  %v2074_v34 = vadd.f32 %v2073_v53, %v1989_v57  ;;  %v2080_v8 = vadd.f32 %v2079_v24, %v1990_v2 }
 0x2cb   : > { %v922_v32 = vadd.f32 %v921_v42, %v827_v1  ;;  %v928_v63 = vadd.f32 %v927_v60, %v828_v14  ;;  %v2086_v50 = vadd.f32 %v2085_v25, %v1991_v27  ;;  %v2092_v55 = vadd.f32 %v2091_v16, %v1992_v33 }
 0x2cc   : > { %v911_v7 = vrot.slane %v910_v18, 2  ;;  %v917_v59 = vrot.slane %v916_v17, 2  ;;  %v2075_v22 = vrot.slane %v2074_v34, 2  ;;  %v2081_v30 = vrot.slane %v2080_v8, 2 }
 0x2cd   : > { %v923_v28 = vrot.slane %v922_v32, 2  ;;  %v929_v9 = vrot.slane %v928_v63, 2  ;;  %v2087_v45 = vrot.slane %v2086_v50, 2  ;;  %v2093_v39 = vrot.slane %v2092_v55, 2 }
 0x2ce   : > { %v912_v58 = vadd.f32 %v911_v7, %v910_v18  ;;  %v918_v29 = vadd.f32 %v917_v59, %v916_v17  ;;  %v2076_v44 = vadd.f32 %v2075_v22, %v2074_v34  ;;  %v2082_v38 = vadd.f32 %v2081_v30, %v2080_v8  ;;  %v6631_v59 = vld [vmem:[%s6114_s1] sm:$0xff] }
 0x2cf   : > { %v924_v35 = vadd.f32 %v923_v28, %v922_v32  ;;  %v930_v6 = vadd.f32 %v929_v9, %v928_v63  ;;  %v2088_v57 = vadd.f32 %v2087_v45, %v2086_v50  ;;  %v2094_v2 = vadd.f32 %v2093_v39, %v2092_v55 }
 0x2d0   : > { %v913_v1 = vrot.slane %v912_v58, 1  ;;  %v919_v14 = vrot.slane %v918_v29, 1  ;;  %v2077_v27 = vrot.slane %v2076_v44, 1  ;;  %v2083_v33 = vrot.slane %v2082_v38, 1 }
 0x2d1   : > { %v925_v61 = vrot.slane %v924_v35, 1  ;;  %v931_v54 = vrot.slane %v930_v6, 1  ;;  %v2089_v53 = vrot.slane %v2088_v57, 1  ;;  %v2095_v24 = vrot.slane %v2094_v2, 1 }
 0x2d2   : > { %v914_v42 = vadd.f32 %v913_v1, %v912_v58  ;;  %v920_v60 = vadd.f32 %v919_v14, %v918_v29  ;;  %v2078_v25 = vadd.f32 %v2077_v27, %v2076_v44  ;;  %v6602_v16 = vadd.f32 %v2083_v33, %v2082_v38  ;;  %v8173_v29 = vld [vmem:[#allocation68_spill] sm:$0xff]  ;;  %v8174_v38 = vld [vmem:[#allocation69_spill] sm:$0xff] }
 0x2d3   : > { %v6604_v18 = vunpack.c.l.b16 %v2156_v52  ;;  %v6606_v28 = vadd.f32 %v925_v61, %v924_v35  ;;  %v6608_v45 = vadd.f32 %v931_v54, %v930_v6  ;;  %v6610_v39 = vadd.f32 %v2089_v53, %v2088_v57  ;;  %v6645_v61 = vpop.f32.mrb[58].mxu0 }
 0x2d4   : > { %8171 = vst [vmem:[#allocation86_spill] sm:$0xff] %v6602_v16  ;;  %v993_v9 = vpack.c.bf16 %v914_v42, %v914_v42  ;;  %v994_v17 = vpack.c.bf16 %v920_v60, %v920_v60  ;;  %v2157_v34 = vpack.c.bf16 %v2078_v25, %v2078_v25  ;;  %v6612_v8 = vadd.f32 %v2095_v24, %v2094_v2 }
 0x2d5   : > { %8172 = vst [vmem:[#allocation87_spill] sm:$0xff] %v6604_v18  ;;  %v5467_v58 = vpack.c.bf16 %v6464_v62, %v6460_v15  ;;  %v5491_v44 = vpack.c.bf16 %v6466_v3, %v6462_v4  ;;  %v5468_v52 = vpack.c.bf16 %v6472_v13, %v6468_v23  ;;  %v5492_v32 = vpack.c.bf16 %v8174_v38, %v8173_v29 }
 0x2d6   : > { %v6622_v63 = vunpack.c.l.b16 %v993_v9  ;;  %v6624_v50 = vunpack.c.l.b16 %v994_v17  ;;  %v6628_v7 = vunpack.c.l.b16 %v2157_v34  ;;  %8175 = vst [vmem:[#allocation68_spill] sm:$0xff] %v6645_v61 }
 0x2d7   : > { %v809_v62 = vmul.bf16 %v6631_v59, %v5467_v58  ;;  %v1973_v3 = vmul.bf16 %v6574_v11, %v5491_v44  ;;  %v810_v15 = vmul.bf16 %v6631_v59, %v5468_v52  ;;  %v1974_v4 = vmul.bf16 %v6574_v11, %v5492_v32 }
 0x2d9   : > { %v829_v35 = vunpack.c.l.bf16 %v809_v62  ;;  %v830_v6 = vunpack.c.h.bf16 %v809_v62  ;;  %v1993_v57 = vunpack.c.l.bf16 %v1973_v3  ;;  %v1994_v2 = vunpack.c.h.bf16 %v1973_v3  ;;  %v6647_v3 = vpop.f32.mrb[59].mxu1 }
 0x2da   : > { %v831_v1 = vunpack.c.l.bf16 %v810_v15  ;;  %v832_v14 = vunpack.c.h.bf16 %v810_v15  ;;  %v1995_v27 = vunpack.c.l.bf16 %v1974_v4  ;;  %v1996_v33 = vunpack.c.h.bf16 %v1974_v4  ;;  %8176 = vst [vmem:[#allocation69_spill] sm:$0xff] %v6647_v3  ;;  %v6649_v15 = vpop.f32.mrb[59].mxu0 }
 0x2db   : > { %v933_v54 = vrot.slane %v829_v35, 4  ;;  %v939_v53 = vrot.slane %v830_v6, 4  ;;  %v2097_v24 = vrot.slane %v1993_v57, 4  ;;  %v2103_v42 = vrot.slane %v1994_v2, 4  ;;  %8177 = vst [vmem:[#allocation88_spill] sm:$0xff] %v6649_v15 }
 0x2dc   : > { %v945_v60 = vrot.slane %v831_v1, 4  ;;  %v951_v25 = vrot.slane %v832_v14, 4  ;;  %v2109_v9 = vrot.slane %v1995_v27, 4  ;;  %v2115_v17 = vrot.slane %v1996_v33, 4 }
 0x2dd   : > { %v934_v34 = vadd.f32 %v933_v54, %v829_v35  ;;  %v940_v58 = vadd.f32 %v939_v53, %v830_v6  ;;  %v2098_v44 = vadd.f32 %v2097_v24, %v1993_v57  ;;  %v2104_v52 = vadd.f32 %v2103_v42, %v1994_v2 }
 0x2de   : > { %v946_v29 = vadd.f32 %v945_v60, %v831_v1  ;;  %v952_v38 = vadd.f32 %v951_v25, %v832_v14  ;;  %v2110_v32 = vadd.f32 %v2109_v9, %v1995_v27  ;;  %v2116_v62 = vadd.f32 %v2115_v17, %v1996_v33 }
 0x2df   : > { %v935_v4 = vrot.slane %v934_v34, 2  ;;  %v941_v55 = vrot.slane %v940_v58, 2  ;;  %v2099_v30 = vrot.slane %v2098_v44, 2  ;;  %v2105_v22 = vrot.slane %v2104_v52, 2 }
 0x2e0   : > { %v947_v13 = vrot.slane %v946_v29, 2  ;;  %v953_v23 = vrot.slane %v952_v38, 2  ;;  %v2111_v61 = vrot.slane %v2110_v32, 2  ;;  %v2117_v18 = vrot.slane %v2116_v62, 2 }
 0x2e1   : > { %v936_v35 = vadd.f32 %v935_v4, %v934_v34  ;;  %v942_v6 = vadd.f32 %v941_v55, %v940_v58  ;;  %v2100_v57 = vadd.f32 %v2099_v30, %v2098_v44  ;;  %v2106_v2 = vadd.f32 %v2105_v22, %v2104_v52 }
 0x2e2   : > { %v948_v1 = vadd.f32 %v947_v13, %v946_v29  ;;  %v954_v14 = vadd.f32 %v953_v23, %v952_v38  ;;  %v2112_v27 = vadd.f32 %v2111_v61, %v2110_v32  ;;  %v2118_v33 = vadd.f32 %v2117_v18, %v2116_v62 }
 0x2e3   : > { %v937_v54 = vrot.slane %v936_v35, 1  ;;  %v943_v53 = vrot.slane %v942_v6, 1  ;;  %v2101_v24 = vrot.slane %v2100_v57, 1  ;;  %v2107_v42 = vrot.slane %v2106_v2, 1 }
 0x2e4   : > { %v949_v60 = vrot.slane %v948_v1, 1  ;;  %v955_v25 = vrot.slane %v954_v14, 1  ;;  %v2113_v9 = vrot.slane %v2112_v27, 1  ;;  %v2119_v17 = vrot.slane %v2118_v33, 1 }
 0x2e5   : > { %v938_v15 = vadd.f32 %v937_v54, %v936_v35  ;;  %v944_v3 = vadd.f32 %v943_v53, %v942_v6  ;;  %v2102_v16 = vadd.f32 %v2101_v24, %v2100_v57  ;;  %v2108_v34 = vadd.f32 %v2107_v42, %v2106_v2 }
 0x2e6   : > { %v950_v55 = vadd.f32 %v949_v60, %v948_v1  ;;  %v956_v30 = vadd.f32 %v955_v25, %v954_v14  ;;  %v2114_v22 = vadd.f32 %v2113_v9, %v2112_v27  ;;  %v2120_v58 = vadd.f32 %v2119_v17, %v2118_v33 }
 0x2e7   : > { %v997_v13 = vpack.c.bf16 %v938_v15, %v938_v15  ;;  %v998_v23 = vpack.c.bf16 %v944_v3, %v944_v3  ;;  %v2161_v61 = vpack.c.bf16 %v2102_v16, %v2102_v16  ;;  %v2162_v18 = vpack.c.bf16 %v2108_v34, %v2108_v34 }
 0x2e8   : > { %v999_v44 = vpack.c.bf16 %v950_v55, %v950_v55  ;;  %v1000_v52 = vpack.c.bf16 %v956_v30, %v956_v30  ;;  %v2163_v29 = vpack.c.bf16 %v2114_v22, %v2114_v22  ;;  %v2164_v38 = vpack.c.bf16 %v2120_v58, %v2120_v58 }
 0x2e9   : > { %v1045_v32 = vunpack.c.l.b16 %v997_v13  ;;  %v6651_v62 = vunpack.c.l.b16 %v998_v23  ;;  %v6653_v4 = vunpack.c.l.b16 %v2161_v61  ;;  %v6655_v35 = vunpack.c.l.b16 %v2162_v18 }
 0x2ea   : > { %v1047_v6 = vunpack.c.l.b16 %v999_v44  ;;  %v6657_v57 = vunpack.c.l.b16 %v1000_v52  ;;  %v6659_v2 = vunpack.c.l.b16 %v2163_v29  ;;  %v6661_v15 = vunpack.c.l.b16 %v2164_v38 }
 0x2eb   : > { %v8178_v16 = vpack.c.bf16 %v6480_v41, %v6476_v56  ;;  %v8179_v1 = vpack.c.bf16 %v6482_v36, %v6478_v49  ;;  %v8180_v27 = vpack.c.bf16 %v6488_v31, %v6484_v43  ;;  %v8181_v54 = vpack.c.bf16 %v6490_v26, %v6486_v37 }
 0x2ec   : > { %v679_v56 = vpack.c.bf16 %v6553_v19, %v6530_v40  ;;  %v995_v41 = vpack.c.bf16 %v6606_v28, %v6606_v28  ;;  %v6686_v49 = vsel %vm1057_vm6, %v6492_v20, %v6500_v12  ;;  %v6689_v36 = vsel %vm1053_vm4, %v1047_v6, %v1045_v32  ;;  %v8187_v19 = vld [vmem:[#allocation84_spill] sm:$0xff] }
 0x2ed   : > { %v811_v3 = vmul.bf16 %v6631_v59, %v8178_v16  ;;  %v1975_v14 = vmul.bf16 %v6574_v11, %v8179_v1  ;;  %v812_v33 = vmul.bf16 %v6631_v59, %v8180_v27  ;;  %v1976_v53 = vmul.bf16 %v6574_v11, %v8181_v54 }
 0x2ef   : > { %v833_v43 = vunpack.c.l.bf16 %v811_v3  ;;  %v834_v31 = vunpack.c.h.bf16 %v811_v3  ;;  %v1997_v59 = vunpack.c.l.bf16 %v1975_v14  ;;  %v1998_v37 = vunpack.c.h.bf16 %v1975_v14 }
 0x2f0   : > { %v835_v26 = vunpack.c.l.bf16 %v812_v33  ;;  %v836_v11 = vunpack.c.h.bf16 %v812_v33  ;;  %v1999_v24 = vunpack.c.l.bf16 %v1976_v53  ;;  %v2000_v42 = vunpack.c.h.bf16 %v1976_v53 }
 0x2f1   : > { %v957_v60 = vrot.slane %v833_v43, 4  ;;  %v963_v25 = vrot.slane %v834_v31, 4  ;;  %v2121_v9 = vrot.slane %v1997_v59, 4  ;;  %v2127_v17 = vrot.slane %v1998_v37, 4 }
 0x2f2   : > { %v969_v34 = vrot.slane %v835_v26, 4  ;;  %v975_v55 = vrot.slane %v836_v11, 4  ;;  %v2133_v30 = vrot.slane %v1999_v24, 4  ;;  %v2139_v20 = vrot.slane %v2000_v42, 4 }
 0x2f3   : > { %v958_v12 = vadd.f32 %v957_v60, %v833_v43  ;;  %v964_v22 = vadd.f32 %v963_v25, %v834_v31  ;;  %v2122_v58 = vadd.f32 %v2121_v9, %v1997_v59  ;;  %v2128_v13 = vadd.f32 %v2127_v17, %v1998_v37 }
 0x2f4   : > { %v970_v23 = vadd.f32 %v969_v34, %v835_v26  ;;  %v976_v61 = vadd.f32 %v975_v55, %v836_v11  ;;  %v2134_v18 = vadd.f32 %v2133_v30, %v1999_v24  ;;  %v2140_v44 = vadd.f32 %v2139_v20, %v2000_v42 }
 0x2f5   : > { %v959_v52 = vrot.slane %v958_v12, 2  ;;  %v965_v29 = vrot.slane %v964_v22, 2  ;;  %v2123_v38 = vrot.slane %v2122_v58, 2  ;;  %v2129_v32 = vrot.slane %v2128_v13, 2 }
 0x2f6   : > { %v971_v6 = vrot.slane %v970_v23, 2  ;;  %v977_v16 = vrot.slane %v976_v61, 2  ;;  %v2135_v3 = vrot.slane %v2134_v18, 2  ;;  %v2141_v1 = vrot.slane %v2140_v44, 2 }
 0x2f7   : > { %v960_v14 = vadd.f32 %v959_v52, %v958_v12  ;;  %v966_v27 = vadd.f32 %v965_v29, %v964_v22  ;;  %v2124_v33 = vadd.f32 %v2123_v38, %v2122_v58  ;;  %v2130_v54 = vadd.f32 %v2129_v32, %v2128_v13 }
 0x2f8   : > { %v972_v53 = vadd.f32 %v971_v6, %v970_v23  ;;  %v978_v43 = vadd.f32 %v977_v16, %v976_v61  ;;  %v2136_v31 = vadd.f32 %v2135_v3, %v2134_v18  ;;  %v2142_v59 = vadd.f32 %v2141_v1, %v2140_v44 }
 0x2f9   : > { %v961_v37 = vrot.slane %v960_v14, 1  ;;  %v967_v26 = vrot.slane %v966_v27, 1  ;;  %v2125_v11 = vrot.slane %v2124_v33, 1  ;;  %v2131_v24 = vrot.slane %v2130_v54, 1 }
 0x2fa   : > { %v973_v42 = vrot.slane %v972_v53, 1  ;;  %v979_v60 = vrot.slane %v978_v43, 1  ;;  %v2137_v25 = vrot.slane %v2136_v31, 1  ;;  %v2143_v9 = vrot.slane %v2142_v59, 1 }
 0x2fb   : > { %v962_v17 = vadd.f32 %v961_v37, %v960_v14  ;;  %v968_v34 = vadd.f32 %v967_v26, %v966_v27  ;;  %v2126_v55 = vadd.f32 %v2125_v11, %v2124_v33  ;;  %v2132_v30 = vadd.f32 %v2131_v24, %v2130_v54  ;;  %v8184_v37 = vld [vmem:[#allocation71_spill] sm:$0xff]  ;;  %v8185_v26 = vld [vmem:[#allocation70_spill] sm:$0xff] }
 0x2fc   : > { %v974_v20 = vadd.f32 %v973_v42, %v972_v53  ;;  %v980_v12 = vadd.f32 %v979_v60, %v978_v43  ;;  %v2138_v22 = vadd.f32 %v2137_v25, %v2136_v31  ;;  %v6691_v58 = vadd.f32 %v2143_v9, %v2142_v59  ;;  %v8182_v53 = vld [vmem:[#allocation75_spill] sm:$0xff]  ;;  %v8186_v60 = vld [vmem:[#allocation82_spill] sm:$0xff] }
 0x2fd   : > { %v1001_v13 = vpack.c.bf16 %v962_v17, %v962_v17  ;;  %v1002_v23 = vpack.c.bf16 %v968_v34, %v968_v34  ;;  %v2165_v61 = vpack.c.bf16 %v2126_v55, %v2126_v55  ;;  %v2166_v18 = vpack.c.bf16 %v2132_v30, %v2132_v30 }
 0x2fe   : > { %v1003_v44 = vpack.c.bf16 %v974_v20, %v974_v20  ;;  %v1043_v52 = vunpack.c.l.b16 %v995_v41  ;;  %v1060_v29 = vsel %vm1059_vm7, %v6580_v46, %v6686_v49  ;;  %v1843_v38 = vpack.c.bf16 %v6555_v47, %v6532_v48  ;;  %v8188_v20 = vld [vmem:[#allocation73_spill] sm:$0xff] }
 0x2ff   : > { %v1049_v32 = vunpack.c.l.b16 %v1001_v13  ;;  %v1050_v6 = vunpack.c.l.b16 %v1002_v23  ;;  %v2213_v16 = vunpack.c.l.b16 %v2165_v61  ;;  %v2214_v3 = vunpack.c.l.b16 %v2166_v18 }
 0x300   : > { %v1051_v1 = vunpack.c.l.b16 %v1003_v44  ;;  %v1062_v14 = vsel %vm1061_vm8, %v6590_v10, %v1060_v29  ;;  %v2159_v27 = vpack.c.bf16 %v6610_v39, %v6610_v39  ;;  %v2167_v28 = vpack.c.bf16 %v2138_v22, %v2138_v22  ;;  %v8190_v44 = vld [vmem:[#allocation86_spill] sm:$0xff] }
 0x301   : > { %v1064_v41 = vsel %vm1063_vm9, %v6622_v63, %v1062_v14  ;;  %v1075_v46 = vsel %vm1055_vm5, %v1049_v32, %v6689_v36  ;;  %v2219_v48 = vsel %vm1057_vm6, %v6496_v5, %v6508_v0  ;;  %v2231_v47 = vsel %vm1053_vm4, %v6659_v2, %v6653_v4  ;;  %v8183_v5 = vld [vmem:[#allocation85_spill] sm:$0xff]  ;;  %v8193_v32 = vld [vmem:[#allocation74_spill] sm:$0xff] }
 0x302   : > { %v1066_v10 = vsel %vm1065_vm10, %v1043_v52, %v1064_v41  ;;  %v1076_v49 = vsel %vm1057_vm6, %v1051_v1, %v1075_v46  ;;  %v2207_v39 = vunpack.c.l.b16 %v2159_v27  ;;  %v2215_v33 = vunpack.c.l.b16 %v2167_v28  ;;  %v8195_v28 = vld [vmem:[#allocation83_spill] sm:$0xff] }
 0x303   : > { %v1080_v54 = vpack.c.b16 %v1076_v49, %v1066_v10  ;;  %v2220_v63 = vsel %vm1059_vm7, %v6584_v51, %v2219_v48  ;;  %v2232_v36 = vsel %vm1055_vm5, %v2213_v16, %v2231_v47  ;;  %v680_v43 = vpack.c.bf16 %v8182_v53, %v6538_v21  ;;  %v8196_v47 = vld [vmem:[#allocation87_spill] sm:$0xff] }
 0x304   : > { %v2221_v0 = vsel %vm1061_vm8, %v8183_v5, %v2220_v63  ;;  %v2233_v4 = vsel %vm1057_vm6, %v2215_v33, %v2232_v36  ;;  %v996_v2 = vpack.c.bf16 %v6608_v45, %v6608_v45  ;;  %v1004_v31 = vpack.c.bf16 %v980_v12, %v980_v12  ;;  %v8189_v12 = vld [vmem:[#allocation76_spill] sm:$0xff] }
 0x305   : > { %v1084_v59 = vmul.bf16 %v1080_v54, %v679_v56  ;;  %v2222_v51 = vsel %vm1063_vm9, %v6628_v7, %v2221_v0  ;;  %v1069_v21 = vsel %vm1057_vm6, %v8185_v26, %v8184_v37  ;;  %v1077_v11 = vsel %vm1053_vm4, %v6657_v57, %v6651_v62 }
 0x306   : > { %v2223_v24 = vsel %vm1065_vm10, %v2207_v39, %v2222_v51  ;;  %v1044_v42 = vunpack.c.l.b16 %v996_v2  ;;  %v1052_v45 = vunpack.c.l.b16 %v1004_v31  ;;  %v1070_v25 = vsel %vm1059_vm7, %v8186_v60, %v1069_v21 }
 0x307   : > { %v2237_v40 = vpack.c.b16 %v2233_v4, %v2223_v24  ;;  %v1071_v56 = vsel %vm1061_vm8, %v8187_v19, %v1070_v25  ;;  %v1078_v7 = vsel %vm1055_vm5, %v1050_v6, %v1077_v11  ;;  %v5890_v34 = vmov 1966171168  }
 0x308   : > { %v1072_v9 = vsel %vm1063_vm9, %v6624_v50, %v1071_v56  ;;  %v1079_v17 = vsel %vm1057_vm6, %v1052_v45, %v1078_v7  ;;  %v1091_v62 = vunpack.c.l.s4 %v5890_v34  ;;  %v1093_v57 = vlaneseq }
 0x309   : > { %v6747_v55 = vmul.bf16 %v2237_v40, %v1843_v38  ;;  %v1073_v30 = vsel %vm1065_vm10, %v1044_v42, %v1072_v9  ;;  %v1844_v22 = vpack.c.bf16 %v8189_v12, %v8188_v20  ;;  %v2160_v13 = vpack.c.bf16 %v6612_v8, %v6612_v8  ;;  %v8192_v38 = vld [vmem:[#allocation72_spill] sm:$0xff] }
 0x30a   : > { %v1081_v23 = vpack.c.b16 %v1079_v17, %v1073_v30  ;;  %v1092_v61 = vunpack.c.0.s8 %v1091_v62  ;;  %v1094_v18 = vshrl.u32 %v1093_v57, 7  ;;  %v2168_v50 = vpack.c.bf16 %v6691_v58, %v6691_v58 }
 0x30b   : > { %v8191_v52 = vpack.c.bf16 %v8190_v44, %v8190_v44  ;;  %v2226_v6 = vsel %vm1057_vm6, %v8193_v32, %v8192_v38  ;;  %v2234_v16 = vsel %vm1053_vm4, %v6661_v15, %v6655_v35  ;;  %v2208_v14 = vunpack.c.l.b16 %v2160_v13 }
 0x30c   : > { %v1085_v1 = vmul.bf16 %v1081_v23, %v680_v43  ;;  %v6765_v8 = vsub.s32 %v1092_v61, %v1094_v18  ;;  %v2216_v27 = vunpack.c.l.b16 %v2168_v50  ;;  %v2227_v58 = vsel %vm1059_vm7, %v8195_v28, %v2226_v6 }
 0x30d   : > { %v2206_v29 = vunpack.c.l.b16 %v8191_v52  ;;  %v2235_v41 = vsel %vm1055_vm5, %v2214_v3, %v2234_v16  ;;  %v2228_v10 = vsel %vm1061_vm8, %v8196_v47, %v2227_v58  ;;  %v6779_v43 = vsub.s32 0, %v1094_v18 }
 0x30e   : > { %8194 = vst [vmem:[#allocation75_spill] sm:$0xff] %v6765_v8  ;;  %v1088_v46 = vcombine.low %v1084_v59, %v1085_v1  ;;  %v1089_v48 = vcombine.high %v1084_v59, %v1085_v1  ;;  %v2236_v39 = vsel %vm1057_vm6, %v2216_v27, %v2235_v41  ;;  %v6781_v5 = vsub.s32 1, %v1094_v18 }
 0x30f   : > { %v2229_v49 = vsel %vm1063_vm9, %v2206_v29, %v2228_v10  ;;  %8197 = vst [vmem:[#allocation85_spill] sm:$0xff] %v6779_v43 }
 0x310   : > { %v1096_v35 = vrot.slane %v1088_v46, %v6765_v8  ;;  %v1103_v15 = vrot.slane %v1089_v48, %v6765_v8  ;;  %v2230_v33 = vsel %vm1065_vm10, %v2208_v14, %v2229_v49  ;;  %8198 = vst [vmem:[#allocation71_spill] sm:$0xff] %v6781_v5 }
 0x311   : > { %v2238_v54 = vpack.c.b16 %v2236_v39, %v2230_v33 }
 0x312   : > { %v1104_v63 = vcombine.high %v1096_v35, %v1096_v35  ;;  %v1105_v36 = vcombine.high %v1103_v15, %v1103_v15  ;;  %v1112_v3 = vrot.slane %v1096_v35, %v6765_v8  ;;  %v1119_v53 = vrot.slane %v1103_v15, %v6765_v8 }
 0x313   : > { %v6783_v0 = vmul.bf16 %v2238_v54, %v1844_v22 }
 0x314   : > { %v1126_v4 = vrot.slane %v1104_v63, %v6765_v8  ;;  %v1133_v2 = vrot.slane %v1105_v36, %v6765_v8  ;;  %v1134_v31 = vcombine.high %v1112_v3, %v1112_v3  ;;  %v1137_v59 = vunpack.i.h.s16 %v1112_v3 }
 0x315   : > { %v1145_v51 = vunpack.i.h.s16 %v1119_v53  ;;  %v5243_v37 = vpack.i.b16 %v1112_v3, %v1112_v3  ;;  %v5247_v26 = vpack.i.b16 %v1119_v53, %v1119_v53  ;;  %v2245_v21 = vcombine.low %v6747_v55, %v6783_v0 }
 0x316   : > { %v1135_v11 = vcombine.high %v1126_v4, %v1126_v4  ;;  %v1139_v24 = vunpack.i.h.s16 %v1126_v4  ;;  %v1141_v42 = vunpack.i.h.s16 %v1134_v31  ;;  %v1147_v45 = vunpack.i.h.s16 %v1133_v2 }
 0x317   : > { %v1149_v60 = vpack.i.b16 %v1137_v59, %v1137_v59  ;;  %v5244_v25 = vpack.i.b16 %v1126_v4, %v1126_v4  ;;  %v5245_v40 = vpack.i.b16 %v1134_v31, %v1134_v31  ;;  %v1157_v19 = vpack.i.b16 %v1145_v51, %v1145_v51 }
 0x318   : > { %v1143_v56 = vunpack.i.h.s16 %v1135_v11  ;;  %v1151_v7 = vpack.i.b16 %v1139_v24, %v1139_v24  ;;  %v1153_v9 = vpack.i.b16 %v1141_v42, %v1141_v42  ;;  %v5246_v17 = vpack.i.b16 %v1135_v11, %v1135_v11 }
 0x319   : > { %v5248_v34 = vpack.i.b16 %v1133_v2, %v1133_v2  ;;  %v1159_v62 = vpack.i.b16 %v1147_v45, %v1147_v45  ;;  %v1163_v57 = vrot.slane %v5243_v37, %v6779_v43  ;;  %v1167_v30 = vrot.slane %v5243_v37, %v6781_v5 }
 0x31a   : > { %v1155_v20 = vpack.i.b16 %v1143_v56, %v1143_v56  ;;  %v1171_v12 = vrot.slane %v1149_v60, %v6779_v43  ;;  %v1175_v22 = vrot.slane %v1149_v60, %v6781_v5  ;;  %v1179_v13 = vrot.slane %v5244_v25, %v6779_v43 }
 0x31b   : > { %v1183_v23 = vrot.slane %v5244_v25, %v6781_v5  ;;  %v1187_v61 = vrot.slane %v1151_v7, %v6779_v43  ;;  %v1191_v18 = vrot.slane %v1151_v7, %v6781_v5  ;;  %v1195_v50 = vrot.slane %v5245_v40, %v6779_v43 }
 0x31c   : > { %v1199_v44 = vrot.slane %v5245_v40, %v6781_v5  ;;  %v1203_v52 = vrot.slane %v1153_v9, %v6779_v43  ;;  %v1207_v29 = vrot.slane %v1153_v9, %v6781_v5  ;;  %v1211_v38 = vrot.slane %v5246_v17, %v6779_v43 }
 0x31d   : > { %v1215_v32 = vrot.slane %v5246_v17, %v6781_v5  ;;  %v1219_v6 = vrot.slane %v1155_v20, %v6779_v43  ;;  %v1223_v16 = vrot.slane %v1155_v20, %v6781_v5  ;;  %v1227_v1 = vrot.slane %v5247_v26, %v6779_v43 }
 0x31e   : > { %v1231_v14 = vrot.slane %v5247_v26, %v6781_v5  ;;  %v1235_v27 = vrot.slane %v1157_v19, %v6779_v43  ;;  %v1239_v28 = vrot.slane %v1157_v19, %v6781_v5  ;;  %v1243_v58 = vrot.slane %v5248_v34, %v6779_v43 }
 0x31f   : > { %v1247_v41 = vrot.slane %v5248_v34, %v6781_v5  ;;  %v1251_v46 = vrot.slane %v1159_v62, %v6779_v43  ;;  %v1255_v48 = vrot.slane %v1159_v62, %v6781_v5  ;;  %v1257_v47 = vpack.i.b16 %v1163_v57, %v1163_v57 }
 0x320   : > { %v1264_v10 = vpack.i.b16 %v1167_v30, %v1167_v30  ;;  %v1271_v49 = vpack.i.b16 %v1171_v12, %v1171_v12  ;;  %v1278_v39 = vpack.i.b16 %v1175_v22, %v1175_v22  ;;  %v1285_v35 = vpack.i.b16 %v1179_v13, %v1179_v13 }
 0x321   : > { %v1262_v15 = vrot.slane %v1257_v47, %v6779_v43  ;;  %v1292_v33 = vpack.i.b16 %v1183_v23, %v1183_v23  ;;  %v1299_v54 = vpack.i.b16 %v1187_v61, %v1187_v61  ;;  %v1306_v63 = vpack.i.b16 %v1191_v18, %v1191_v18 }
 0x322   : > { %v1269_v36 = vrot.slane %v1264_v10, %v6779_v43  ;;  %v1276_v3 = vrot.slane %v1271_v49, %v6779_v43  ;;  %v1283_v53 = vrot.slane %v1278_v39, %v6779_v43  ;;  %v1290_v4 = vrot.slane %v1285_v35, %v6779_v43  ;;  %v8199_v49 = vld [vmem:[#allocation22_spill] sm:$0xff]  ;;  %v8200_v39 = vld [vmem:[#allocation20_spill] sm:$0xff] }
 0x323   : > { %v1297_v2 = vrot.slane %v1292_v33, %v6779_v43  ;;  %v1304_v31 = vrot.slane %v1299_v54, %v6779_v43  ;;  %v1311_v59 = vrot.slane %v1306_v63, %v6779_v43  ;;  %v1313_v51 = vpack.i.b16 %v1195_v50, %v1195_v50  ;;  %v8202_v54 = vld [vmem:[#allocation26_spill] sm:$0xff]  ;;  %v8203_v63 = vld [vmem:[#allocation24_spill] sm:$0xff] }
 0x324   : > { %v1320_v37 = vpack.i.b16 %v1199_v44, %v1199_v44  ;;  %v1327_v26 = vpack.i.b16 %v1203_v52, %v1203_v52  ;;  %v1334_v11 = vpack.i.b16 %v1207_v29, %v1207_v29  ;;  %v1341_v24 = vpack.i.b16 %v1211_v38, %v1211_v38 }
 0x325   : > { %v1318_v42 = vrot.slane %v1313_v51, %v6779_v43  ;;  %v1348_v45 = vpack.i.b16 %v1215_v32, %v1215_v32  ;;  %v1355_v60 = vpack.i.b16 %v1219_v6, %v1219_v6  ;;  %v1362_v25 = vpack.i.b16 %v1223_v16, %v1223_v16 }
 0x326   : > { %v1325_v40 = vrot.slane %v1320_v37, %v6779_v43  ;;  %v1332_v19 = vrot.slane %v1327_v26, %v6779_v43  ;;  %v1339_v56 = vrot.slane %v1334_v11, %v6779_v43  ;;  %v1346_v7 = vrot.slane %v1341_v24, %v6779_v43  ;;  %v8211_v26 = vld [vmem:[#allocation38_spill] sm:$0xff]  ;;  %v8212_v11 = vld [vmem:[#allocation36_spill] sm:$0xff] }
 0x327   : > { %v1353_v9 = vrot.slane %v1348_v45, %v6779_v43  ;;  %v1360_v17 = vrot.slane %v1355_v60, %v6779_v43  ;;  %v1367_v34 = vrot.slane %v1362_v25, %v6779_v43  ;;  %v1369_v62 = vpack.i.b16 %v1227_v1, %v1227_v1  ;;  %v8214_v45 = vld [vmem:[#allocation42_spill] sm:$0xff]  ;;  %v8215_v60 = vld [vmem:[#allocation40_spill] sm:$0xff] }
 0x328   : > { %v1376_v57 = vpack.i.b16 %v1231_v14, %v1231_v14  ;;  %v1383_v30 = vpack.i.b16 %v1235_v27, %v1235_v27  ;;  %v1390_v20 = vpack.i.b16 %v1239_v28, %v1239_v28  ;;  %v1397_v12 = vpack.i.b16 %v1243_v58, %v1243_v58 }
 0x329   : > { %v1374_v22 = vrot.slane %v1369_v62, %v6779_v43  ;;  %v1404_v13 = vpack.i.b16 %v1247_v41, %v1247_v41  ;;  %v1411_v23 = vpack.i.b16 %v1251_v46, %v1251_v46  ;;  %v1418_v61 = vpack.i.b16 %v1255_v48, %v1255_v48 }
 0x32a   : > { %v1381_v18 = vrot.slane %v1376_v57, %v6779_v43  ;;  %v1388_v50 = vrot.slane %v1383_v30, %v6779_v43  ;;  %v1395_v44 = vrot.slane %v1390_v20, %v6779_v43  ;;  %v1402_v52 = vrot.slane %v1397_v12, %v6779_v43  ;;  %v8223_v30 = vld [vmem:[#allocation54_spill] sm:$0xff]  ;;  %v8224_v20 = vld [vmem:[#allocation52_spill] sm:$0xff] }
 0x32b   : > { %v1409_v29 = vrot.slane %v1404_v13, %v6779_v43  ;;  %v1416_v38 = vrot.slane %v1411_v23, %v6779_v43  ;;  %v1423_v32 = vrot.slane %v1418_v61, %v6779_v43  ;;  %v5249_v6 = vcombine.low %v1262_v15, %v1269_v36  ;;  %v8205_v15 = vld [vmem:[#allocation30_spill] sm:$0xff]  ;;  %v8206_v36 = vld [vmem:[#allocation28_spill] sm:$0xff] }
 0x32c   : > { %v5250_v16 = vcombine.low %v1276_v3, %v1283_v53  ;;  %v5251_v1 = vcombine.low %v1290_v4, %v1297_v2  ;;  %v5252_v14 = vcombine.low %v1304_v31, %v1311_v59  ;;  %v5253_v27 = vcombine.low %v1318_v42, %v1325_v40  ;;  %v8208_v4 = vld [vmem:[#allocation34_spill] sm:$0xff]  ;;  %v8209_v2 = vld [vmem:[#allocation32_spill] sm:$0xff] }
 0x32d   : > { %v5254_v28 = vcombine.low %v1332_v19, %v1339_v56  ;;  %v5255_v58 = vcombine.low %v1346_v7, %v1353_v9  ;;  %v5256_v41 = vcombine.low %v1360_v17, %v1367_v34  ;;  %v5257_v46 = vcombine.low %v1374_v22, %v1381_v18  ;;  %v8217_v19 = vld [vmem:[#allocation46_spill] sm:$0xff]  ;;  %v8218_v56 = vld [vmem:[#allocation44_spill] sm:$0xff] }
 0x32e   : > { %v5258_v48 = vcombine.low %v1388_v50, %v1395_v44  ;;  %v5259_v47 = vcombine.low %v1402_v52, %v1409_v29  ;;  %v5260_v10 = vcombine.low %v1416_v38, %v1423_v32  ;;  %v8201_v35 = vpack.c.bf16 %v8199_v49, %v8200_v39  ;;  %v8220_v17 = vld [vmem:[#allocation50_spill] sm:$0xff]  ;;  %v8221_v34 = vld [vmem:[#allocation48_spill] sm:$0xff]  ;;  %v8240_v49 = vld [vmem:[#allocation81_spill] sm:$0xff] }
 0x32f   : > { %v8204_v51 = vpack.c.bf16 %v8202_v54, %v8203_v63  ;;  %v8207_v3 = vpack.c.bf16 %v8205_v15, %v8206_v36  ;;  %v8210_v31 = vpack.c.bf16 %v8208_v4, %v8209_v2  ;;  %v8213_v24 = vpack.c.bf16 %v8211_v26, %v8212_v11  ;;  %v8226_v13 = vld [vmem:[#allocation58_spill] sm:$0xff]  ;;  %v8227_v23 = vld [vmem:[#allocation56_spill] sm:$0xff] }
 0x330   : > { %v1496_v33 = vmul.bf16 %v8201_v35, %v5249_v6  ;;  %v8216_v25 = vpack.c.bf16 %v8214_v45, %v8215_v60  ;;  %v8219_v7 = vpack.c.bf16 %v8217_v19, %v8218_v56  ;;  %v8222_v62 = vpack.c.bf16 %v8220_v17, %v8221_v34  ;;  %v8229_v50 = vld [vmem:[#allocation62_spill] sm:$0xff]  ;;  %v8230_v44 = vld [vmem:[#allocation60_spill] sm:$0xff] }
 0x331   : > { %v1497_v37 = vmul.bf16 %v8204_v51, %v5250_v16  ;;  %v1498_v53 = vmul.bf16 %v8207_v3, %v5251_v1  ;;  %v1499_v59 = vmul.bf16 %v8210_v31, %v5252_v14  ;;  %v1500_v42 = vmul.bf16 %v8213_v24, %v5253_v27  ;;  %v8232_v38 = vld [vmem:[#allocation66_spill] sm:$0xff]  ;;  %v8233_v32 = vld [vmem:[#allocation64_spill] sm:$0xff]  ;;  %v8235_v1 = vld [vmem:[#allocation17_spill] sm:$0xff] }
 0x332   : > { %v1501_v40 = vmul.bf16 %v8216_v25, %v5254_v28  ;;  %v6858_v9 = vmul.bf16 %v8219_v7, %v5255_v58  ;;  %v6863_v57 = vmul.bf16 %v8222_v62, %v5256_v41  ;;  %v8225_v12 = vpack.c.bf16 %v8223_v30, %v8224_v20  ;;  %v8236_v14 = vld [vmem:[#allocation77_spill] sm:$0xff]  ;;  %v8237_v58 = vld [vmem:[#allocation78_spill] sm:$0xff] }
 0x333   : > { %v8228_v61 = vpack.c.bf16 %v8226_v13, %v8227_v23  ;;  %v8231_v52 = vpack.c.bf16 %v8229_v50, %v8230_v44  ;;  %v8234_v6 = vpack.c.bf16 %v8232_v38, %v8233_v32  ;;  %v6887_v27 = vadd.f32 %v8236_v14, %v8235_v1 }
 0x334   : > { %v6868_v22 = vmul.bf16 %v8225_v12, %v5257_v46  ;;  %v1510_v28 = vunpack.c.l.bf16 %v1497_v37  ;;  %v6891_v41 = vadd.f32 %v8237_v58, %v8235_v1  ;;  %v8238_v46 = vld [vmem:[#allocation79_spill] sm:$0xff]  ;;  %v1508_v35 = vunpack.c.l.bf16 %v1496_v33 }
 0x335   : > { %v6873_v18 = vmul.bf16 %v8228_v61, %v5258_v48  ;;  %v6878_v29 = vmul.bf16 %v8231_v52, %v5259_v47  ;;  %v6883_v16 = vmul.bf16 %v8234_v6, %v5260_v10  ;;  %v6895_v48 = vadd.f32 %v8238_v46, %v8235_v1  ;;  %v8239_v47 = vld [vmem:[#allocation18_spill] sm:$0xff] }
 0x336   : > { %v6899_v39 = vadd.f32 %v8240_v49, %v8239_v47  ;;  %v1509_v10 = vunpack.c.h.bf16 %v1496_v33  ;;  %v1511_v54 = vunpack.c.h.bf16 %v1497_v37  ;;  %v1512_v63 = vunpack.c.l.bf16 %v1498_v53 }
 0x337   : > { %v1513_v51 = vunpack.c.h.bf16 %v1498_v53  ;;  %v1514_v15 = vunpack.c.l.bf16 %v1499_v59  ;;  %v1515_v36 = vunpack.c.h.bf16 %v1499_v59  ;;  %v1516_v3 = vunpack.c.l.bf16 %v1500_v42 }
 0x338   : > { %v1517_v4 = vunpack.c.h.bf16 %v1500_v42  ;;  %v1518_v2 = vunpack.c.l.bf16 %v1501_v40  ;;  %v1519_v31 = vunpack.c.h.bf16 %v1501_v40  ;;  %v1520_v26 = vunpack.c.l.bf16 %v6858_v9 }
 0x339   : > { %v1521_v11 = vunpack.c.h.bf16 %v6858_v9  ;;  %v1522_v24 = vunpack.c.l.bf16 %v6863_v57  ;;  %v1523_v45 = vunpack.c.h.bf16 %v6863_v57  ;;  %v1532_v60 = vadd.f32 %v1510_v28, %v1508_v35 }
 0x33a   : > { %v1524_v33 = vunpack.c.l.bf16 %v6868_v22  ;;  %v1543_v37 = vadd.f32 %v1511_v54, %v1509_v10  ;;  %v2246_v53 = vcombine.high %v6747_v55, %v6783_v0  ;;  %v2253_v59 = vrot.slane %v2245_v21, %v6765_v8  ;;  %v8241_v55 = vld [vmem:[#allocation68_spill] sm:$0xff]  ;;  %v8242_v21 = vld [vmem:[#allocation69_spill] sm:$0xff] }
 0x33b   : > { %v1525_v42 = vunpack.c.h.bf16 %v6868_v22  ;;  %v1526_v25 = vunpack.c.l.bf16 %v6873_v18  ;;  %v1527_v40 = vunpack.c.h.bf16 %v6873_v18  ;;  %v1533_v19 = vadd.f32 %v1532_v60, %v1512_v63 }
 0x33c   : > { %v1544_v56 = vadd.f32 %v1543_v37, %v1513_v51  ;;  %v2260_v7 = vrot.slane %v2246_v53, %v6765_v8  ;;  %v2261_v9 = vcombine.high %v2253_v59, %v2253_v59  ;;  %v2269_v17 = vrot.slane %v2253_v59, %v6765_v8 }
 0x33d   : > { %v1534_v34 = vadd.f32 %v1533_v19, %v1514_v15  ;;  %v6918_v62 = vmul.f32 0.2, %v6899_v39  ;;  %v6922_v0 = vadd.f32 %v8241_v55, %v8239_v47  ;;  %v6926_v57 = vadd.f32 %v8242_v21, %v8239_v47 }
 0x33e   : > { %v1545_v30 = vadd.f32 %v1544_v56, %v1515_v36  ;;  %v2262_v20 = vcombine.high %v2260_v7, %v2260_v7  ;;  %v2276_v12 = vrot.slane %v2260_v7, %v6765_v8  ;;  %v2283_v22 = vrot.slane %v2261_v9, %v6765_v8 }
 0x33f   : > { %v1535_v13 = vadd.f32 %v1534_v34, %v1516_v3  ;;  %v2291_v23 = vcombine.high %v2269_v17, %v2269_v17  ;;  %v2294_v61 = vunpack.i.h.s16 %v2269_v17  ;;  %v5303_v18 = vpack.i.b16 %v2269_v17, %v2269_v17 }
 0x340   : > { %v1546_v50 = vadd.f32 %v1545_v30, %v1517_v4  ;;  %v2290_v44 = vrot.slane %v2262_v20, %v6765_v8  ;;  %v2292_v52 = vcombine.high %v2283_v22, %v2283_v22  ;;  %v2296_v38 = vunpack.i.h.s16 %v2283_v22 }
 0x341   : > { %v1536_v32 = vadd.f32 %v1535_v13, %v1518_v2  ;;  %v2298_v6 = vunpack.i.h.s16 %v2291_v23  ;;  %v2302_v14 = vunpack.i.h.s16 %v2276_v12  ;;  %v2306_v28 = vpack.i.b16 %v2294_v61, %v2294_v61 }
 0x342   : > { %v1547_v58 = vadd.f32 %v1546_v50, %v1519_v31  ;;  %v2300_v46 = vunpack.i.h.s16 %v2292_v52  ;;  %v2304_v49 = vunpack.i.h.s16 %v2290_v44  ;;  %v5304_v35 = vpack.i.b16 %v2283_v22, %v2283_v22 }
 0x343   : > { %v1537_v10 = vadd.f32 %v1536_v32, %v1520_v26  ;;  %v2308_v54 = vpack.i.b16 %v2296_v38, %v2296_v38  ;;  %v5305_v63 = vpack.i.b16 %v2291_v23, %v2291_v23  ;;  %v2310_v51 = vpack.i.b16 %v2298_v6, %v2298_v6 }
 0x344   : > { %v1548_v15 = vadd.f32 %v1547_v58, %v1521_v11  ;;  %v5306_v36 = vpack.i.b16 %v2292_v52, %v2292_v52  ;;  %v2312_v3 = vpack.i.b16 %v2300_v46, %v2300_v46  ;;  %v5307_v4 = vpack.i.b16 %v2276_v12, %v2276_v12 }
 0x345   : > { %v1538_v60 = vadd.f32 %v1537_v10, %v1522_v24  ;;  %v2314_v37 = vpack.i.b16 %v2302_v14, %v2302_v14  ;;  %v5308_v53 = vpack.i.b16 %v2290_v44, %v2290_v44  ;;  %v2316_v59 = vpack.i.b16 %v2304_v49, %v2304_v49 }
 0x346   : > { %v1549_v2 = vadd.f32 %v1548_v15, %v1523_v45  ;;  %v2320_v19 = vrot.slane %v5303_v18, %v6779_v43  ;;  %v2324_v31 = vrot.slane %v5303_v18, %v6781_v5  ;;  %v2328_v56 = vrot.slane %v2306_v28, %v6779_v43 }
 0x347   : > { %v1539_v7 = vadd.f32 %v1538_v60, %v1524_v33  ;;  %v2332_v26 = vrot.slane %v2306_v28, %v6781_v5  ;;  %v2336_v9 = vrot.slane %v5304_v35, %v6779_v43  ;;  %v2340_v11 = vrot.slane %v5304_v35, %v6781_v5 }
 0x348   : > { %v1550_v17 = vadd.f32 %v1549_v2, %v1525_v42  ;;  %v2344_v24 = vrot.slane %v2308_v54, %v6779_v43  ;;  %v2348_v34 = vrot.slane %v2308_v54, %v6781_v5  ;;  %v2352_v45 = vrot.slane %v5305_v63, %v6779_v43 }
 0x349   : > { %v6940_v55 = vadd.f32 %v1539_v7, %v1526_v25  ;;  %v2356_v21 = vrot.slane %v5305_v63, %v6781_v5  ;;  %v2360_v30 = vrot.slane %v2310_v51, %v6779_v43  ;;  %v2364_v33 = vrot.slane %v2310_v51, %v6781_v5 }
 0x34a   : > { %v6945_v20 = vadd.f32 %v1550_v17, %v1527_v40  ;;  %v2368_v12 = vrot.slane %v5306_v36, %v6779_v43  ;;  %v2372_v42 = vrot.slane %v5306_v36, %v6781_v5  ;;  %v2376_v22 = vrot.slane %v2312_v3, %v6779_v43 }
 0x34b   : > { %v2380_v13 = vrot.slane %v2312_v3, %v6781_v5  ;;  %v2384_v23 = vrot.slane %v5307_v4, %v6779_v43  ;;  %v2388_v25 = vrot.slane %v5307_v4, %v6781_v5  ;;  %v2392_v61 = vrot.slane %v2314_v37, %v6779_v43 }
 0x34c   : > { %v2396_v18 = vrot.slane %v2314_v37, %v6781_v5  ;;  %v2400_v50 = vrot.slane %v5308_v53, %v6779_v43  ;;  %v2404_v40 = vrot.slane %v5308_v53, %v6781_v5  ;;  %v2408_v44 = vrot.slane %v2316_v59, %v6779_v43 }
 0x34d   : > { %v2412_v52 = vrot.slane %v2316_v59, %v6781_v5  ;;  %v2414_v38 = vpack.i.b16 %v2320_v19, %v2320_v19  ;;  %v2421_v32 = vpack.i.b16 %v2324_v31, %v2324_v31  ;;  %v2428_v6 = vpack.i.b16 %v2328_v56, %v2328_v56 }
 0x34e   : > { %v2435_v14 = vpack.i.b16 %v2332_v26, %v2332_v26  ;;  %v2442_v28 = vpack.i.b16 %v2336_v9, %v2336_v9  ;;  %v2449_v58 = vpack.i.b16 %v2340_v11, %v2340_v11  ;;  %v2456_v46 = vpack.i.b16 %v2344_v24, %v2344_v24 }
 0x34f   : > { %v2419_v49 = vrot.slane %v2414_v38, %v6779_v43  ;;  %v2426_v35 = vrot.slane %v2421_v32, %v6779_v43  ;;  %v2433_v10 = vrot.slane %v2428_v6, %v6779_v43  ;;  %v2463_v54 = vpack.i.b16 %v2348_v34, %v2348_v34 }
 0x350   : > { %v2440_v63 = vrot.slane %v2435_v14, %v6779_v43  ;;  %v2447_v51 = vrot.slane %v2442_v28, %v6779_v43  ;;  %v2454_v15 = vrot.slane %v2449_v58, %v6779_v43  ;;  %v2461_v36 = vrot.slane %v2456_v46, %v6779_v43 }
 0x351   : > { %v2468_v3 = vrot.slane %v2463_v54, %v6779_v43  ;;  %v2470_v4 = vpack.i.b16 %v2352_v45, %v2352_v45  ;;  %v2477_v60 = vpack.i.b16 %v2356_v21, %v2356_v21  ;;  %v2484_v37 = vpack.i.b16 %v2360_v30, %v2360_v30 }
 0x352   : > { %v2491_v53 = vpack.i.b16 %v2364_v33, %v2364_v33  ;;  %v2498_v59 = vpack.i.b16 %v2368_v12, %v2368_v12  ;;  %v2505_v2 = vpack.i.b16 %v2372_v42, %v2372_v42  ;;  %v2512_v19 = vpack.i.b16 %v2376_v22, %v2376_v22 }
 0x353   : > { %v2475_v31 = vrot.slane %v2470_v4, %v6779_v43  ;;  %v2482_v56 = vrot.slane %v2477_v60, %v6779_v43  ;;  %v2489_v7 = vrot.slane %v2484_v37, %v6779_v43  ;;  %v2519_v26 = vpack.i.b16 %v2380_v13, %v2380_v13 }
 0x354   : > { %v2496_v9 = vrot.slane %v2491_v53, %v6779_v43  ;;  %v2503_v11 = vrot.slane %v2498_v59, %v6779_v43  ;;  %v2510_v17 = vrot.slane %v2505_v2, %v6779_v43  ;;  %v2517_v24 = vrot.slane %v2512_v19, %v6779_v43  ;;  %v8243_v59 = vld [vmem:[#allocation23_spill] sm:$0xff]  ;;  %v8244_v2 = vld [vmem:[#allocation21_spill] sm:$0xff] }
 0x355   : > { %v2524_v34 = vrot.slane %v2519_v26, %v6779_v43  ;;  %v2526_v45 = vpack.i.b16 %v2384_v23, %v2384_v23  ;;  %v2533_v21 = vpack.i.b16 %v2388_v25, %v2388_v25  ;;  %v2540_v30 = vpack.i.b16 %v2392_v61, %v2392_v61 }
 0x356   : > { %v2547_v33 = vpack.i.b16 %v2396_v18, %v2396_v18  ;;  %v2554_v12 = vpack.i.b16 %v2400_v50, %v2400_v50  ;;  %v2561_v42 = vpack.i.b16 %v2404_v40, %v2404_v40  ;;  %v2568_v22 = vpack.i.b16 %v2408_v44, %v2408_v44 }
 0x357   : > { %v2531_v38 = vrot.slane %v2526_v45, %v6779_v43  ;;  %v2538_v13 = vrot.slane %v2533_v21, %v6779_v43  ;;  %v2545_v32 = vrot.slane %v2540_v30, %v6779_v43  ;;  %v2575_v6 = vpack.i.b16 %v2412_v52, %v2412_v52  ;;  %v8246_v45 = vld [vmem:[#allocation27_spill] sm:$0xff]  ;;  %v8247_v21 = vld [vmem:[#allocation25_spill] sm:$0xff] }
 0x358   : > { %v2552_v14 = vrot.slane %v2547_v33, %v6779_v43  ;;  %v2559_v28 = vrot.slane %v2554_v12, %v6779_v43  ;;  %v2566_v58 = vrot.slane %v2561_v42, %v6779_v43  ;;  %v2573_v23 = vrot.slane %v2568_v22, %v6779_v43  ;;  %v8261_v12 = vld [vmem:[#allocation47_spill] sm:$0xff]  ;;  %v8262_v42 = vld [vmem:[#allocation45_spill] sm:$0xff] }
 0x359   : > { %v2580_v25 = vrot.slane %v2575_v6, %v6779_v43  ;;  %v5309_v61 = vcombine.low %v2419_v49, %v2426_v35  ;;  %v5310_v18 = vcombine.low %v2433_v10, %v2440_v63  ;;  %v5311_v50 = vcombine.low %v2447_v51, %v2454_v15  ;;  %v8249_v49 = vld [vmem:[#allocation31_spill] sm:$0xff]  ;;  %v8250_v35 = vld [vmem:[#allocation29_spill] sm:$0xff] }
 0x35a   : > { %v5312_v40 = vcombine.low %v2461_v36, %v2468_v3  ;;  %v5313_v44 = vcombine.low %v2475_v31, %v2482_v56  ;;  %v5314_v46 = vcombine.low %v2489_v7, %v2496_v9  ;;  %v5315_v54 = vcombine.low %v2503_v11, %v2510_v17  ;;  %v8252_v51 = vld [vmem:[#allocation35_spill] sm:$0xff]  ;;  %v8253_v15 = vld [vmem:[#allocation33_spill] sm:$0xff] }
 0x35b   : > { %v5316_v4 = vcombine.low %v2517_v24, %v2524_v34  ;;  %v5317_v60 = vcombine.low %v2531_v38, %v2538_v13  ;;  %v5318_v52 = vcombine.low %v2545_v32, %v2552_v14  ;;  %v5319_v37 = vcombine.low %v2559_v28, %v2566_v58  ;;  %v8255_v31 = vld [vmem:[#allocation39_spill] sm:$0xff]  ;;  %v8256_v56 = vld [vmem:[#allocation37_spill] sm:$0xff] }
 0x35c   : > { %v5320_v53 = vcombine.low %v2573_v23, %v2580_v25  ;;  %v8245_v19 = vpack.c.bf16 %v8243_v59, %v8244_v2  ;;  %v8248_v30 = vpack.c.bf16 %v8246_v45, %v8247_v21  ;;  %v8251_v10 = vpack.c.bf16 %v8249_v49, %v8250_v35  ;;  %v8258_v11 = vld [vmem:[#allocation43_spill] sm:$0xff]  ;;  %v8259_v17 = vld [vmem:[#allocation41_spill] sm:$0xff] }
 0x35d   : > { %v8254_v36 = vpack.c.bf16 %v8252_v51, %v8253_v15  ;;  %v8257_v7 = vpack.c.bf16 %v8255_v31, %v8256_v56  ;;  %v8260_v24 = vpack.c.bf16 %v8258_v11, %v8259_v17  ;;  %v8263_v22 = vpack.c.bf16 %v8261_v12, %v8262_v42  ;;  %v8264_v13 = vld [vmem:[#allocation51_spill] sm:$0xff]  ;;  %v8265_v32 = vld [vmem:[#allocation49_spill] sm:$0xff]  ;;  %v8280_v42 = vld [vmem:[#allocation88_spill] sm:$0xff] }
 0x35e   : > { %v2653_v26 = vmul.bf16 %v8245_v19, %v5309_v61  ;;  %v2654_v33 = vmul.bf16 %v8248_v30, %v5310_v18  ;;  %v2655_v63 = vmul.bf16 %v8251_v10, %v5311_v50  ;;  %v8266_v6 = vpack.c.bf16 %v8264_v13, %v8265_v32  ;;  %v8267_v28 = vld [vmem:[#allocation55_spill] sm:$0xff]  ;;  %v8268_v58 = vld [vmem:[#allocation53_spill] sm:$0xff]  ;;  %v8279_v10 = vld [vmem:[#allocation80_spill] sm:$0xff] }
 0x35f   : > { %v2656_v3 = vmul.bf16 %v8254_v36, %v5312_v40  ;;  %v2657_v9 = vmul.bf16 %v8257_v7, %v5313_v44  ;;  %v2658_v34 = vmul.bf16 %v8260_v24, %v5314_v46  ;;  %v2659_v38 = vmul.bf16 %v8263_v22, %v5315_v54  ;;  %v8270_v61 = vld [vmem:[#allocation59_spill] sm:$0xff]  ;;  %v8271_v18 = vld [vmem:[#allocation57_spill] sm:$0xff] }
 0x360   : > { %v7007_v14 = vmul.bf16 %v8266_v6, %v5316_v4  ;;  %v8269_v23 = vpack.c.bf16 %v8267_v28, %v8268_v58  ;;  %v8272_v50 = vpack.c.bf16 %v8270_v61, %v8271_v18  ;;  %v8273_v44 = vld [vmem:[#allocation63_spill] sm:$0xff]  ;;  %v8274_v46 = vld [vmem:[#allocation61_spill] sm:$0xff]  ;;  %v2797_v21 = vmul.f32 0.2, %v6887_v27 }
 0x361   : > { %v8275_v59 = vpack.c.bf16 %v8273_v44, %v8274_v46  ;;  %v8276_v54 = vld [vmem:[#allocation67_spill] sm:$0xff]  ;;  %v8277_v19 = vld [vmem:[#allocation65_spill] sm:$0xff]  ;;  %v2798_v30 = vmul.f32 0.2, %v6895_v48  ;;  %v2667_v49 = vunpack.c.l.bf16 %v2654_v33  ;;  %v2668_v35 = vunpack.c.h.bf16 %v2654_v33 }
 0x362   : > { %v7012_v25 = vmul.bf16 %v8269_v23, %v5317_v60  ;;  %v7017_v40 = vmul.bf16 %v8272_v50, %v5318_v52  ;;  %v8278_v45 = vpack.c.bf16 %v8276_v54, %v8277_v19  ;;  %v3954_v60 = vmul.f32 0.2, %v6891_v41 }
 0x363   : > { %v7022_v2 = vmul.bf16 %v8275_v59, %v5319_v37  ;;  %v2803_v52 = vmax.f32 %v6899_v39, %v6918_v62  ;;  %v3948_v37 = vadd.f32 %v8279_v10, %v8235_v1  ;;  %v3956_v51 = vmul.f32 0.2, %v6922_v0 }
 0x364   : > { %v7027_v4 = vmul.bf16 %v8278_v45, %v5320_v53  ;;  %v2800_v15 = vmul.f32 0.2, %v6926_v57  ;;  %v2665_v53 = vunpack.c.l.bf16 %v2653_v26  ;;  %v2666_v36 = vunpack.c.h.bf16 %v2653_v26 }
 0x365   : > { %v2801_v31 = vmax.f32 %v6887_v27, %v2797_v21  ;;  %v2669_v56 = vunpack.c.l.bf16 %v2655_v63  ;;  %v3958_v7 = vmax.f32 %v6891_v41, %v3954_v60  ;;  %v2802_v11 = vmax.f32 %v6895_v48, %v2798_v30 }
 0x366   : > { %v2670_v33 = vunpack.c.h.bf16 %v2655_v63  ;;  %v2689_v17 = vadd.f32 %v2667_v49, %v2665_v53  ;;  %v2700_v24 = vadd.f32 %v2668_v35, %v2666_v36  ;;  %v3955_v62 = vmul.f32 0.2, %v3948_v37 }
 0x367   : > { %v2805_v39 = vpack.c.bf16 %v2803_v52, %v2801_v31  ;;  %v3960_v1 = vmax.f32 %v6922_v0, %v3956_v51  ;;  %v2804_v12 = vmax.f32 %v6926_v57, %v2800_v15  ;;  %v3952_v22 = vadd.f32 %v8280_v42, %v8239_v47  ;;  %v8281_v0 = vld [vmem:[#allocation19_spill] sm:$0xff]  ;;  %v5670_v52 = vld [vmem:[#allocation8] sm:$0xff]  }
 0x368   : > { %v2671_v26 = vunpack.c.l.bf16 %v2656_v3  ;;  %v2672_v13 = vunpack.c.h.bf16 %v2656_v3  ;;  %v2690_v27 = vadd.f32 %v2689_v17, %v2669_v56  ;;  %v2701_v32 = vadd.f32 %v2700_v24, %v2670_v33  ;;  %v5674_v24 = vld [vmem:[%s6114_s1 + $0x8] sm:$0xff] }
 0x369   : > { %v3962_v6 = vpack.c.bf16 %v3960_v1, %v3958_v7  ;;  %v2806_v41 = vpack.c.bf16 %v2804_v12, %v2802_v11  ;;  %v3957_v28 = vmul.f32 0.2, %v3952_v22  ;;  %v2673_v48 = vunpack.c.l.bf16 %v2657_v9  ;;  %v5673_v11 = vld [vmem:[%s6114_s1] sm:$0xff] }
 0x36a   : > { %v2674_v63 = vunpack.c.h.bf16 %v2657_v9  ;;  %v2691_v58 = vadd.f32 %v2690_v27, %v2671_v26  ;;  %v2702_v23 = vadd.f32 %v2701_v32, %v2672_v13  ;;  %v2675_v61 = vunpack.c.l.bf16 %v2658_v34 }
 0x36b   : > { %v3959_v18 = vmax.f32 %v3948_v37, %v3955_v62  ;;  %v3961_v50 = vmax.f32 %v3952_v22, %v3957_v28  ;;  %v2811_v44 = vand.u32 %v2806_v41, %v8281_v0  ;;  %v2676_v57 = vunpack.c.h.bf16 %v2658_v34 }
 0x36c   : > { %v2692_v46 = vadd.f32 %v2691_v58, %v2673_v48  ;;  %v2703_v59 = vadd.f32 %v2702_v23, %v2674_v63  ;;  %v2808_v47 = vand.u32 %v2805_v39, %v8281_v0  ;;  %v2677_v54 = vunpack.c.l.bf16 %v2659_v38 }
 0x36d   : > { %v3963_v3 = vpack.c.bf16 %v3961_v50, %v3959_v18  ;;  %2813 = vmatprep.subr.bf16.mxu1 %v2811_v44  ;;  %v2678_v19 = vunpack.c.h.bf16 %v2659_v38  ;;  %v2679_v9 = vunpack.c.l.bf16 %v7007_v14  ;;  %v2680_v30 = vunpack.c.h.bf16 %v7007_v14 }
 0x36e   : > { %v2693_v45 = vadd.f32 %v2692_v46, %v2675_v61  ;;  %v2704_v21 = vadd.f32 %v2703_v59, %v2676_v57  ;;  %2814 = vmatpush1.bf16.msra.mxu1 %v2808_v47  ;;  %v3965_v34 = vand.u32 %v3962_v6, %v8281_v0  ;;  %v2681_v10 = vunpack.c.l.bf16 %v7012_v25  ;;  %v5675_v6 = vld [vmem:[#allocation8 + $0x18] sm:$0xff]  }
 0x36f   : > { %v3968_v60 = vand.u32 %v3963_v3, %v8281_v0  ;;  %v2682_v38 = vunpack.c.h.bf16 %v7012_v25  ;;  %v8282_v15 = vmov 0   ;;  %v2683_v53 = vunpack.c.l.bf16 %v7017_v40  ;;  %v5671_v25 = vld [vmem:[#allocation8 + $0x8] sm:$0xff]  }
 0x370   : > { %v2694_v49 = vadd.f32 %v2693_v45, %v2677_v54  ;;  %v2705_v35 = vadd.f32 %v2704_v21, %v2678_v19  ;;  %v2684_v14 = vunpack.c.h.bf16 %v7017_v40  ;;  %v5672_v40 = vld [vmem:[#allocation8 + $0x10] sm:$0xff]   ;;  %v1556_v33 = vunpack.c.l.bf16 %v5673_v11  ;;  %v5676_v54 = vld [vmem:[#allocation8 + $0x20] sm:$0xff]  }
 0x371   : > { %3970 = vmatprep.subr.bf16.mxu0 %v3968_v60  ;;  %5326 = vmatmul.mubr.msk.bf16.vlgmr.msra.gmra.mrb[60].mxu1 %vm443_vm3, %v5670_v52  ;;  %v1557_v17 = vunpack.c.h.bf16 %v5673_v11  ;;  %v2713_v39 = vunpack.c.l.bf16 %v5674_v24  ;;  %v2714_v62 = vunpack.c.h.bf16 %v5674_v24  ;;  %v5677_v11 = vld [vmem:[#allocation8 + $0x28] sm:$0xff]  }
 0x372   : > { %v2695_v37 = vadd.f32 %v2694_v49, %v2679_v9  ;;  %v2706_v51 = vadd.f32 %v2705_v35, %v2680_v30  ;;  %3971 = vmatpush1.bf16.msra.mxu0 %v3965_v34  ;;  %2855 = vmatprep.mubr.bf16.mxu1 %v8282_v15  ;;  %v1558_v1 = vmul.f32 %v1556_v33, %v1556_v33 }
 0x373   : > { %v1559_v12 = vmul.f32 %v1557_v17, %v1557_v17  ;;  %v2715_v42 = vmul.f32 %v2713_v39, %v2713_v39  ;;  %v2716_v22 = vmul.f32 %v2714_v62, %v2714_v62 }
 0x374   : > { %v2696_v36 = vadd.f32 %v2695_v37, %v2681_v10  ;;  %v2707_v31 = vadd.f32 %v2706_v51, %v2682_v38  ;;  %v1560_v26 = vrot.slane %v1558_v1, 4  ;;  %v1528_v38 = vunpack.c.l.bf16 %v6878_v29 }
 0x375   : > { %5386 = vmatmul.mubr.msk.bf16.vlgmr.msra.gmra.mrb[60].mxu0 %vm443_vm3, %v5670_v52  ;;  %v1566_v13 = vrot.slane %v1559_v12, 4  ;;  %v2717_v27 = vrot.slane %v2715_v42, 4  ;;  %v2723_v32 = vrot.slane %v2716_v22, 4  ;;  %v1529_v37 = vunpack.c.h.bf16 %v6878_v29 }
 0x376   : > { %v7058_v56 = vadd.f32 %v2696_v36, %v2683_v53  ;;  %v7060_v7 = vadd.f32 %v2707_v31, %v2684_v14  ;;  %4012 = vmatprep.mubr.bf16.mxu0 %v8282_v15  ;;  %v1561_v41 = vadd.f32 %v1560_v26, %v1558_v1  ;;  %v1530_v53 = vunpack.c.l.bf16 %v6883_v16 }
 0x377   : > { %v1567_v28 = vadd.f32 %v1566_v13, %v1559_v12  ;;  %v2718_v48 = vadd.f32 %v2717_v27, %v2715_v42  ;;  %v2724_v63 = vadd.f32 %v2723_v32, %v2716_v22  ;;  %v2685_v14 = vunpack.c.l.bf16 %v7022_v2 }
 0x378   : > { %v1562_v58 = vrot.slane %v1561_v41, 2  ;;  %v2686_v36 = vunpack.c.h.bf16 %v7022_v2  ;;  %v1531_v31 = vunpack.c.h.bf16 %v6883_v16  ;;  %v1541_v29 = vadd.f32 %v6940_v55, %v1528_v38 }
 0x379   : > { %5327 = vmatmul.mubr.msk.bf16.gmra.mrb[64].mxu1 %vm443_vm3, %v5671_v25  ;;  %v1568_v23 = vrot.slane %v1567_v28, 2  ;;  %v2719_v61 = vrot.slane %v2718_v48, 2  ;;  %v2725_v18 = vrot.slane %v2724_v63, 2  ;;  %v1552_v33 = vadd.f32 %v6945_v20, %v1529_v37 }
 0x37a   : > { %2865 = vmatprep.mubr.bf16.mxu1 %v8282_v15  ;;  %v1563_v50 = vadd.f32 %v1562_v58, %v1561_v41  ;;  %v2698_v17 = vadd.f32 %v7058_v56, %v2685_v14  ;;  %v2709_v2 = vadd.f32 %v7060_v7, %v2686_v36  ;;  %v1542_v16 = vadd.f32 %v1541_v29, %v1530_v53  ;;  %v5678_v56 = vld [vmem:[#allocation8 + $0x30] sm:$0xff]  }
 0x37b   : > { %v1569_v0 = vadd.f32 %v1568_v23, %v1567_v28  ;;  %v2720_v44 = vadd.f32 %v2719_v61, %v2718_v48  ;;  %v2726_v57 = vadd.f32 %v2725_v18, %v2724_v63  ;;  %v1553_v24 = vadd.f32 %v1552_v33, %v1531_v31  ;;  %v5679_v23 = vld [vmem:[#allocation8 + $0x38] sm:$0xff]   ;;  %v5680_v61 = vld [vmem:[#allocation8 + $0x40] sm:$0xff]   ;;  %v5681_v18 = vld [vmem:[#allocation8 + $0x48] sm:$0xff]  }
 0x37c   : > { %v1564_v46 = vrot.slane %v1563_v50, 1 }
 0x37d   : > { %5387 = vmatmul.mubr.msk.bf16.gmra.mrb[64].mxu0 %vm443_vm3, %v5671_v25  ;;  %v1570_v59 = vrot.slane %v1569_v0, 1  ;;  %v2721_v47 = vrot.slane %v2720_v44, 1  ;;  %v2727_v3 = vrot.slane %v2726_v57, 1  ;;  %v2687_v25 = vunpack.c.l.bf16 %v7027_v4 }
 0x37e   : > { %4022 = vmatprep.mubr.bf16.mxu0 %v8282_v15  ;;  %v1565_v19 = vadd.f32 %v1564_v46, %v1563_v50  ;;  %v1555_v1 = vpack.c.bf16 %v1553_v24, %v1553_v24  ;;  %v5682_v50 = vld [vmem:[#allocation8 + $0x50] sm:$0xff]  }
 0x37f   : > { %v1571_v45 = vadd.f32 %v1570_v59, %v1569_v0  ;;  %v2722_v21 = vadd.f32 %v2721_v47, %v2720_v44  ;;  %v2728_v9 = vadd.f32 %v2727_v3, %v2726_v57  ;;  %v2699_v39 = vadd.f32 %v2698_v17, %v2687_v25  ;;  %v5683_v0 = vld [vmem:[#allocation8 + $0x58] sm:$0xff]   ;;  %v5684_v44 = vld [vmem:[#allocation8 + $0x60] sm:$0xff]  }
 0x380   : > { %v1572_v60 = vmul.f32 -0.1, %v1565_v19  ;;  %v1579_v22 = vunpack.c.l.bf16 %v1555_v1 }
 0x381   : > { %5328 = vmatmul.mubr.msk.bf16.gmra.mrb[68].mxu1 %vm443_vm3, %v5672_v40  ;;  %v1573_v30 = vmul.f32 -0.1, %v1571_v45  ;;  %v2729_v49 = vmul.f32 -0.1, %v2722_v21  ;;  %v2730_v35 = vmul.f32 -0.1, %v2728_v9  ;;  %v2711_v12 = vpack.c.bf16 %v2699_v39, %v2699_v39 }
 0x382   : > { %2875 = vmatprep.mubr.bf16.mxu1 %v8282_v15  ;;  %v1574_v34 = vmul.f32 1.442695, %v1572_v60  ;;  %v7272_v60 = vld [vmem:[%s6114_s1 + $0x10] sm:$0xff] }
 0x383   : > { %v1576_v52 = vmul.f32 1.442695, %v1573_v30  ;;  %v2731_v10 = vmul.f32 1.442695, %v2729_v49  ;;  %v2733_v51 = vmul.f32 1.442695, %v2730_v35  ;;  %v2735_v20 = vunpack.c.l.bf16 %v2711_v12 }
 0x384   : > { %5652 = vpow2.f32 %v1574_v34 }
 0x385   : > { %5388 = vmatmul.mubr.msk.bf16.gmra.mrb[68].mxu0 %vm443_vm3, %v5672_v40  ;;  %5654 = vpow2.f32 %v1576_v52  ;;  %v2688_v40 = vunpack.c.h.bf16 %v7027_v4  ;;  %v1554_v4 = vpack.c.bf16 %v1542_v16, %v1542_v16 }
 0x386   : > { %4032 = vmatprep.mubr.bf16.mxu0 %v8282_v15  ;;  %5656 = vpow2.f32 %v2731_v10 }
 0x387   : > { %5658 = vpow2.f32 %v2733_v51  ;;  %v2710_v62 = vadd.f32 %v2709_v2, %v2688_v40  ;;  %v1578_v55 = vunpack.c.l.bf16 %v1554_v4 }
 0x389   : > { %5329 = vmatmul.mubr.msk.bf16.gmra.mrb[72].mxu1 %vm443_vm3, %v5675_v6  ;;  %v2712_v42 = vpack.c.bf16 %v2710_v62, %v2710_v62 }
 0x38a   : > { %2885 = vmatprep.mubr.bf16.mxu1 %v8282_v15 }
 0x38b   : > { %v2736_v27 = vunpack.c.l.bf16 %v2712_v42 }
 0x38d   : > { %5389 = vmatmul.mubr.msk.bf16.gmra.mrb[72].mxu0 %vm443_vm3, %v5675_v6 }
 0x38e   : > { %4042 = vmatprep.mubr.bf16.mxu0 %v8282_v15  ;;  %v5653_v26 = vpop.eup %5652 }
 0x38f   : > { %v5655_v7 = vpop.eup %5654  ;;  %v1580_v13 = vmul.f32 %v5653_v26, %v1578_v55 }
 0x390   : > { %v5657_v32 = vpop.eup %5656  ;;  %v1581_v6 = vmul.f32 %v5655_v7, %v1579_v22 }
 0x391   : > { %5330 = vmatmul.mubr.msk.bf16.gmra.mrb[76].mxu1 %vm443_vm3, %v5676_v54  ;;  %v2737_v41 = vmul.f32 %v5657_v32, %v2735_v20  ;;  %v5659_v28 = vpop.eup %5658 }
 0x392   : > { %2895 = vmatprep.mubr.bf16.mxu1 %v8282_v15  ;;  %v2738_v48 = vmul.f32 %v5659_v28, %v2736_v27 }
 0x393   : > { %v7101_v63 = vadd.f32 %v2737_v41, %v1580_v13 }
 0x394   : > { %v7103_v58 = vadd.f32 %v2738_v48, %v1581_v6 }
 0x395   : > { %5390 = vmatmul.mubr.msk.bf16.gmra.mrb[76].mxu0 %vm443_vm3, %v5676_v54  ;;  %8283 = vst [vmem:[#allocation70_spill] sm:$0xff] %v7101_v63 }
 0x396   : > { %4052 = vmatprep.mubr.bf16.mxu0 %v8282_v15  ;;  %8284 = vst [vmem:[#allocation82_spill] sm:$0xff] %v7103_v58 }
 0x399   : > { %5331 = vmatmul.mubr.msk.bf16.gmra.mrb[80].mxu1 %vm443_vm3, %v5677_v11 }
 0x39a   : > { %2905 = vmatprep.mubr.bf16.mxu1 %v8282_v15 }
 0x39d   : > { %5391 = vmatmul.mubr.msk.bf16.gmra.mrb[80].mxu0 %vm443_vm3, %v5677_v11 }
 0x39e   : > { %4062 = vmatprep.mubr.bf16.mxu0 %v8282_v15 }
 0x3a1   : > { %5332 = vmatmul.mubr.msk.bf16.gmra.mrb[84].mxu1 %vm443_vm3, %v5678_v56 }
 0x3a2   : > { %2915 = vmatprep.mubr.bf16.mxu1 %v8282_v15 }
 0x3a5   : > { %5392 = vmatmul.mubr.msk.bf16.gmra.mrb[84].mxu0 %vm443_vm3, %v5678_v56 }
 0x3a6   : > { %4072 = vmatprep.mubr.bf16.mxu0 %v8282_v15 }
 0x3a9   : > { %5333 = vmatmul.mubr.msk.bf16.gmra.mrb[88].mxu1 %vm443_vm3, %v5679_v23 }
 0x3aa   : > { %2925 = vmatprep.mubr.bf16.mxu1 %v8282_v15 }
 0x3ad   : > { %5393 = vmatmul.mubr.msk.bf16.gmra.mrb[88].mxu0 %vm443_vm3, %v5679_v23 }
 0x3ae   : > { %4082 = vmatprep.mubr.bf16.mxu0 %v8282_v15 }
 0x3b1   : > { %5334 = vmatmul.mubr.msk.bf16.gmra.mrb[92].mxu1 %vm443_vm3, %v5680_v61 }
 0x3b2   : > { %2935 = vmatprep.mubr.bf16.mxu1 %v8282_v15 }
 0x3b5   : > { %5394 = vmatmul.mubr.msk.bf16.gmra.mrb[92].mxu0 %vm443_vm3, %v5680_v61 }
 0x3b6   : > { %4092 = vmatprep.mubr.bf16.mxu0 %v8282_v15 }
 0x3b9   : > { %5335 = vmatmul.mubr.msk.bf16.gmra.mrb[96].mxu1 %vm443_vm3, %v5681_v18 }
 0x3ba   : > { %2945 = vmatprep.mubr.bf16.mxu1 %v8282_v15 }
 0x3bd   : > { %5395 = vmatmul.mubr.msk.bf16.gmra.mrb[96].mxu0 %vm443_vm3, %v5681_v18 }
 0x3be   : > { %4102 = vmatprep.mubr.bf16.mxu0 %v8282_v15 }
 0x3c1   : > { %5336 = vmatmul.mubr.msk.bf16.gmra.mrb[100].mxu1 %vm443_vm3, %v5682_v50 }
 0x3c2   : > { %2955 = vmatprep.mubr.bf16.mxu1 %v8282_v15 }
 0x3c5   : > { %5396 = vmatmul.mubr.msk.bf16.gmra.mrb[100].mxu0 %vm443_vm3, %v5682_v50 }
 0x3c6   : > { %4112 = vmatprep.mubr.bf16.mxu0 %v8282_v15 }
 0x3c9   : > { %5337 = vmatmul.mubr.msk.bf16.gmra.mrb[104].mxu1 %vm443_vm3, %v5683_v0 }
 0x3ca   : > { %2965 = vmatprep.mubr.bf16.mxu1 %v8282_v15 }
 0x3cd   : > { %5397 = vmatmul.mubr.msk.bf16.gmra.mrb[104].mxu0 %vm443_vm3, %v5683_v0 }
 0x3ce   : > { %4122 = vmatprep.mubr.bf16.mxu0 %v8282_v15 }
 0x3d1   : > { %5338 = vmatmul.mubr.msk.bf16.gmra.mrb[108].mxu1 %vm443_vm3, %v5684_v44 }
 0x3d5   : > { %5398 = vmatmul.mubr.msk.bf16.gmra.mrb[108].mxu0 %vm443_vm3, %v5684_v44 }
 0x444   : > { %v7127_v57 = vpop.f32.mrb[60].mxu1 }
 0x445   : > { %8285 = vst [vmem:[#allocation84_spill] sm:$0xff] %v7127_v57  ;;  %v7129_v46 = vpop.f32.mrb[61].mxu1 }
 0x446   : > { %8286 = vst [vmem:[#allocation73_spill] sm:$0xff] %v7129_v46  ;;  %v7133_v47 = vpop.f32.mrb[62].mxu1 }
 0x447   : > { %8287 = vst [vmem:[#allocation76_spill] sm:$0xff] %v7133_v47  ;;  %v7135_v3 = vpop.f32.mrb[63].mxu1 }
 0x448   : > { %8288 = vst [vmem:[#allocation86_spill] sm:$0xff] %v7135_v3  ;;  %v7137_v54 = vpop.f32.mrb[60].mxu0 }
 0x449   : > { %8289 = vst [vmem:[#allocation72_spill] sm:$0xff] %v7137_v54  ;;  %v7141_v19 = vpop.f32.mrb[61].mxu0 }
 0x44a   : > { %8290 = vst [vmem:[#allocation74_spill] sm:$0xff] %v7141_v19  ;;  %v7145_v21 = vpop.f32.mrb[62].mxu0 }
 0x44b   : > { %8291 = vst [vmem:[#allocation83_spill] sm:$0xff] %v7145_v21  ;;  %v7147_v9 = vpop.f32.mrb[63].mxu0 }
 0x44c   : > { %8292 = vst [vmem:[#allocation87_spill] sm:$0xff] %v7147_v9  ;;  %v7151_v30 = vpop.f32.mrb[64].mxu1 }
 0x44d   : > { %8293 = vst [vmem:[#allocation22_spill] sm:$0xff] %v7151_v30  ;;  %v7153_v49 = vpop.f32.mrb[65].mxu1 }
 0x44e   : > { %8294 = vst [vmem:[#allocation20_spill] sm:$0xff] %v7153_v49  ;;  %v7157_v34 = vpop.f32.mrb[66].mxu1 }
 0x44f   : > { %8295 = vst [vmem:[#allocation26_spill] sm:$0xff] %v7157_v34  ;;  %v7159_v52 = vpop.f32.mrb[67].mxu1 }
 0x450   : > { %8296 = vst [vmem:[#allocation24_spill] sm:$0xff] %v7159_v52  ;;  %v7161_v10 = vpop.f32.mrb[64].mxu0 }
 0x451   : > { %8297 = vst [vmem:[#allocation30_spill] sm:$0xff] %v7161_v10  ;;  %v7165_v37 = vpop.f32.mrb[65].mxu0 }
 0x452   : > { %8298 = vst [vmem:[#allocation28_spill] sm:$0xff] %v7165_v37  ;;  %v7169_v53 = vpop.f32.mrb[66].mxu0 }
 0x453   : > { %8299 = vst [vmem:[#allocation34_spill] sm:$0xff] %v7169_v53  ;;  %v7171_v14 = vpop.f32.mrb[67].mxu0 }
 0x454   : > { %8300 = vst [vmem:[#allocation32_spill] sm:$0xff] %v7171_v14  ;;  %v7175_v31 = vpop.f32.mrb[68].mxu1 }
 0x455   : > { %8301 = vst [vmem:[#allocation38_spill] sm:$0xff] %v7175_v31  ;;  %v7177_v25 = vpop.f32.mrb[69].mxu1 }
 0x456   : > { %8302 = vst [vmem:[#allocation36_spill] sm:$0xff] %v7177_v25  ;;  %v7181_v11 = vpop.f32.mrb[70].mxu1 }
 0x457   : > { %8303 = vst [vmem:[#allocation42_spill] sm:$0xff] %v7181_v11  ;;  %v7183_v29 = vpop.f32.mrb[71].mxu1 }
 0x458   : > { %8304 = vst [vmem:[#allocation40_spill] sm:$0xff] %v7183_v29  ;;  %v7185_v33 = vpop.f32.mrb[68].mxu0 }
 0x459   : > { %8305 = vst [vmem:[#allocation46_spill] sm:$0xff] %v7185_v33  ;;  %v7189_v2 = vpop.f32.mrb[69].mxu0 }
 0x45a   : > { %8306 = vst [vmem:[#allocation44_spill] sm:$0xff] %v7189_v2  ;;  %v7193_v24 = vpop.f32.mrb[70].mxu0 }
 0x45b   : > { %8307 = vst [vmem:[#allocation50_spill] sm:$0xff] %v7193_v24  ;;  %v7195_v39 = vpop.f32.mrb[71].mxu0 }
 0x45c   : > { %8308 = vst [vmem:[#allocation48_spill] sm:$0xff] %v7195_v39  ;;  %v7199_v4 = vpop.f32.mrb[72].mxu1 }
 0x45d   : > { %8309 = vst [vmem:[#allocation54_spill] sm:$0xff] %v7199_v4  ;;  %v7201_v1 = vpop.f32.mrb[73].mxu1 }
 0x45e   : > { %8310 = vst [vmem:[#allocation52_spill] sm:$0xff] %v7201_v1  ;;  %v7205_v42 = vpop.f32.mrb[74].mxu1 }
 0x45f   : > { %8311 = vst [vmem:[#allocation58_spill] sm:$0xff] %v7205_v42  ;;  %v7207_v55 = vpop.f32.mrb[75].mxu1 }
 0x460   : > { %8312 = vst [vmem:[#allocation56_spill] sm:$0xff] %v7207_v55  ;;  %v7209_v22 = vpop.f32.mrb[72].mxu0 }
 0x461   : > { %8313 = vst [vmem:[#allocation62_spill] sm:$0xff] %v7209_v22  ;;  %v7213_v26 = vpop.f32.mrb[73].mxu0 }
 0x462   : > { %8314 = vst [vmem:[#allocation60_spill] sm:$0xff] %v7213_v26  ;;  %v7217_v7 = vpop.f32.mrb[74].mxu0 }
 0x463   : > { %8315 = vst [vmem:[#allocation66_spill] sm:$0xff] %v7217_v7  ;;  %v7219_v13 = vpop.f32.mrb[75].mxu0 }
 0x464   : > { %8316 = vst [vmem:[#allocation64_spill] sm:$0xff] %v7219_v13  ;;  %v7223_v32 = vpop.f32.mrb[76].mxu1 }
 0x465   : > { %8317 = vst [vmem:[#allocation17_spill] sm:$0xff] %v7223_v32  ;;  %v7225_v6 = vpop.f32.mrb[77].mxu1 }
 0x466   : > { %8318 = vst [vmem:[#allocation77_spill] sm:$0xff] %v7225_v6  ;;  %v7229_v28 = vpop.f32.mrb[78].mxu1 }
 0x467   : > { %8319 = vst [vmem:[#allocation78_spill] sm:$0xff] %v7229_v28  ;;  %v7231_v48 = vpop.f32.mrb[79].mxu1 }
 0x468   : > { %8320 = vst [vmem:[#allocation79_spill] sm:$0xff] %v7231_v48  ;;  %v7233_v23 = vpop.f32.mrb[76].mxu0 }
 0x469   : > { %8321 = vst [vmem:[#allocation18_spill] sm:$0xff] %v7233_v23  ;;  %v7237_v18 = vpop.f32.mrb[77].mxu0 }
 0x46a   : > { %8322 = vst [vmem:[#allocation81_spill] sm:$0xff] %v7237_v18  ;;  %v7241_v0 = vpop.f32.mrb[78].mxu0 }
 0x46b   : > { %8323 = vst [vmem:[#allocation68_spill] sm:$0xff] %v7241_v0  ;;  %v7243_v44 = vpop.f32.mrb[79].mxu0 }
 0x46c   : > { %8324 = vst [vmem:[#allocation69_spill] sm:$0xff] %v7243_v44  ;;  %v7247_v56 = vpop.f32.mrb[80].mxu1 }
 0x46d   : > { %8325 = vst [vmem:[#allocation23_spill] sm:$0xff] %v7247_v56  ;;  %v7249_v62 = vpop.f32.mrb[81].mxu1 }
 0x46e   : > { %8326 = vst [vmem:[#allocation21_spill] sm:$0xff] %v7249_v62  ;;  %v7253_v36 = vpop.f32.mrb[82].mxu1 }
 0x46f   : > { %8327 = vst [vmem:[#allocation27_spill] sm:$0xff] %v7253_v36  ;;  %v7255_v51 = vpop.f32.mrb[83].mxu1 }
 0x470   : > { %8328 = vst [vmem:[#allocation25_spill] sm:$0xff] %v7255_v51  ;;  %v7257_v50 = vpop.f32.mrb[80].mxu0 }
 0x471   : > { %8329 = vst [vmem:[#allocation31_spill] sm:$0xff] %v7257_v50  ;;  %v7261_v45 = vpop.f32.mrb[81].mxu0 }
 0x472   : > { %8330 = vst [vmem:[#allocation29_spill] sm:$0xff] %v7261_v45  ;;  %v7265_v61 = vpop.f32.mrb[82].mxu0 }
 0x473   : > { %8331 = vst [vmem:[#allocation35_spill] sm:$0xff] %v7265_v61  ;;  %v7267_v41 = vpop.f32.mrb[83].mxu0 }
 0x474   : > { %8332 = vst [vmem:[#allocation33_spill] sm:$0xff] %v7267_v41  ;;  %v2907_v20 = vpop.f32.mrb[84].mxu1 }
 0x475   : > { %v2909_v12 = vpop.f32.mrb[85].mxu1 }
 0x476   : > { %v5507_v17 = vpack.c.bf16 %v2909_v12, %v2907_v20  ;;  %v2911_v40 = vpop.f32.mrb[86].mxu1  ;;  %v7277_v12 = vld [vmem:[%s6114_s1 + $0x18] sm:$0xff] }
 0x477   : > { %v2913_v38 = vpop.f32.mrb[87].mxu1 }
 0x478   : > { %v4064_v35 = vpop.f32.mrb[84].mxu0  ;;  %v3122_v15 = vmul.bf16 %v7272_v60, %v5507_v17  ;;  %v5508_v59 = vpack.c.bf16 %v2913_v38, %v2911_v40 }
 0x479   : > { %v4066_v27 = vpop.f32.mrb[85].mxu0 }
 0x47a   : > { %v3134_v58 = vunpack.c.l.bf16 %v3122_v15  ;;  %v3135_v63 = vunpack.c.h.bf16 %v3122_v15  ;;  %v5531_v50 = vpack.c.bf16 %v4066_v27, %v4064_v35  ;;  %v4068_v45 = vpop.f32.mrb[86].mxu0  ;;  %v3123_v0 = vmul.bf16 %v7272_v60, %v5508_v59 }
 0x47b   : > { %v4070_v16 = vpop.f32.mrb[87].mxu0 }
 0x47c   : > { %v3158_v61 = vrot.slane %v3134_v58, 4  ;;  %v3164_v41 = vrot.slane %v3135_v63, 4  ;;  %v4279_v20 = vmul.bf16 %v7277_v12, %v5531_v50  ;;  %v3136_v44 = vunpack.c.l.bf16 %v3123_v0  ;;  %v7280_v23 = vpop.f32.mrb[88].mxu1 }
 0x47d   : > { %v3137_v18 = vunpack.c.h.bf16 %v3123_v0  ;;  %v5532_v17 = vpack.c.bf16 %v4070_v16, %v4068_v45  ;;  %v7282_v38 = vpop.f32.mrb[89].mxu1 }
 0x47e   : > { %v3159_v40 = vadd.f32 %v3158_v61, %v3134_v58  ;;  %v3165_v15 = vadd.f32 %v3164_v41, %v3135_v63  ;;  %v4291_v35 = vunpack.c.l.bf16 %v4279_v20  ;;  %v4292_v27 = vunpack.c.h.bf16 %v4279_v20  ;;  %v7284_v7 = vpop.f32.mrb[90].mxu1 }
 0x47f   : > { %v3170_v59 = vrot.slane %v3136_v44, 4  ;;  %v3176_v13 = vrot.slane %v3137_v18, 4  ;;  %v4280_v22 = vmul.bf16 %v7277_v12, %v5532_v17  ;;  %v7289_v26 = vpop.f32.mrb[91].mxu1 }
 0x480   : > { %v3160_v24 = vrot.slane %v3159_v40, 2  ;;  %v3166_v0 = vrot.slane %v3165_v15, 2  ;;  %v4315_v45 = vrot.slane %v4291_v35, 4  ;;  %v4321_v16 = vrot.slane %v4292_v27, 4  ;;  %v7291_v39 = vpop.f32.mrb[88].mxu0 }
 0x481   : > { %v3171_v63 = vadd.f32 %v3170_v59, %v3136_v44  ;;  %v3177_v58 = vadd.f32 %v3176_v13, %v3137_v18  ;;  %v4293_v41 = vunpack.c.l.bf16 %v4280_v22  ;;  %v4294_v61 = vunpack.c.h.bf16 %v4280_v22  ;;  %v7293_v20 = vpop.f32.mrb[89].mxu0 }
 0x482   : > { %v3161_v33 = vadd.f32 %v3160_v24, %v3159_v40  ;;  %v3167_v2 = vadd.f32 %v3166_v0, %v3165_v15  ;;  %v4316_v17 = vadd.f32 %v4315_v45, %v4291_v35  ;;  %v4322_v53 = vadd.f32 %v4321_v16, %v4292_v27  ;;  %v7295_v14 = vpop.f32.mrb[90].mxu0 }
 0x483   : > { %v3172_v50 = vrot.slane %v3171_v63, 2  ;;  %v3178_v10 = vrot.slane %v3177_v58, 2  ;;  %v4327_v37 = vrot.slane %v4293_v41, 4  ;;  %v4333_v21 = vrot.slane %v4294_v61, 4  ;;  %v7297_v9 = vpop.f32.mrb[91].mxu0 }
 0x484   : > { %v3162_v54 = vrot.slane %v3161_v33, 1  ;;  %v3168_v19 = vrot.slane %v3167_v2, 1  ;;  %v4317_v44 = vrot.slane %v4316_v17, 2  ;;  %v4323_v13 = vrot.slane %v4322_v53, 2  ;;  %v7299_v18 = vpop.f32.mrb[92].mxu1 }
 0x485   : > { %v3173_v22 = vadd.f32 %v3172_v50, %v3171_v63  ;;  %v3179_v59 = vadd.f32 %v3178_v10, %v3177_v58  ;;  %v4328_v24 = vadd.f32 %v4327_v37, %v4293_v41  ;;  %v4334_v40 = vadd.f32 %v4333_v21, %v4294_v61  ;;  %v7301_v15 = vpop.f32.mrb[93].mxu1 }
 0x486   : > { %v3163_v35 = vadd.f32 %v3162_v54, %v3161_v33  ;;  %v3169_v27 = vadd.f32 %v3168_v19, %v3167_v2  ;;  %v4318_v0 = vadd.f32 %v4317_v44, %v4316_v17  ;;  %v4324_v45 = vadd.f32 %v4323_v13, %v4322_v53  ;;  %v7303_v16 = vpop.f32.mrb[94].mxu1 }
 0x487   : > { %v3174_v36 = vrot.slane %v3173_v22, 1  ;;  %v3180_v51 = vrot.slane %v3179_v59, 1  ;;  %v4329_v56 = vrot.slane %v4328_v24, 2  ;;  %v4335_v62 = vrot.slane %v4334_v40, 2  ;;  %v7305_v28 = vpop.f32.mrb[95].mxu1 }
 0x488   : > { %v3302_v48 = vpack.c.bf16 %v3163_v35, %v3163_v35  ;;  %v3303_v32 = vpack.c.bf16 %v3169_v27, %v3169_v27  ;;  %v4319_v50 = vrot.slane %v4318_v0, 1  ;;  %v4325_v10 = vrot.slane %v4324_v45, 1  ;;  %v7307_v37 = vpop.f32.mrb[92].mxu0 }
 0x489   : > { %v3175_v21 = vadd.f32 %v3174_v36, %v3173_v22  ;;  %v3181_v63 = vadd.f32 %v3180_v51, %v3179_v59  ;;  %v4330_v54 = vadd.f32 %v4329_v56, %v4328_v24  ;;  %v4336_v19 = vadd.f32 %v4335_v62, %v4334_v40  ;;  %v7309_v33 = vpop.f32.mrb[93].mxu0 }
 0x48a   : > { %v3350_v53 = vunpack.c.l.b16 %v3302_v48  ;;  %v3351_v2 = vunpack.c.l.b16 %v3303_v32  ;;  %v4320_v58 = vadd.f32 %v4319_v50, %v4318_v0  ;;  %v4326_v41 = vadd.f32 %v4325_v10, %v4324_v45  ;;  %v7311_v61 = vpop.f32.mrb[94].mxu0 }
 0x48b   : > { %v3304_v17 = vpack.c.bf16 %v3175_v21, %v3175_v21  ;;  %v3305_v44 = vpack.c.bf16 %v3181_v63, %v3181_v63  ;;  %v4331_v13 = vrot.slane %v4330_v54, 1  ;;  %v4337_v35 = vrot.slane %v4336_v19, 1  ;;  %v7313_v27 = vpop.f32.mrb[95].mxu0 }
 0x48c   : > { %v4459_v6 = vpack.c.bf16 %v4320_v58, %v4320_v58  ;;  %v4460_v42 = vpack.c.bf16 %v4326_v41, %v4326_v41  ;;  %v8333_v51 = vpack.c.bf16 %v7282_v38, %v7280_v23  ;;  %v5533_v62 = vpack.c.bf16 %v7293_v20, %v7291_v39  ;;  %v7321_v56 = vpop.f32.mrb[96].mxu1 }
 0x48d   : > { %v3352_v32 = vunpack.c.l.b16 %v3304_v17  ;;  %v3353_v48 = vunpack.c.l.b16 %v3305_v44  ;;  %v4332_v22 = vadd.f32 %v4331_v13, %v4330_v54  ;;  %v4338_v59 = vadd.f32 %v4337_v35, %v4336_v19  ;;  %v7323_v24 = vpop.f32.mrb[97].mxu1 }
 0x48e   : > { %v3124_v36 = vmul.bf16 %v7272_v60, %v8333_v51  ;;  %v4507_v40 = vunpack.c.l.b16 %v4459_v6  ;;  %v4508_v0 = vunpack.c.l.b16 %v4460_v42  ;;  %v7325_v10 = vpop.f32.mrb[98].mxu1  ;;  %v4281_v19 = vmul.bf16 %v7277_v12, %v5533_v62 }
 0x48f   : > { %v7328_v23 = vsel %vm1053_vm4, %v3352_v32, %v3350_v53  ;;  %v7331_v38 = vsel %vm1053_vm4, %v3353_v48, %v3351_v2  ;;  %v4461_v39 = vpack.c.bf16 %v4332_v22, %v4332_v22  ;;  %v4462_v20 = vpack.c.bf16 %v4338_v59, %v4338_v59  ;;  %v7333_v21 = vpop.f32.mrb[99].mxu1 }
 0x490   : > { %v3138_v45 = vunpack.c.l.bf16 %v3124_v36  ;;  %v3139_v50 = vunpack.c.h.bf16 %v3124_v36  ;;  %v5510_v42 = vpack.c.bf16 %v7289_v26, %v7284_v7  ;;  %v7338_v6 = vpop.f32.mrb[96].mxu0  ;;  %v5534_v53 = vpack.c.bf16 %v7297_v9, %v7295_v14 }
 0x491   : > { %v4509_v58 = vunpack.c.l.b16 %v4461_v39  ;;  %v4510_v41 = vunpack.c.l.b16 %v4462_v20  ;;  %v7344_v17 = vpop.f32.mrb[97].mxu0  ;;  %v4295_v35 = vunpack.c.l.bf16 %v4281_v19  ;;  %v4296_v51 = vunpack.c.h.bf16 %v4281_v19 }
 0x492   : > { %v3182_v63 = vrot.slane %v3138_v45, 4  ;;  %v3188_v54 = vrot.slane %v3139_v50, 4  ;;  %v7346_v36 = vpop.f32.mrb[98].mxu0  ;;  %v3125_v62 = vmul.bf16 %v7272_v60, %v5510_v42  ;;  %v4282_v9 = vmul.bf16 %v7277_v12, %v5534_v53 }
 0x493   : > { %v7349_v26 = vsel %vm1053_vm4, %v4509_v58, %v4507_v40  ;;  %v7352_v7 = vsel %vm1053_vm4, %v4510_v41, %v4508_v0  ;;  %v7356_v14 = vpop.f32.mrb[99].mxu0  ;;  %v4339_v22 = vrot.slane %v4295_v35, 4  ;;  %v4345_v59 = vrot.slane %v4296_v51, 4 }
 0x494   : > { %v3183_v44 = vadd.f32 %v3182_v63, %v3138_v45  ;;  %v3189_v13 = vadd.f32 %v3188_v54, %v3139_v50  ;;  %v7358_v45 = vpop.f32.mrb[100].mxu1  ;;  %v3140_v50 = vunpack.c.l.bf16 %v3125_v62  ;;  %v3141_v39 = vunpack.c.h.bf16 %v3125_v62 }
 0x495   : > { %v4297_v20 = vunpack.c.l.bf16 %v4282_v9  ;;  %v4298_v40 = vunpack.c.h.bf16 %v4282_v9  ;;  %v7360_v63 = vpop.f32.mrb[101].mxu1  ;;  %v4340_v19 = vadd.f32 %v4339_v22, %v4295_v35  ;;  %v4346_v42 = vadd.f32 %v4345_v59, %v4296_v51 }
 0x496   : > { %v3184_v32 = vrot.slane %v3183_v44, 2  ;;  %v3190_v48 = vrot.slane %v3189_v13, 2  ;;  %v7362_v58 = vpop.f32.mrb[102].mxu1  ;;  %v3194_v41 = vrot.slane %v3140_v50, 4  ;;  %v3200_v53 = vrot.slane %v3141_v39, 4 }
 0x497   : > { %v4351_v2 = vrot.slane %v4297_v20, 4  ;;  %v4357_v55 = vrot.slane %v4298_v40, 4  ;;  %v7364_v4 = vpop.f32.mrb[103].mxu1  ;;  %v4341_v29 = vrot.slane %v4340_v19, 2  ;;  %v4347_v62 = vrot.slane %v4346_v42, 2 }
 0x498   : > { %v3185_v0 = vadd.f32 %v3184_v32, %v3183_v44  ;;  %v3191_v54 = vadd.f32 %v3190_v48, %v3189_v13  ;;  %v7366_v31 = vpop.f32.mrb[100].mxu0  ;;  %v3195_v9 = vadd.f32 %v3194_v41, %v3140_v50  ;;  %v3201_v25 = vadd.f32 %v3200_v53, %v3141_v39 }
 0x499   : > { %v4352_v44 = vadd.f32 %v4351_v2, %v4297_v20  ;;  %v4358_v13 = vadd.f32 %v4357_v55, %v4298_v40  ;;  %v7368_v35 = vpop.f32.mrb[101].mxu0  ;;  %v4342_v48 = vadd.f32 %v4341_v29, %v4340_v19  ;;  %v4348_v22 = vadd.f32 %v4347_v62, %v4346_v42 }
 0x49a   : > { %v3186_v1 = vrot.slane %v3185_v0, 1  ;;  %v3192_v11 = vrot.slane %v3191_v54, 1  ;;  %v7370_v59 = vpop.f32.mrb[102].mxu0  ;;  %v3196_v34 = vrot.slane %v3195_v9, 2  ;;  %v3202_v52 = vrot.slane %v3201_v25, 2 }
 0x49b   : > { %v4353_v30 = vrot.slane %v4352_v44, 2  ;;  %v4359_v49 = vrot.slane %v4358_v13, 2  ;;  %v7372_v47 = vpop.f32.mrb[103].mxu0  ;;  %v4343_v50 = vrot.slane %v4342_v48, 1  ;;  %v4349_v39 = vrot.slane %v4348_v22, 1 }
 0x49c   : > { %v3187_v51 = vadd.f32 %v3186_v1, %v3185_v0  ;;  %v3193_v32 = vadd.f32 %v3192_v11, %v3191_v54  ;;  %v7374_v2 = vpop.f32.mrb[104].mxu1  ;;  %v3197_v55 = vadd.f32 %v3196_v34, %v3195_v9  ;;  %v3203_v20 = vadd.f32 %v3202_v52, %v3201_v25 }
 0x49d   : > { %v4354_v1 = vadd.f32 %v4353_v30, %v4352_v44  ;;  %v4360_v11 = vadd.f32 %v4359_v49, %v4358_v13  ;;  %v7376_v29 = vpop.f32.mrb[105].mxu1  ;;  %v4344_v54 = vadd.f32 %v4343_v50, %v4342_v48  ;;  %v4350_v19 = vadd.f32 %v4349_v39, %v4348_v22 }
 0x49e   : > { %v3306_v3 = vpack.c.bf16 %v3187_v51, %v3187_v51  ;;  %v3307_v57 = vpack.c.bf16 %v3193_v32, %v3193_v32  ;;  %v7378_v42 = vpop.f32.mrb[106].mxu1  ;;  %v3198_v41 = vrot.slane %v3197_v55, 1  ;;  %v3204_v53 = vrot.slane %v3203_v20, 1 }
 0x49f   : > { %v4355_v62 = vrot.slane %v4354_v1, 1  ;;  %v4361_v51 = vrot.slane %v4360_v11, 1  ;;  %v7380_v32 = vpop.f32.mrb[107].mxu1 }
 0x4a0   : > { %v3354_v40 = vunpack.c.l.b16 %v3306_v3  ;;  %v3355_v0 = vunpack.c.l.b16 %v3307_v57  ;;  %v4463_v3 = vpack.c.bf16 %v4344_v54, %v4344_v54  ;;  %v4464_v57 = vpack.c.bf16 %v4350_v19, %v4350_v19  ;;  %v7390_v49 = vpop.f32.mrb[104].mxu0 }
 0x4a1   : > { %v3199_v52 = vadd.f32 %v3198_v41, %v3197_v55  ;;  %v3205_v25 = vadd.f32 %v3204_v53, %v3203_v20  ;;  %v4356_v9 = vadd.f32 %v4355_v62, %v4354_v1  ;;  %v4362_v44 = vadd.f32 %v4361_v51, %v4360_v11  ;;  %v7392_v13 = vpop.f32.mrb[105].mxu0 }
 0x4a2   : > { %v7384_v34 = vsel %vm1055_vm5, %v3354_v40, %v7328_v23  ;;  %v7388_v30 = vsel %vm1055_vm5, %v3355_v0, %v7331_v38  ;;  %v4511_v48 = vunpack.c.l.b16 %v4463_v3  ;;  %v4512_v22 = vunpack.c.l.b16 %v4464_v57  ;;  %v7400_v39 = vpop.f32.mrb[106].mxu0 }
 0x4a3   : > { %8334 = vst [vmem:[#allocation39_spill] sm:$0xff] %v7388_v30  ;;  %v8335_v23 = vpack.c.bf16 %v7301_v15, %v7299_v18  ;;  %v5535_v38 = vpack.c.bf16 %v7309_v33, %v7307_v37  ;;  %v3308_v40 = vpack.c.bf16 %v3199_v52, %v3199_v52  ;;  %v3309_v0 = vpack.c.bf16 %v3205_v25, %v3205_v25  ;;  %v7402_v1 = vpop.f32.mrb[107].mxu0 }
 0x4a4   : > { %v4465_v55 = vpack.c.bf16 %v4356_v9, %v4356_v9  ;;  %v4466_v20 = vpack.c.bf16 %v4362_v44, %v4362_v44  ;;  %v7406_v11 = vsel %vm1055_vm5, %v4511_v48, %v7349_v26  ;;  %v7410_v18 = vsel %vm1055_vm5, %v4512_v22, %v7352_v7  ;;  %v7412_v19 = vpop.f32.mrb[108].mxu1 }
 0x4a5   : > { %v3126_v50 = vmul.bf16 %v7272_v60, %v8335_v23  ;;  %8336 = vst [vmem:[#allocation37_spill] sm:$0xff] %v7406_v11  ;;  %8337 = vst [vmem:[#allocation43_spill] sm:$0xff] %v7410_v18  ;;  %v7414_v37 = vunpack.c.l.b16 %v3308_v40  ;;  %v7416_v33 = vunpack.c.l.b16 %v3309_v0  ;;  %v7422_v62 = vpop.f32.mrb[109].mxu1  ;;  %v4283_v3 = vmul.bf16 %v7277_v12, %v5535_v38 }
 0x4a6   : > { %v7418_v41 = vunpack.c.l.b16 %v4465_v55  ;;  %v7420_v53 = vunpack.c.l.b16 %v4466_v20  ;;  %8341 = vst [vmem:[#allocation51_spill] sm:$0xff] %v7422_v62  ;;  %v5512_v7 = vpack.c.bf16 %v7305_v28, %v7303_v16  ;;  %v7427_v57 = vpop.f32.mrb[110].mxu1  ;;  %v5536_v52 = vpack.c.bf16 %v7313_v27, %v7311_v61 }
 0x4a7   : > { %v3142_v15 = vunpack.c.l.bf16 %v3126_v50  ;;  %v3143_v54 = vunpack.c.h.bf16 %v3126_v50  ;;  %8338 = vst [vmem:[#allocation41_spill] sm:$0xff] %v7416_v33  ;;  %v5513_v25 = vpack.c.bf16 %v7323_v24, %v7321_v56  ;;  %v5537_v9 = vpack.c.bf16 %v7344_v17, %v7338_v6  ;;  %v7437_v48 = vpop.f32.mrb[111].mxu1 }
 0x4a8   : > { %8339 = vst [vmem:[#allocation47_spill] sm:$0xff] %v7418_v41  ;;  %8340 = vst [vmem:[#allocation45_spill] sm:$0xff] %v7420_v53  ;;  %v4299_v50 = vunpack.c.l.bf16 %v4283_v3  ;;  %v4300_v28 = vunpack.c.h.bf16 %v4283_v3  ;;  %v7439_v16 = vpop.f32.mrb[108].mxu0  ;;  %v3127_v38 = vmul.bf16 %v7272_v60, %v5512_v7  ;;  %v4284_v61 = vmul.bf16 %v7277_v12, %v5536_v52 }
 0x4a9   : > { %v3206_v26 = vrot.slane %v3142_v15, 4  ;;  %v3212_v51 = vrot.slane %v3143_v54, 4  ;;  %8342 = vst [vmem:[#allocation49_spill] sm:$0xff] %v7437_v48  ;;  %8343 = vst [vmem:[#allocation55_spill] sm:$0xff] %v7439_v16  ;;  %v7444_v27 = vmul.bf16 %v7272_v60, %v5513_v25  ;;  %v7447_v56 = vmul.bf16 %v7277_v12, %v5537_v9  ;;  %v7449_v24 = vpop.f32.mrb[109].mxu0 }
 0x4aa   : > { %8344 = vst [vmem:[#allocation53_spill] sm:$0xff] %v7449_v24  ;;  %v4363_v40 = vrot.slane %v4299_v50, 4  ;;  %v4369_v0 = vrot.slane %v4300_v28, 4  ;;  %v7451_v55 = vpop.f32.mrb[110].mxu0  ;;  %v3144_v20 = vunpack.c.l.bf16 %v3127_v38 }
 0x4ab   : > { %v3207_v22 = vadd.f32 %v3206_v26, %v3142_v15  ;;  %v3213_v23 = vadd.f32 %v3212_v51, %v3143_v54  ;;  %8345 = vst [vmem:[#allocation59_spill] sm:$0xff] %v7451_v55  ;;  %v3145_v15 = vunpack.c.h.bf16 %v3127_v38  ;;  %v4301_v54 = vunpack.c.l.bf16 %v4284_v61  ;;  %v7453_v51 = vpop.f32.mrb[111].mxu0 }
 0x4ac   : > { %v4302_v26 = vunpack.c.h.bf16 %v4284_v61  ;;  %8346 = vst [vmem:[#allocation57_spill] sm:$0xff] %v7453_v51  ;;  %v4364_v52 = vadd.f32 %v4363_v40, %v4299_v50  ;;  %v4370_v25 = vadd.f32 %v4369_v0, %v4300_v28  ;;  %v3218_v9 = vrot.slane %v3144_v20, 4 }
 0x4ad   : > { %v3208_v6 = vrot.slane %v3207_v22, 2  ;;  %v3214_v17 = vrot.slane %v3213_v23, 2  ;;  %v3224_v44 = vrot.slane %v3145_v15, 4  ;;  %v4375_v46 = vrot.slane %v4301_v54, 4 }
 0x4ae   : > { %v4381_v5 = vrot.slane %v4302_v26, 4  ;;  %v4365_v53 = vrot.slane %v4364_v52, 2  ;;  %v4371_v18 = vrot.slane %v4370_v25, 2  ;;  %v3219_v24 = vadd.f32 %v3218_v9, %v3144_v20 }
 0x4af   : > { %v3209_v3 = vadd.f32 %v3208_v6, %v3207_v22  ;;  %v3215_v7 = vadd.f32 %v3214_v17, %v3213_v23  ;;  %v3225_v33 = vadd.f32 %v3224_v44, %v3145_v15  ;;  %v4376_v30 = vadd.f32 %v4375_v46, %v4301_v54 }
 0x4b0   : > { %v4382_v38 = vadd.f32 %v4381_v5, %v4302_v26  ;;  %v4366_v62 = vadd.f32 %v4365_v53, %v4364_v52  ;;  %v4372_v51 = vadd.f32 %v4371_v18, %v4370_v25  ;;  %v3220_v22 = vrot.slane %v3219_v24, 2 }
 0x4b1   : > { %v3210_v43 = vrot.slane %v3209_v3, 1  ;;  %v3216_v8 = vrot.slane %v3215_v7, 1  ;;  %v3226_v23 = vrot.slane %v3225_v33, 2  ;;  %v4377_v50 = vrot.slane %v4376_v30, 2 }
 0x4b2   : > { %v4383_v28 = vrot.slane %v4382_v38, 2  ;;  %v4367_v40 = vrot.slane %v4366_v62, 1  ;;  %v4373_v0 = vrot.slane %v4372_v51, 1  ;;  %v3221_v41 = vadd.f32 %v3220_v22, %v3219_v24 }
 0x4b3   : > { %v3211_v48 = vadd.f32 %v3210_v43, %v3209_v3  ;;  %v3217_v61 = vadd.f32 %v3216_v8, %v3215_v7  ;;  %v3227_v11 = vadd.f32 %v3226_v23, %v3225_v33  ;;  %v4378_v55 = vadd.f32 %v4377_v50, %v4376_v30 }
 0x4b4   : > { %v4384_v16 = vadd.f32 %v4383_v28, %v4382_v38  ;;  %v4368_v43 = vadd.f32 %v4367_v40, %v4366_v62  ;;  %v4374_v8 = vadd.f32 %v4373_v0, %v4372_v51  ;;  %v3222_v5 = vrot.slane %v3221_v41, 1 }
 0x4b5   : > { %v3310_v6 = vpack.c.bf16 %v3211_v48, %v3211_v48  ;;  %v3311_v17 = vpack.c.bf16 %v3217_v61, %v3217_v61  ;;  %v3228_v18 = vrot.slane %v3227_v11, 1  ;;  %v4379_v53 = vrot.slane %v4378_v55, 1 }
 0x4b6   : > { %v4385_v44 = vrot.slane %v4384_v16, 1  ;;  %v4467_v15 = vpack.c.bf16 %v4368_v43, %v4368_v43  ;;  %v4468_v54 = vpack.c.bf16 %v4374_v8, %v4374_v8  ;;  %v3146_v48 = vunpack.c.l.bf16 %v7444_v27 }
 0x4b7   : > { %v7455_v20 = vunpack.c.l.b16 %v3310_v6  ;;  %v7457_v46 = vunpack.c.l.b16 %v3311_v17  ;;  %v3147_v26 = vunpack.c.h.bf16 %v7444_v27  ;;  %v3223_v24 = vadd.f32 %v3222_v5, %v3221_v41 }
 0x4b8   : > { %v3229_v33 = vadd.f32 %v3228_v18, %v3227_v11  ;;  %v4380_v30 = vadd.f32 %v4379_v53, %v4378_v55  ;;  %v4386_v3 = vadd.f32 %v4385_v44, %v4384_v16  ;;  %v7461_v7 = vunpack.c.l.b16 %v4467_v15 }
 0x4b9   : > { %v7463_v52 = vunpack.c.l.b16 %v4468_v54  ;;  %v3230_v62 = vrot.slane %v3146_v48, 4  ;;  %v3236_v51 = vrot.slane %v3147_v26, 4  ;;  %v3312_v25 = vpack.c.bf16 %v3223_v24, %v3223_v24 }
 0x4ba   : > { %v3313_v9 = vpack.c.bf16 %v3229_v33, %v3229_v33  ;;  %v4469_v38 = vpack.c.bf16 %v4380_v30, %v4380_v30  ;;  %v4470_v61 = vpack.c.bf16 %v4386_v3, %v4386_v3  ;;  %v4303_v50 = vunpack.c.l.bf16 %v7447_v56 }
 0x4bb   : > { %v3231_v22 = vadd.f32 %v3230_v62, %v3146_v48  ;;  %v3237_v23 = vadd.f32 %v3236_v51, %v3147_v26  ;;  %v4304_v27 = vunpack.c.h.bf16 %v7447_v56  ;;  %v7467_v41 = vunpack.c.l.b16 %v3312_v25 }
 0x4bc   : > { %v7469_v11 = vunpack.c.l.b16 %v3313_v9  ;;  %v7471_v16 = vunpack.c.l.b16 %v4469_v38  ;;  %v7473_v55 = vunpack.c.l.b16 %v4470_v61  ;;  %v4387_v17 = vrot.slane %v4303_v50, 4 }
 0x4bd   : > { %v3232_v28 = vrot.slane %v3231_v22, 2  ;;  %v3238_v6 = vrot.slane %v3237_v23, 2  ;;  %v4393_v40 = vrot.slane %v4304_v27, 4  ;;  %v8347_v0 = vpack.c.bf16 %v7333_v21, %v7325_v10 }
 0x4be   : > { %v5538_v56 = vpack.c.bf16 %v7356_v14, %v7346_v36  ;;  %v5515_v8 = vpack.c.bf16 %v7360_v63, %v7358_v45  ;;  %v5539_v5 = vpack.c.bf16 %v7368_v35, %v7366_v31  ;;  %v4388_v44 = vadd.f32 %v4387_v17, %v4303_v50 }
 0x4bf   : > { %v3129_v43 = vmul.bf16 %v7272_v60, %v8347_v0  ;;  %v3233_v18 = vadd.f32 %v3232_v28, %v3231_v22  ;;  %v3239_v53 = vadd.f32 %v3238_v6, %v3237_v23  ;;  %v4394_v15 = vadd.f32 %v4393_v40, %v4304_v27 }
 0x4c0   : > { %v4286_v26 = vmul.bf16 %v7277_v12, %v5538_v56  ;;  %v3130_v10 = vmul.bf16 %v7272_v60, %v5515_v8  ;;  %v4389_v33 = vrot.slane %v4388_v44, 2 }
 0x4c1   : > { %v3148_v54 = vunpack.c.l.bf16 %v3129_v43  ;;  %v3149_v48 = vunpack.c.h.bf16 %v3129_v43  ;;  %v3234_v21 = vrot.slane %v3233_v18, 1  ;;  %v3240_v24 = vrot.slane %v3239_v53, 1 }
 0x4c2   : > { %v4395_v36 = vrot.slane %v4394_v15, 2  ;;  %v4305_v45 = vunpack.c.l.bf16 %v4286_v26  ;;  %v4306_v63 = vunpack.c.h.bf16 %v4286_v26  ;;  %v4390_v35 = vadd.f32 %v4389_v33, %v4388_v44 }
 0x4c3   : > { %v3242_v14 = vrot.slane %v3148_v54, 4  ;;  %v3248_v30 = vrot.slane %v3149_v48, 4  ;;  %v3235_v3 = vadd.f32 %v3234_v21, %v3233_v18  ;;  %v3241_v31 = vadd.f32 %v3240_v24, %v3239_v53 }
 0x4c4   : > { %v4396_v62 = vadd.f32 %v4395_v36, %v4394_v15  ;;  %v4399_v9 = vrot.slane %v4305_v45, 4  ;;  %v4405_v38 = vrot.slane %v4306_v63, 4  ;;  %v4391_v23 = vrot.slane %v4390_v35, 1 }
 0x4c5   : > { %v3243_v51 = vadd.f32 %v3242_v14, %v3148_v54  ;;  %v3249_v25 = vadd.f32 %v3248_v30, %v3149_v48  ;;  %v3314_v61 = vpack.c.bf16 %v3235_v3, %v3235_v3  ;;  %v3315_v22 = vpack.c.bf16 %v3241_v31, %v3241_v31 }
 0x4c6   : > { %v4397_v50 = vrot.slane %v4396_v62, 1  ;;  %v4400_v6 = vadd.f32 %v4399_v9, %v4305_v45  ;;  %v4406_v17 = vadd.f32 %v4405_v38, %v4306_v63  ;;  %v4392_v43 = vadd.f32 %v4391_v23, %v4390_v35 }
 0x4c7   : > { %v3244_v27 = vrot.slane %v3243_v51, 2  ;;  %v3250_v28 = vrot.slane %v3249_v25, 2  ;;  %v7487_v40 = vunpack.c.l.b16 %v3314_v61  ;;  %v7489_v0 = vunpack.c.l.b16 %v3315_v22 }
 0x4c8   : > { %v4398_v56 = vadd.f32 %v4397_v50, %v4396_v62  ;;  %v4401_v53 = vrot.slane %v4400_v6, 2  ;;  %v4407_v44 = vrot.slane %v4406_v17, 2  ;;  %v4471_v15 = vpack.c.bf16 %v4392_v43, %v4392_v43 }
 0x4c9   : > { %v3245_v8 = vadd.f32 %v3244_v27, %v3243_v51  ;;  %v3251_v18 = vadd.f32 %v3250_v28, %v3249_v25  ;;  %v3150_v48 = vunpack.c.l.bf16 %v3130_v10  ;;  %v3151_v26 = vunpack.c.h.bf16 %v3130_v10 }
 0x4ca   : > { %v4472_v54 = vpack.c.bf16 %v4398_v56, %v4398_v56  ;;  %v4402_v33 = vadd.f32 %v4401_v53, %v4400_v6  ;;  %v4408_v36 = vadd.f32 %v4407_v44, %v4406_v17  ;;  %v7491_v14 = vunpack.c.l.b16 %v4471_v15 }
 0x4cb   : > { %v3246_v21 = vrot.slane %v3245_v8, 1  ;;  %v3252_v24 = vrot.slane %v3251_v18, 1  ;;  %v3254_v45 = vrot.slane %v3150_v48, 4  ;;  %v3260_v63 = vrot.slane %v3151_v26, 4 }
 0x4cc   : > { %v7493_v30 = vunpack.c.l.b16 %v4472_v54  ;;  %v4403_v35 = vrot.slane %v4402_v33, 1  ;;  %v4409_v62 = vrot.slane %v4408_v36, 1  ;;  %v4287_v10 = vmul.bf16 %v7277_v12, %v5539_v5 }
 0x4cd   : > { %v7495_v3 = vadd.f32 %v3246_v21, %v3245_v8  ;;  %v7497_v31 = vadd.f32 %v3252_v24, %v3251_v18  ;;  %v3255_v51 = vadd.f32 %v3254_v45, %v3150_v48  ;;  %v3261_v25 = vadd.f32 %v3260_v63, %v3151_v26 }
 0x4ce   : > { %v5516_v9 = vpack.c.bf16 %v7364_v4, %v7362_v58  ;;  %v7502_v38 = vadd.f32 %v4403_v35, %v4402_v33  ;;  %v7504_v61 = vadd.f32 %v4409_v62, %v4408_v36  ;;  %v5540_v22 = vpack.c.bf16 %v7372_v47, %v7370_v59 }
 0x4cf   : > { %v5517_v23 = vpack.c.bf16 %v7376_v29, %v7374_v2  ;;  %v3256_v50 = vrot.slane %v3255_v51, 2  ;;  %v3262_v27 = vrot.slane %v3261_v25, 2  ;;  %v4307_v28 = vunpack.c.l.bf16 %v4287_v10 }
 0x4d0   : > { %v4308_v6 = vunpack.c.h.bf16 %v4287_v10  ;;  %v3131_v17 = vmul.bf16 %v7272_v60, %v5516_v9  ;;  %v4288_v5 = vmul.bf16 %v7277_v12, %v5540_v22  ;;  %v5541_v58 = vpack.c.bf16 %v7392_v13, %v7390_v49 }
 0x4d1   : > { %v3132_v4 = vmul.bf16 %v7272_v60, %v5517_v23  ;;  %v3257_v43 = vadd.f32 %v3256_v50, %v3255_v51  ;;  %v3263_v56 = vadd.f32 %v3262_v27, %v3261_v25  ;;  %v4411_v8 = vrot.slane %v4307_v28, 4 }
 0x4d2   : > { %v4417_v47 = vrot.slane %v4308_v6, 4  ;;  %v3152_v59 = vunpack.c.l.bf16 %v3131_v17  ;;  %v3153_v18 = vunpack.c.h.bf16 %v3131_v17  ;;  %v4309_v2 = vunpack.c.l.bf16 %v4288_v5 }
 0x4d3   : > { %v4310_v29 = vunpack.c.h.bf16 %v4288_v5  ;;  %v3258_v53 = vrot.slane %v3257_v43, 1  ;;  %v3264_v44 = vrot.slane %v3263_v56, 1  ;;  %v4412_v15 = vadd.f32 %v4411_v8, %v4307_v28 }
 0x4d4   : > { %v4418_v54 = vadd.f32 %v4417_v47, %v4308_v6  ;;  %v3266_v48 = vrot.slane %v3152_v59, 4  ;;  %v3272_v26 = vrot.slane %v3153_v18, 4  ;;  %v4423_v21 = vrot.slane %v4309_v2, 4 }
 0x4d5   : > { %v4429_v24 = vrot.slane %v4310_v29, 4  ;;  %v3259_v33 = vadd.f32 %v3258_v53, %v3257_v43  ;;  %v3265_v36 = vadd.f32 %v3264_v44, %v3263_v56  ;;  %v4413_v45 = vrot.slane %v4412_v15, 2 }
 0x4d6   : > { %v4419_v63 = vrot.slane %v4418_v54, 2  ;;  %v3267_v35 = vadd.f32 %v3266_v48, %v3152_v59  ;;  %v3273_v62 = vadd.f32 %v3272_v26, %v3153_v18  ;;  %v4424_v51 = vadd.f32 %v4423_v21, %v4309_v2 }
 0x4d7   : > { %v4430_v25 = vadd.f32 %v4429_v24, %v4310_v29  ;;  %v3318_v10 = vpack.c.bf16 %v3259_v33, %v3259_v33  ;;  %v3319_v9 = vpack.c.bf16 %v3265_v36, %v3265_v36  ;;  %v4414_v22 = vadd.f32 %v4413_v45, %v4412_v15 }
 0x4d8   : > { %v4420_v23 = vadd.f32 %v4419_v63, %v4418_v54  ;;  %v3268_v50 = vrot.slane %v3267_v35, 2  ;;  %v3274_v27 = vrot.slane %v3273_v62, 2  ;;  %v4425_v28 = vrot.slane %v4424_v51, 2 }
 0x4d9   : > { %v4431_v6 = vrot.slane %v4430_v25, 2  ;;  %v7515_v17 = vunpack.c.l.b16 %v3318_v10  ;;  %v7517_v5 = vunpack.c.l.b16 %v3319_v9  ;;  %v4415_v43 = vrot.slane %v4414_v22, 1 }
 0x4da   : > { %v4421_v56 = vrot.slane %v4420_v23, 1  ;;  %v3269_v8 = vadd.f32 %v3268_v50, %v3267_v35  ;;  %v3275_v47 = vadd.f32 %v3274_v27, %v3273_v62  ;;  %v4426_v59 = vadd.f32 %v4425_v28, %v4424_v51 }
 0x4db   : > { %v4432_v18 = vadd.f32 %v4431_v6, %v4430_v25  ;;  %v4416_v2 = vadd.f32 %v4415_v43, %v4414_v22  ;;  %v3154_v53 = vunpack.c.l.bf16 %v3132_v4  ;;  %v3155_v44 = vunpack.c.h.bf16 %v3132_v4 }
 0x4dc   : > { %v4422_v29 = vadd.f32 %v4421_v56, %v4420_v23  ;;  %v3270_v15 = vrot.slane %v3269_v8, 1  ;;  %v3276_v54 = vrot.slane %v3275_v47, 1  ;;  %v4427_v48 = vrot.slane %v4426_v59, 1 }
 0x4dd   : > { %v4433_v26 = vrot.slane %v4432_v18, 1  ;;  %v4475_v21 = vpack.c.bf16 %v4416_v2, %v4416_v2  ;;  %v3278_v33 = vrot.slane %v3154_v53, 4  ;;  %v3284_v36 = vrot.slane %v3155_v44, 4 }
 0x4de   : > { %v4476_v24 = vpack.c.bf16 %v4422_v29, %v4422_v29  ;;  %v3271_v45 = vadd.f32 %v3270_v15, %v3269_v8  ;;  %v3277_v63 = vadd.f32 %v3276_v54, %v3275_v47  ;;  %v4428_v10 = vadd.f32 %v4427_v48, %v4426_v59 }
 0x4df   : > { %v4434_v9 = vadd.f32 %v4433_v26, %v4432_v18  ;;  %v7519_v35 = vunpack.c.l.b16 %v4475_v21  ;;  %v3279_v51 = vadd.f32 %v3278_v33, %v3154_v53  ;;  %v3285_v25 = vadd.f32 %v3284_v36, %v3155_v44 }
 0x4e0   : > { %v7521_v62 = vunpack.c.l.b16 %v4476_v24  ;;  %v3320_v22 = vpack.c.bf16 %v3271_v45, %v3271_v45  ;;  %v3321_v4 = vpack.c.bf16 %v3277_v63, %v3277_v63  ;;  %v4477_v23 = vpack.c.bf16 %v4428_v10, %v4428_v10 }
 0x4e1   : > { %v4478_v50 = vpack.c.bf16 %v4434_v9, %v4434_v9  ;;  %v3280_v27 = vrot.slane %v3279_v51, 2  ;;  %v3286_v28 = vrot.slane %v3285_v25, 2  ;;  %v4289_v6 = vmul.bf16 %v7277_v12, %v5541_v58 }
 0x4e2   : > { %v5518_v43 = vpack.c.bf16 %v7380_v32, %v7378_v42  ;;  %v3368_v56 = vunpack.c.l.b16 %v3320_v22  ;;  %v7529_v8 = vunpack.c.l.b16 %v3321_v4  ;;  %v7531_v47 = vunpack.c.l.b16 %v4477_v23 }
 0x4e3   : > { %v7533_v59 = vunpack.c.l.b16 %v4478_v50  ;;  %v3281_v18 = vadd.f32 %v3280_v27, %v3279_v51  ;;  %v3287_v2 = vadd.f32 %v3286_v28, %v3285_v25  ;;  %v4311_v29 = vunpack.c.l.bf16 %v4289_v6 }
 0x4e4   : > { %v4312_v53 = vunpack.c.h.bf16 %v4289_v6  ;;  %v3133_v44 = vmul.bf16 %v7272_v60, %v5518_v43  ;;  %v5542_v49 = vpack.c.bf16 %v7402_v1, %v7400_v39  ;;  %v3000_v13 = vpack.c.bf16 %v7427_v57, %v7412_v19  ;;  %v8358_v57 = vld [vmem:[#allocation43_spill] sm:$0xff] }
 0x4e5   : > { %v3316_v42 = vpack.c.bf16 %v7495_v3, %v7495_v3  ;;  %v3282_v32 = vrot.slane %v3281_v18, 1  ;;  %v3288_v58 = vrot.slane %v3287_v2, 1  ;;  %v4435_v15 = vrot.slane %v4311_v29, 4 }
 0x4e6   : > { %v4441_v54 = vrot.slane %v4312_v53, 4  ;;  %v3156_v48 = vunpack.c.l.bf16 %v3133_v44  ;;  %v3157_v26 = vunpack.c.h.bf16 %v3133_v44  ;;  %v4290_v21 = vmul.bf16 %v7277_v12, %v5542_v49 }
 0x4e7   : > { %v3364_v24 = vunpack.c.l.b16 %v3316_v42  ;;  %v3283_v33 = vadd.f32 %v3282_v32, %v3281_v18  ;;  %v3289_v60 = vadd.f32 %v3288_v58, %v3287_v2  ;;  %v4436_v36 = vadd.f32 %v4435_v15, %v4311_v29 }
 0x4e8   : > { %v4442_v45 = vadd.f32 %v4441_v54, %v4312_v53  ;;  %v3290_v39 = vrot.slane %v3156_v48, 4  ;;  %v3296_v1 = vrot.slane %v3157_v26, 4  ;;  %v4313_v63 = vunpack.c.l.bf16 %v4290_v21 }
 0x4e9   : > { %v4314_v10 = vunpack.c.h.bf16 %v4290_v21  ;;  %v3322_v9 = vpack.c.bf16 %v3283_v33, %v3283_v33  ;;  %v3323_v51 = vpack.c.bf16 %v3289_v60, %v3289_v60  ;;  %v4437_v3 = vrot.slane %v4436_v36, 2 }
 0x4ea   : > { %v4443_v25 = vrot.slane %v4442_v45, 2  ;;  %v3291_v22 = vadd.f32 %v3290_v39, %v3156_v48  ;;  %v3297_v4 = vadd.f32 %v3296_v1, %v3157_v26  ;;  %v4447_v23 = vrot.slane %v4313_v63, 4 }
 0x4eb   : > { %v4453_v50 = vrot.slane %v4314_v10, 4  ;;  %v3370_v27 = vunpack.c.l.b16 %v3322_v9  ;;  %v7543_v28 = vunpack.c.l.b16 %v3323_v51  ;;  %v4438_v12 = vadd.f32 %v4437_v3, %v4436_v36 }
 0x4ec   : > { %v4444_v6 = vadd.f32 %v4443_v25, %v4442_v45  ;;  %v3292_v43 = vrot.slane %v3291_v22, 2  ;;  %v3298_v18 = vrot.slane %v3297_v4, 2  ;;  %v4448_v2 = vadd.f32 %v4447_v23, %v4313_v63 }
 0x4ed   : > { %v4454_v29 = vadd.f32 %v4453_v50, %v4314_v10  ;;  %v4439_v53 = vrot.slane %v4438_v12, 1  ;;  %v3376_v49 = vsel %vm1057_vm6, %v7414_v37, %v7384_v34  ;;  %v3388_v42 = vsel %vm1053_vm4, %v3368_v56, %v7515_v17  ;;  %v8348_v17 = vld [vmem:[#allocation55_spill] sm:$0xff] }
 0x4ee   : > { %v4445_v44 = vrot.slane %v4444_v6, 1  ;;  %v3293_v32 = vadd.f32 %v3292_v43, %v3291_v22  ;;  %v3299_v58 = vadd.f32 %v3298_v18, %v3297_v4  ;;  %v4449_v15 = vrot.slane %v4448_v2, 2  ;;  %v8349_v56 = vld [vmem:[#allocation59_spill] sm:$0xff] }
 0x4ef   : > { %v4455_v54 = vrot.slane %v4454_v29, 2  ;;  %v4440_v48 = vadd.f32 %v4439_v53, %v4438_v12  ;;  %v3377_v21 = vsel %vm1059_vm7, %v7455_v20, %v3376_v49  ;;  %v3389_v33 = vsel %vm1055_vm5, %v3370_v27, %v3388_v42  ;;  %v8351_v43 = vld [vmem:[#allocation47_spill] sm:$0xff]  ;;  %v8353_v53 = vld [vmem:[#allocation49_spill] sm:$0xff] }
 0x4f0   : > { %v4446_v26 = vadd.f32 %v4445_v44, %v4444_v6  ;;  %v3294_v60 = vrot.slane %v3293_v32, 1  ;;  %v3300_v36 = vrot.slane %v3299_v58, 1  ;;  %v4450_v45 = vadd.f32 %v4449_v15, %v4448_v2  ;;  %v8350_v6 = vld [vmem:[#allocation37_spill] sm:$0xff]  ;;  %v8354_v15 = vld [vmem:[#allocation39_spill] sm:$0xff] }
 0x4f1   : > { %v4456_v39 = vadd.f32 %v4455_v54, %v4454_v29  ;;  %v4479_v1 = vpack.c.bf16 %v4440_v48, %v4440_v48  ;;  %v3378_v37 = vsel %vm1061_vm8, %v7467_v41, %v3377_v21  ;;  %v4157_v63 = vpack.c.bf16 %v8349_v56, %v8348_v17  ;;  %v8352_v29 = vld [vmem:[#allocation51_spill] sm:$0xff]  ;;  %v8355_v54 = vld [vmem:[#allocation41_spill] sm:$0xff] }
 0x4f2   : > { %v4480_v34 = vpack.c.bf16 %v4446_v26, %v4446_v26  ;;  %v3295_v10 = vadd.f32 %v3294_v60, %v3293_v32  ;;  %v3301_v9 = vadd.f32 %v3300_v36, %v3299_v58  ;;  %v4451_v51 = vrot.slane %v4450_v45, 1 }
 0x4f3   : > { %v4457_v3 = vrot.slane %v4456_v39, 1  ;;  %v4527_v25 = vunpack.c.l.b16 %v4479_v1  ;;  %v3379_v22 = vsel %vm1063_vm9, %v7487_v40, %v3378_v37  ;;  %v4473_v4 = vpack.c.bf16 %v7502_v38, %v7502_v38  ;;  %v8357_v1 = vld [vmem:[#allocation57_spill] sm:$0xff] }
 0x4f4   : > { %v4528_v20 = vunpack.c.l.b16 %v4480_v34  ;;  %v4452_v23 = vadd.f32 %v4451_v51, %v4450_v45  ;;  %v3324_v27 = vpack.c.bf16 %v3295_v10, %v3295_v10  ;;  %v3380_v41 = vsel %vm1065_vm10, %v3364_v24, %v3379_v22 }
 0x4f5   : > { %v4458_v50 = vadd.f32 %v4457_v3, %v4456_v39  ;;  %v4521_v12 = vunpack.c.l.b16 %v4473_v4  ;;  %v4533_v18 = vsel %vm1057_vm6, %v8351_v43, %v8350_v6  ;;  %v4545_v2 = vsel %vm1053_vm4, %v7531_v47, %v7519_v35  ;;  %v8356_v39 = vld [vmem:[#allocation53_spill] sm:$0xff] }
 0x4f6   : > { %v3001_v40 = vpack.c.bf16 %v8353_v53, %v8352_v29  ;;  %v3372_v44 = vunpack.c.l.b16 %v3324_v27  ;;  %v4481_v49 = vpack.c.bf16 %v4452_v23, %v4452_v23  ;;  %v4534_v38 = vsel %vm1059_vm7, %v7461_v7, %v4533_v18  ;;  %v5687_v27 = vld [vmem:[%s6114_s1 + $0x10] sm:$0xff] }
 0x4f7   : > { %v4546_v42 = vsel %vm1055_vm5, %v4527_v25, %v4545_v2  ;;  %v4535_v24 = vsel %vm1061_vm8, %v7471_v16, %v4534_v38  ;;  %v3317_v32 = vpack.c.bf16 %v7497_v31, %v7497_v31  ;;  %v3325_v58 = vpack.c.bf16 %v3301_v9, %v3301_v9 }
 0x4f8   : > { %v3383_v35 = vsel %vm1057_vm6, %v8355_v54, %v8354_v15  ;;  %v3390_v47 = vsel %vm1057_vm6, %v3372_v44, %v3389_v33  ;;  %v4529_v48 = vunpack.c.l.b16 %v4481_v49  ;;  %v4536_v26 = vsel %vm1063_vm9, %v7491_v14, %v4535_v24 }
 0x4f9   : > { %v3384_v7 = vsel %vm1059_vm7, %v7457_v46, %v3383_v35  ;;  %v3394_v21 = vpack.c.b16 %v3390_v47, %v3380_v41  ;;  %v4537_v16 = vsel %vm1065_vm10, %v4521_v12, %v4536_v26  ;;  %v3365_v60 = vunpack.c.l.b16 %v3317_v32  ;;  %v8360_v12 = vld [vmem:[#allocation75_spill] sm:$0xff] }
 0x4fa   : > { %v3373_v36 = vunpack.c.l.b16 %v3325_v58  ;;  %v4547_v31 = vsel %vm1057_vm6, %v4529_v48, %v4546_v42  ;;  %v3385_v45 = vsel %vm1061_vm8, %v7469_v11, %v3384_v7  ;;  %v3391_v33 = vsel %vm1053_vm4, %v7529_v8, %v7517_v5 }
 0x4fb   : > { %v4158_v14 = vpack.c.bf16 %v8357_v1, %v8356_v39  ;;  %v3398_v46 = vmul.bf16 %v3394_v21, %v3000_v13  ;;  %v4551_v34 = vpack.c.b16 %v4547_v31, %v4537_v16  ;;  %v3386_v37 = vsel %vm1063_vm9, %v7489_v0, %v3385_v45  ;;  %v8359_v13 = vld [vmem:[#allocation45_spill] sm:$0xff] }
 0x4fc   : > { %v3392_v17 = vsel %vm1055_vm5, %v7543_v28, %v3391_v33  ;;  %v3387_v11 = vsel %vm1065_vm10, %v3365_v60, %v3386_v37  ;;  %v4474_v5 = vpack.c.bf16 %v7504_v61, %v7504_v61  ;;  %v4482_v8 = vpack.c.bf16 %v4458_v50, %v4458_v50  ;;  %v8361_v37 = vld [vmem:[#allocation85_spill] sm:$0xff] }
 0x4fd   : > { %v3393_v56 = vsel %vm1057_vm6, %v3373_v36, %v3392_v17  ;;  %v7605_v10 = vmul.bf16 %v4551_v34, %v4157_v63  ;;  %v4540_v9 = vsel %vm1057_vm6, %v8359_v13, %v8358_v57  ;;  %v4548_v0 = vsel %vm1053_vm4, %v7533_v59, %v7521_v62 }
 0x4fe   : > { %v3395_v19 = vpack.c.b16 %v3393_v56, %v3387_v11  ;;  %v4522_v28 = vunpack.c.l.b16 %v4474_v5  ;;  %v4530_v51 = vunpack.c.l.b16 %v4482_v8  ;;  %v4541_v3 = vsel %vm1059_vm7, %v7463_v52, %v4540_v9  ;;  %v8362_v11 = vld [vmem:[#allocation71_spill] sm:$0xff] }
 0x4ff   : > { %v4549_v61 = vsel %vm1055_vm5, %v4528_v20, %v4548_v0  ;;  %v4542_v25 = vsel %vm1061_vm8, %v7473_v55, %v4541_v3  ;;  %v3870_v41 = vunpack.c.l.bf16 %v5687_v27  ;;  %v3871_v52 = vunpack.c.h.bf16 %v5687_v27  ;;  %v7628_v55 = vld [vmem:[%s6114_s1 + $0x18] sm:$0xff] }
 0x500   : > { %v3399_v63 = vmul.bf16 %v3395_v19, %v3001_v40  ;;  %v4543_v22 = vsel %vm1063_vm9, %v7493_v30, %v4542_v25  ;;  %v4550_v4 = vsel %vm1057_vm6, %v4530_v51, %v4549_v61  ;;  %v5027_v30 = vunpack.c.l.bf16 %v7628_v55 }
 0x501   : > { %v4544_v62 = vsel %vm1065_vm10, %v4522_v28, %v4543_v22  ;;  %v5028_v18 = vunpack.c.h.bf16 %v7628_v55  ;;  %v7638_v38 = vmul.f32 %v3870_v41, %v3870_v41  ;;  %v7640_v42 = vmul.f32 %v3871_v52, %v3871_v52 }
 0x502   : > { %v3402_v23 = vcombine.low %v3398_v46, %v3399_v63  ;;  %v3403_v50 = vcombine.high %v3398_v46, %v3399_v63  ;;  %v4552_v59 = vpack.c.b16 %v4550_v4, %v4544_v62  ;;  %v7644_v48 = vmul.f32 %v5027_v30, %v5027_v30 }
 0x504   : > { %v3410_v6 = vrot.slane %v3402_v23, %v8360_v12  ;;  %v3417_v20 = vrot.slane %v3403_v50, %v8360_v12  ;;  %v7625_v43 = vmul.bf16 %v4552_v59, %v4158_v14 }
 0x506   : > { %v3418_v2 = vcombine.high %v3410_v6, %v3410_v6  ;;  %v3419_v29 = vcombine.high %v3417_v20, %v3417_v20  ;;  %v3426_v53 = vrot.slane %v3410_v6, %v8360_v12  ;;  %v3433_v40 = vrot.slane %v3417_v20, %v8360_v12 }
 0x507   : > { %v4559_v44 = vcombine.low %v7605_v10, %v7625_v43  ;;  %v4560_v49 = vcombine.high %v7605_v10, %v7625_v43 }
 0x508   : > { %v3440_v24 = vrot.slane %v3418_v2, %v8360_v12  ;;  %v3447_v32 = vrot.slane %v3419_v29, %v8360_v12  ;;  %v3448_v58 = vcombine.high %v3426_v53, %v3426_v53  ;;  %v3451_v15 = vunpack.i.h.s16 %v3426_v53 }
 0x509   : > { %v3459_v54 = vunpack.i.h.s16 %v3433_v40  ;;  %v5363_v35 = vpack.i.b16 %v3426_v53, %v3426_v53  ;;  %v5367_v47 = vpack.i.b16 %v3433_v40, %v3433_v40 }
 0x50a   : > { %v3449_v26 = vcombine.high %v3440_v24, %v3440_v24  ;;  %v3453_v7 = vunpack.i.h.s16 %v3440_v24  ;;  %v3455_v21 = vunpack.i.h.s16 %v3448_v58  ;;  %v3461_v16 = vunpack.i.h.s16 %v3447_v32 }
 0x50b   : > { %v3463_v60 = vpack.i.b16 %v3451_v15, %v3451_v15  ;;  %v5364_v36 = vpack.i.b16 %v3440_v24, %v3440_v24  ;;  %v5365_v31 = vpack.i.b16 %v3448_v58, %v3448_v58  ;;  %v3471_v45 = vpack.i.b16 %v3459_v54, %v3459_v54 }
 0x50c   : > { %v3457_v33 = vunpack.i.h.s16 %v3449_v26  ;;  %v3465_v39 = vpack.i.b16 %v3453_v7, %v3453_v7  ;;  %v3467_v1 = vpack.i.b16 %v3455_v21, %v3455_v21  ;;  %v5366_v14 = vpack.i.b16 %v3449_v26, %v3449_v26 }
 0x50d   : > { %v5368_v46 = vpack.i.b16 %v3447_v32, %v3447_v32  ;;  %v3473_v34 = vpack.i.b16 %v3461_v16, %v3461_v16  ;;  %v3477_v17 = vrot.slane %v5363_v35, %v8361_v37  ;;  %v3481_v56 = vrot.slane %v5363_v35, %v8362_v11 }
 0x50e   : > { %v3469_v5 = vpack.i.b16 %v3457_v33, %v3457_v33  ;;  %v3485_v8 = vrot.slane %v3463_v60, %v8361_v37  ;;  %v3489_v19 = vrot.slane %v3463_v60, %v8362_v11  ;;  %v3493_v57 = vrot.slane %v5364_v36, %v8361_v37 }
 0x50f   : > { %v3497_v13 = vrot.slane %v5364_v36, %v8362_v11  ;;  %v3501_v9 = vrot.slane %v3465_v39, %v8361_v37  ;;  %v3505_v0 = vrot.slane %v3465_v39, %v8362_v11  ;;  %v3509_v28 = vrot.slane %v5365_v31, %v8361_v37 }
 0x510   : > { %v3513_v51 = vrot.slane %v5365_v31, %v8362_v11  ;;  %v3517_v3 = vrot.slane %v3467_v1, %v8361_v37  ;;  %v3521_v61 = vrot.slane %v3467_v1, %v8362_v11  ;;  %v3525_v63 = vrot.slane %v5366_v14, %v8361_v37 }
 0x511   : > { %v3529_v25 = vrot.slane %v5366_v14, %v8362_v11  ;;  %v3533_v22 = vrot.slane %v3469_v5, %v8361_v37  ;;  %v3537_v4 = vrot.slane %v3469_v5, %v8362_v11  ;;  %v3541_v23 = vrot.slane %v5367_v47, %v8361_v37 }
 0x512   : > { %v3545_v50 = vrot.slane %v5367_v47, %v8362_v11  ;;  %v3549_v62 = vrot.slane %v3471_v45, %v8361_v37  ;;  %v3553_v59 = vrot.slane %v3471_v45, %v8362_v11  ;;  %v3557_v27 = vrot.slane %v5368_v46, %v8361_v37 }
 0x513   : > { %v3561_v41 = vrot.slane %v5368_v46, %v8362_v11  ;;  %v3565_v52 = vrot.slane %v3473_v34, %v8361_v37  ;;  %v3569_v6 = vrot.slane %v3473_v34, %v8362_v11  ;;  %v3571_v20 = vpack.i.b16 %v3477_v17, %v3477_v17 }
 0x514   : > { %v3578_v30 = vpack.i.b16 %v3481_v56, %v3481_v56  ;;  %v3585_v2 = vpack.i.b16 %v3485_v8, %v3485_v8  ;;  %v3592_v29 = vpack.i.b16 %v3489_v19, %v3489_v19  ;;  %v3599_v53 = vpack.i.b16 %v3493_v57, %v3493_v57 }
 0x515   : > { %v3576_v40 = vrot.slane %v3571_v20, %v8361_v37  ;;  %v3606_v24 = vpack.i.b16 %v3497_v13, %v3497_v13  ;;  %v3613_v32 = vpack.i.b16 %v3501_v9, %v3501_v9  ;;  %v3620_v58 = vpack.i.b16 %v3505_v0, %v3505_v0 }
 0x516   : > { %v3583_v15 = vrot.slane %v3578_v30, %v8361_v37  ;;  %v3590_v54 = vrot.slane %v3585_v2, %v8361_v37  ;;  %v3597_v35 = vrot.slane %v3592_v29, %v8361_v37  ;;  %v3604_v47 = vrot.slane %v3599_v53, %v8361_v37 }
 0x517   : > { %v3611_v26 = vrot.slane %v3606_v24, %v8361_v37  ;;  %v3618_v7 = vrot.slane %v3613_v32, %v8361_v37  ;;  %v3625_v21 = vrot.slane %v3620_v58, %v8361_v37  ;;  %v3627_v16 = vpack.i.b16 %v3509_v28, %v3509_v28 }
 0x518   : > { %v3634_v60 = vpack.i.b16 %v3513_v51, %v3513_v51  ;;  %v3641_v36 = vpack.i.b16 %v3517_v3, %v3517_v3  ;;  %v3648_v31 = vpack.i.b16 %v3521_v61, %v3521_v61  ;;  %v3655_v45 = vpack.i.b16 %v3525_v63, %v3525_v63 }
 0x519   : > { %v3632_v33 = vrot.slane %v3627_v16, %v8361_v37  ;;  %v3662_v39 = vpack.i.b16 %v3529_v25, %v3529_v25  ;;  %v3669_v1 = vpack.i.b16 %v3533_v22, %v3533_v22  ;;  %v3676_v14 = vpack.i.b16 %v3537_v4, %v3537_v4  ;;  %v8363_v16 = vld [vmem:[#allocation73_spill] sm:$0xff] }
 0x51a   : > { %v3639_v46 = vrot.slane %v3634_v60, %v8361_v37  ;;  %v3646_v34 = vrot.slane %v3641_v36, %v8361_v37  ;;  %v3653_v17 = vrot.slane %v3648_v31, %v8361_v37  ;;  %v3660_v56 = vrot.slane %v3655_v45, %v8361_v37  ;;  %v8364_v60 = vld [vmem:[#allocation84_spill] sm:$0xff]  ;;  %v8366_v45 = vld [vmem:[#allocation86_spill] sm:$0xff] }
 0x51b   : > { %v3667_v5 = vrot.slane %v3662_v39, %v8361_v37  ;;  %v3674_v8 = vrot.slane %v3669_v1, %v8361_v37  ;;  %v3681_v19 = vrot.slane %v3676_v14, %v8361_v37  ;;  %v3683_v57 = vpack.i.b16 %v3541_v23, %v3541_v23  ;;  %v8367_v39 = vld [vmem:[#allocation76_spill] sm:$0xff] }
 0x51c   : > { %v3690_v13 = vpack.i.b16 %v3545_v50, %v3545_v50  ;;  %v3697_v9 = vpack.i.b16 %v3549_v62, %v3549_v62  ;;  %v3704_v0 = vpack.i.b16 %v3553_v59, %v3553_v59  ;;  %v3711_v28 = vpack.i.b16 %v3557_v27, %v3557_v27 }
 0x51d   : > { %v3688_v51 = vrot.slane %v3683_v57, %v8361_v37  ;;  %v3718_v3 = vpack.i.b16 %v3561_v41, %v3561_v41  ;;  %v3725_v61 = vpack.i.b16 %v3565_v52, %v3565_v52  ;;  %v3732_v63 = vpack.i.b16 %v3569_v6, %v3569_v6  ;;  %v8381_v57 = vld [vmem:[#allocation52_spill] sm:$0xff] }
 0x51e   : > { %v3695_v25 = vrot.slane %v3690_v13, %v8361_v37  ;;  %v3702_v22 = vrot.slane %v3697_v9, %v8361_v37  ;;  %v3709_v4 = vrot.slane %v3704_v0, %v8361_v37  ;;  %v3716_v20 = vrot.slane %v3711_v28, %v8361_v37  ;;  %v8382_v13 = vld [vmem:[#allocation54_spill] sm:$0xff]  ;;  %v8384_v28 = vld [vmem:[#allocation56_spill] sm:$0xff] }
 0x51f   : > { %v3723_v30 = vrot.slane %v3718_v3, %v8361_v37  ;;  %v3730_v23 = vrot.slane %v3725_v61, %v8361_v37  ;;  %v3737_v50 = vrot.slane %v3732_v63, %v8361_v37  ;;  %v5369_v62 = vcombine.low %v3576_v40, %v3583_v15  ;;  %v8369_v40 = vld [vmem:[#allocation20_spill] sm:$0xff]  ;;  %v8370_v15 = vld [vmem:[#allocation22_spill] sm:$0xff]  ;;  %v8387_v63 = vld [vmem:[#allocation77_spill] sm:$0xff] }
 0x520   : > { %v5370_v59 = vcombine.low %v3590_v54, %v3597_v35  ;;  %v5371_v27 = vcombine.low %v3604_v47, %v3611_v26  ;;  %v5372_v41 = vcombine.low %v3618_v7, %v3625_v21  ;;  %v5373_v52 = vcombine.low %v3632_v33, %v3639_v46  ;;  %v8372_v47 = vld [vmem:[#allocation24_spill] sm:$0xff]  ;;  %v8373_v26 = vld [vmem:[#allocation26_spill] sm:$0xff] }
 0x521   : > { %v5374_v6 = vcombine.low %v3646_v34, %v3653_v17  ;;  %v5375_v2 = vcombine.low %v3660_v56, %v3667_v5  ;;  %v5376_v29 = vcombine.low %v3674_v8, %v3681_v19  ;;  %v5377_v53 = vcombine.low %v3688_v51, %v3695_v25  ;;  %v8375_v33 = vld [vmem:[#allocation36_spill] sm:$0xff]  ;;  %v8376_v46 = vld [vmem:[#allocation38_spill] sm:$0xff]  ;;  %v8388_v25 = vld [vmem:[#allocation17_spill] sm:$0xff] }
 0x522   : > { %v5378_v24 = vcombine.low %v3702_v22, %v3709_v4  ;;  %v5379_v32 = vcombine.low %v3716_v20, %v3723_v30  ;;  %v5380_v58 = vcombine.low %v3730_v23, %v3737_v50  ;;  %v8365_v36 = vpack.c.bf16 %v8363_v16, %v8364_v60  ;;  %v8378_v56 = vld [vmem:[#allocation40_spill] sm:$0xff]  ;;  %v8379_v5 = vld [vmem:[#allocation42_spill] sm:$0xff]  ;;  %v8390_v20 = vld [vmem:[#allocation79_spill] sm:$0xff] }
 0x523   : > { %v8368_v1 = vpack.c.bf16 %v8366_v45, %v8367_v39  ;;  %v8371_v54 = vpack.c.bf16 %v8369_v40, %v8370_v15  ;;  %v8374_v7 = vpack.c.bf16 %v8372_v47, %v8373_v26  ;;  %v8377_v34 = vpack.c.bf16 %v8375_v33, %v8376_v46  ;;  %v8385_v51 = vld [vmem:[#allocation58_spill] sm:$0xff] }
 0x524   : > { %v3810_v31 = vmul.bf16 %v8365_v36, %v5369_v62  ;;  %v8380_v8 = vpack.c.bf16 %v8378_v56, %v8379_v5  ;;  %v8383_v9 = vpack.c.bf16 %v8381_v57, %v8382_v13  ;;  %v8386_v3 = vpack.c.bf16 %v8384_v28, %v8385_v51  ;;  %v8391_v30 = vld [vmem:[#allocation78_spill] sm:$0xff]  ;;  %v8393_v62 = vld [vmem:[#allocation21_spill] sm:$0xff] }
 0x525   : > { %v3811_v14 = vmul.bf16 %v8368_v1, %v5370_v59  ;;  %v3812_v35 = vmul.bf16 %v8371_v54, %v5371_v27  ;;  %v3813_v21 = vmul.bf16 %v8374_v7, %v5372_v41  ;;  %v3814_v17 = vmul.bf16 %v8377_v34, %v5373_v52  ;;  %v8394_v59 = vld [vmem:[#allocation23_spill] sm:$0xff]  ;;  %v8396_v52 = vld [vmem:[#allocation25_spill] sm:$0xff] }
 0x526   : > { %v3815_v19 = vmul.bf16 %v8380_v8, %v5374_v6  ;;  %v7715_v0 = vmul.bf16 %v8383_v9, %v5375_v2  ;;  %v7720_v61 = vmul.bf16 %v8386_v3, %v5376_v29  ;;  %v8389_v22 = vpack.c.bf16 %v8387_v63, %v8388_v25  ;;  %v8397_v6 = vld [vmem:[#allocation27_spill] sm:$0xff] }
 0x527   : > { %v8392_v23 = vpack.c.bf16 %v8390_v20, %v8391_v30  ;;  %v8395_v27 = vpack.c.bf16 %v8393_v62, %v8394_v59  ;;  %v8398_v2 = vpack.c.bf16 %v8396_v52, %v8397_v6  ;;  %v3822_v16 = vunpack.c.l.bf16 %v3810_v31 }
 0x528   : > { %v7725_v4 = vmul.bf16 %v8389_v22, %v5377_v53  ;;  %v7745_v53 = vmul.f32 %v5028_v18, %v5028_v18  ;;  %v3874_v60 = vrot.slane %v7638_v38, 4  ;;  %v3823_v36 = vunpack.c.h.bf16 %v3810_v31 }
 0x529   : > { %v7730_v50 = vmul.bf16 %v8392_v23, %v5378_v24  ;;  %v7735_v41 = vmul.bf16 %v8395_v27, %v5379_v32  ;;  %v7740_v29 = vmul.bf16 %v8398_v2, %v5380_v58  ;;  %v4567_v24 = vrot.slane %v4559_v44, %v8360_v12 }
 0x52a   : > { %v3880_v32 = vrot.slane %v7640_v42, 4  ;;  %v3824_v45 = vunpack.c.l.bf16 %v3811_v14  ;;  %v3825_v39 = vunpack.c.h.bf16 %v3811_v14  ;;  %v3826_v58 = vunpack.c.l.bf16 %v3812_v35 }
 0x52b   : > { %v3827_v1 = vunpack.c.h.bf16 %v3812_v35  ;;  %v3828_v40 = vunpack.c.l.bf16 %v3813_v21  ;;  %v3829_v55 = vunpack.c.h.bf16 %v3813_v21  ;;  %v3830_v15 = vunpack.c.l.bf16 %v3814_v17 }
 0x52c   : > { %v3831_v18 = vunpack.c.h.bf16 %v3814_v17  ;;  %v3832_v54 = vunpack.c.l.bf16 %v3815_v19  ;;  %v3833_v47 = vunpack.c.h.bf16 %v3815_v19  ;;  %v3834_v26 = vunpack.c.l.bf16 %v7715_v0 }
 0x52d   : > { %v3835_v7 = vunpack.c.h.bf16 %v7715_v0  ;;  %v3836_v44 = vunpack.c.l.bf16 %v7720_v61  ;;  %v3837_v33 = vunpack.c.h.bf16 %v7720_v61  ;;  %v3838_v31 = vunpack.c.l.bf16 %v7725_v4 }
 0x52e   : > { %v3839_v14 = vunpack.c.h.bf16 %v7725_v4  ;;  %v3846_v46 = vadd.f32 %v3824_v45, %v3822_v16  ;;  %v3857_v35 = vadd.f32 %v3825_v39, %v3823_v36  ;;  %v4574_v21 = vrot.slane %v4560_v49, %v8360_v12 }
 0x52f   : > { %v3840_v34 = vunpack.c.l.bf16 %v7730_v50  ;;  %v3841_v17 = vunpack.c.h.bf16 %v7730_v50  ;;  %v4575_v56 = vcombine.high %v4567_v24, %v4567_v24  ;;  %v4583_v5 = vrot.slane %v4567_v24, %v8360_v12 }
 0x530   : > { %v3847_v8 = vadd.f32 %v3846_v46, %v3826_v58  ;;  %v3858_v19 = vadd.f32 %v3857_v35, %v3827_v1  ;;  %v4576_v57 = vcombine.high %v4574_v21, %v4574_v21  ;;  %v4590_v13 = vrot.slane %v4574_v21, %v8360_v12 }
 0x531   : > { %v4597_v9 = vrot.slane %v4575_v56, %v8360_v12  ;;  %v4605_v0 = vcombine.high %v4583_v5, %v4583_v5  ;;  %v4608_v28 = vunpack.i.h.s16 %v4583_v5  ;;  %v5423_v51 = vpack.i.b16 %v4583_v5, %v4583_v5 }
 0x532   : > { %v3848_v3 = vadd.f32 %v3847_v8, %v3828_v40  ;;  %v3859_v10 = vadd.f32 %v3858_v19, %v3829_v55  ;;  %v4604_v43 = vrot.slane %v4576_v57, %v8360_v12  ;;  %v4616_v49 = vunpack.i.h.s16 %v4590_v13 }
 0x533   : > { %v4606_v61 = vcombine.high %v4597_v9, %v4597_v9  ;;  %v4610_v63 = vunpack.i.h.s16 %v4597_v9  ;;  %v4612_v25 = vunpack.i.h.s16 %v4605_v0  ;;  %v4620_v22 = vpack.i.b16 %v4608_v28, %v4608_v28 }
 0x534   : > { %v3849_v4 = vadd.f32 %v3848_v3, %v3830_v15  ;;  %v3860_v20 = vadd.f32 %v3859_v10, %v3831_v18  ;;  %v4618_v30 = vunpack.i.h.s16 %v4604_v43  ;;  %v5424_v23 = vpack.i.b16 %v4597_v9, %v4597_v9 }
 0x535   : > { %v4614_v50 = vunpack.i.h.s16 %v4606_v61  ;;  %v4622_v62 = vpack.i.b16 %v4610_v63, %v4610_v63  ;;  %v5425_v59 = vpack.i.b16 %v4605_v0, %v4605_v0  ;;  %v4624_v27 = vpack.i.b16 %v4612_v25, %v4612_v25 }
 0x536   : > { %v3850_v52 = vadd.f32 %v3849_v4, %v3832_v54  ;;  %v3861_v6 = vadd.f32 %v3860_v20, %v3833_v47  ;;  %v5426_v2 = vpack.i.b16 %v4606_v61, %v4606_v61  ;;  %v5427_v16 = vpack.i.b16 %v4590_v13, %v4590_v13 }
 0x537   : > { %v4626_v24 = vpack.i.b16 %v4614_v50, %v4614_v50  ;;  %v4628_v36 = vpack.i.b16 %v4616_v49, %v4616_v49  ;;  %v5428_v12 = vpack.i.b16 %v4604_v43, %v4604_v43  ;;  %v4630_v45 = vpack.i.b16 %v4618_v30, %v4618_v30 }
 0x538   : > { %v3851_v39 = vadd.f32 %v3850_v52, %v3834_v26  ;;  %v3862_v58 = vadd.f32 %v3861_v6, %v3835_v7  ;;  %v4634_v1 = vrot.slane %v5423_v51, %v8361_v37  ;;  %v4638_v40 = vrot.slane %v5423_v51, %v8362_v11 }
 0x539   : > { %v4642_v55 = vrot.slane %v4620_v22, %v8361_v37  ;;  %v4646_v15 = vrot.slane %v4620_v22, %v8362_v11  ;;  %v4650_v18 = vrot.slane %v5424_v23, %v8361_v37  ;;  %v4654_v54 = vrot.slane %v5424_v23, %v8362_v11 }
 0x53a   : > { %v3852_v47 = vadd.f32 %v3851_v39, %v3836_v44  ;;  %v3863_v46 = vadd.f32 %v3862_v58, %v3837_v33  ;;  %v4658_v35 = vrot.slane %v4622_v62, %v8361_v37  ;;  %v4662_v21 = vrot.slane %v4622_v62, %v8362_v11 }
 0x53b   : > { %v4666_v26 = vrot.slane %v5425_v59, %v8361_v37  ;;  %v4670_v7 = vrot.slane %v5425_v59, %v8362_v11  ;;  %v4674_v56 = vrot.slane %v4624_v27, %v8361_v37  ;;  %v4678_v5 = vrot.slane %v4624_v27, %v8362_v11 }
 0x53c   : > { %v3853_v8 = vadd.f32 %v3852_v47, %v3838_v31  ;;  %v3864_v19 = vadd.f32 %v3863_v46, %v3839_v14  ;;  %v4682_v57 = vrot.slane %v5426_v2, %v8361_v37  ;;  %v4686_v13 = vrot.slane %v5426_v2, %v8362_v11 }
 0x53d   : > { %v4690_v44 = vrot.slane %v4626_v24, %v8361_v37  ;;  %v4694_v33 = vrot.slane %v4626_v24, %v8362_v11  ;;  %v4698_v9 = vrot.slane %v5427_v16, %v8361_v37  ;;  %v4702_v0 = vrot.slane %v5427_v16, %v8362_v11 }
 0x53e   : > { %v7787_v28 = vadd.f32 %v3853_v8, %v3840_v34  ;;  %v7789_v51 = vadd.f32 %v3864_v19, %v3841_v17  ;;  %v4706_v3 = vrot.slane %v4628_v36, %v8361_v37  ;;  %v4710_v31 = vrot.slane %v4628_v36, %v8362_v11 }
 0x53f   : > { %v4714_v14 = vrot.slane %v5428_v12, %v8361_v37  ;;  %v4718_v10 = vrot.slane %v5428_v12, %v8362_v11  ;;  %v4722_v43 = vrot.slane %v4630_v45, %v8361_v37  ;;  %v4726_v49 = vrot.slane %v4630_v45, %v8362_v11 }
 0x540   : > { %v4728_v61 = vpack.i.b16 %v4634_v1, %v4634_v1  ;;  %v4735_v63 = vpack.i.b16 %v4638_v40, %v4638_v40  ;;  %v4742_v25 = vpack.i.b16 %v4642_v55, %v4642_v55  ;;  %v4749_v22 = vpack.i.b16 %v4646_v15, %v4646_v15 }
 0x541   : > { %v4756_v34 = vpack.i.b16 %v4650_v18, %v4650_v18  ;;  %v4763_v4 = vpack.i.b16 %v4654_v54, %v4654_v54  ;;  %v4770_v17 = vpack.i.b16 %v4658_v35, %v4658_v35  ;;  %v4777_v20 = vpack.i.b16 %v4662_v21, %v4662_v21 }
 0x542   : > { %v4733_v30 = vrot.slane %v4728_v61, %v8361_v37  ;;  %v4740_v23 = vrot.slane %v4735_v63, %v8361_v37  ;;  %v4747_v50 = vrot.slane %v4742_v25, %v8361_v37  ;;  %v4754_v62 = vrot.slane %v4749_v22, %v8361_v37 }
 0x543   : > { %v4761_v59 = vrot.slane %v4756_v34, %v8361_v37  ;;  %v4768_v11 = vrot.slane %v4763_v4, %v8361_v37  ;;  %v4775_v27 = vrot.slane %v4770_v17, %v8361_v37  ;;  %v4782_v52 = vrot.slane %v4777_v20, %v8361_v37  ;;  %v8399_v20 = vld [vmem:[#allocation74_spill] sm:$0xff] }
 0x544   : > { %v4784_v6 = vpack.i.b16 %v4666_v26, %v4666_v26  ;;  %v4791_v2 = vpack.i.b16 %v4670_v7, %v4670_v7  ;;  %v4798_v16 = vpack.i.b16 %v4674_v56, %v4674_v56  ;;  %v4805_v24 = vpack.i.b16 %v4678_v5, %v4678_v5 }
 0x545   : > { %v4812_v36 = vpack.i.b16 %v4682_v57, %v4682_v57  ;;  %v4819_v12 = vpack.i.b16 %v4686_v13, %v4686_v13  ;;  %v4826_v45 = vpack.i.b16 %v4690_v44, %v4690_v44  ;;  %v4833_v39 = vpack.i.b16 %v4694_v33, %v4694_v33 }
 0x546   : > { %v4789_v58 = vrot.slane %v4784_v6, %v8361_v37  ;;  %v4796_v1 = vrot.slane %v4791_v2, %v8361_v37  ;;  %v4803_v40 = vrot.slane %v4798_v16, %v8361_v37  ;;  %v4810_v55 = vrot.slane %v4805_v24, %v8361_v37  ;;  %v8400_v6 = vld [vmem:[#allocation72_spill] sm:$0xff]  ;;  %v8402_v24 = vld [vmem:[#allocation87_spill] sm:$0xff] }
 0x547   : > { %v4817_v15 = vrot.slane %v4812_v36, %v8361_v37  ;;  %v4824_v18 = vrot.slane %v4819_v12, %v8361_v37  ;;  %v4831_v54 = vrot.slane %v4826_v45, %v8361_v37  ;;  %v4838_v47 = vrot.slane %v4833_v39, %v8361_v37  ;;  %v8403_v36 = vld [vmem:[#allocation83_spill] sm:$0xff]  ;;  %v8411_v45 = vld [vmem:[#allocation44_spill] sm:$0xff]  ;;  %v8412_v39 = vld [vmem:[#allocation46_spill] sm:$0xff] }
 0x548   : > { %v4840_v46 = vpack.i.b16 %v4698_v9, %v4698_v9  ;;  %v4847_v35 = vpack.i.b16 %v4702_v0, %v4702_v0  ;;  %v4854_v21 = vpack.i.b16 %v4706_v3, %v4706_v3  ;;  %v4861_v26 = vpack.i.b16 %v4710_v31, %v4710_v31 }
 0x549   : > { %v4868_v7 = vpack.i.b16 %v4714_v14, %v4714_v14  ;;  %v4875_v56 = vpack.i.b16 %v4718_v10, %v4718_v10  ;;  %v4882_v5 = vpack.i.b16 %v4722_v43, %v4722_v43  ;;  %v4889_v8 = vpack.i.b16 %v4726_v49, %v4726_v49 }
 0x54a   : > { %v4845_v19 = vrot.slane %v4840_v46, %v8361_v37  ;;  %v4852_v57 = vrot.slane %v4847_v35, %v8361_v37  ;;  %v4859_v13 = vrot.slane %v4854_v21, %v8361_v37  ;;  %v4866_v44 = vrot.slane %v4861_v26, %v8361_v37  ;;  %v8420_v21 = vld [vmem:[#allocation64_spill] sm:$0xff]  ;;  %v8421_v26 = vld [vmem:[#allocation66_spill] sm:$0xff] }
 0x54b   : > { %v4873_v33 = vrot.slane %v4868_v7, %v8361_v37  ;;  %v4880_v61 = vrot.slane %v4875_v56, %v8361_v37  ;;  %v4887_v9 = vrot.slane %v4882_v5, %v8361_v37  ;;  %v4894_v0 = vrot.slane %v4889_v8, %v8361_v37  ;;  %v8423_v5 = vld [vmem:[#allocation81_spill] sm:$0xff]  ;;  %v8424_v8 = vld [vmem:[#allocation18_spill] sm:$0xff] }
 0x54c   : > { %v5429_v3 = vcombine.low %v4733_v30, %v4740_v23  ;;  %v5430_v31 = vcombine.low %v4747_v50, %v4754_v62  ;;  %v5431_v14 = vcombine.low %v4761_v59, %v4768_v11  ;;  %v5432_v10 = vcombine.low %v4775_v27, %v4782_v52  ;;  %v8405_v30 = vld [vmem:[#allocation28_spill] sm:$0xff]  ;;  %v8406_v23 = vld [vmem:[#allocation30_spill] sm:$0xff] }
 0x54d   : > { %v5433_v43 = vcombine.low %v4789_v58, %v4796_v1  ;;  %v5434_v49 = vcombine.low %v4803_v40, %v4810_v55  ;;  %v5435_v63 = vcombine.low %v4817_v15, %v4824_v18  ;;  %v5436_v25 = vcombine.low %v4831_v54, %v4838_v47  ;;  %v8408_v59 = vld [vmem:[#allocation32_spill] sm:$0xff]  ;;  %v8409_v11 = vld [vmem:[#allocation34_spill] sm:$0xff] }
 0x54e   : > { %v5437_v22 = vcombine.low %v4845_v19, %v4852_v57  ;;  %v5438_v34 = vcombine.low %v4859_v13, %v4866_v44  ;;  %v5439_v4 = vcombine.low %v4873_v33, %v4880_v61  ;;  %v5440_v17 = vcombine.low %v4887_v9, %v4894_v0  ;;  %v8414_v40 = vld [vmem:[#allocation48_spill] sm:$0xff]  ;;  %v8415_v55 = vld [vmem:[#allocation50_spill] sm:$0xff]  ;;  %v8426_v13 = vld [vmem:[#allocation69_spill] sm:$0xff] }
 0x54f   : > { %v8401_v2 = vpack.c.bf16 %v8399_v20, %v8400_v6  ;;  %v8404_v12 = vpack.c.bf16 %v8402_v24, %v8403_v36  ;;  %v8407_v50 = vpack.c.bf16 %v8405_v30, %v8406_v23  ;;  %v8410_v27 = vpack.c.bf16 %v8408_v59, %v8409_v11  ;;  %v8417_v54 = vld [vmem:[#allocation60_spill] sm:$0xff]  ;;  %v8418_v47 = vld [vmem:[#allocation62_spill] sm:$0xff]  ;;  %v8429_v9 = vld [vmem:[#allocation29_spill] sm:$0xff] }
 0x550   : > { %v8413_v58 = vpack.c.bf16 %v8411_v45, %v8412_v39  ;;  %v8416_v15 = vpack.c.bf16 %v8414_v40, %v8415_v55  ;;  %v8419_v46 = vpack.c.bf16 %v8417_v54, %v8418_v47  ;;  %v8422_v7 = vpack.c.bf16 %v8420_v21, %v8421_v26  ;;  %v8427_v44 = vld [vmem:[#allocation68_spill] sm:$0xff]  ;;  %v8430_v0 = vld [vmem:[#allocation31_spill] sm:$0xff] }
 0x551   : > { %v4967_v16 = vmul.bf16 %v8401_v2, %v5429_v3  ;;  %v4968_v37 = vmul.bf16 %v8404_v12, %v5430_v31  ;;  %v4969_v62 = vmul.bf16 %v8407_v50, %v5431_v14  ;;  %v4970_v52 = vmul.bf16 %v8410_v27, %v5432_v10  ;;  %v8432_v14 = vld [vmem:[#allocation33_spill] sm:$0xff]  ;;  %v8433_v10 = vld [vmem:[#allocation35_spill] sm:$0xff] }
 0x552   : > { %v4971_v1 = vmul.bf16 %v8413_v58, %v5433_v43  ;;  %v4972_v18 = vmul.bf16 %v8416_v15, %v5434_v49  ;;  %v4973_v35 = vmul.bf16 %v8419_v46, %v5435_v63  ;;  %v7845_v56 = vmul.bf16 %v8422_v7, %v5436_v25 }
 0x553   : > { %v8425_v19 = vpack.c.bf16 %v8423_v5, %v8424_v8  ;;  %v8428_v33 = vpack.c.bf16 %v8426_v13, %v8427_v44  ;;  %v8431_v3 = vpack.c.bf16 %v8429_v9, %v8430_v0  ;;  %v8434_v43 = vpack.c.bf16 %v8432_v14, %v8433_v10 }
 0x554   : > { %v4981_v63 = vunpack.c.l.bf16 %v4968_v37  ;;  %v4982_v25 = vunpack.c.h.bf16 %v4968_v37  ;;  %v5031_v20 = vrot.slane %v7644_v48, 4  ;;  %v3842_v6 = vunpack.c.l.bf16 %v7735_v41 }
 0x555   : > { %v7850_v57 = vmul.bf16 %v8425_v19, %v5437_v22  ;;  %v7855_v61 = vmul.bf16 %v8428_v33, %v5438_v34  ;;  %v7860_v31 = vmul.bf16 %v8431_v3, %v5439_v4  ;;  %v7865_v49 = vmul.bf16 %v8434_v43, %v5440_v17 }
 0x556   : > { %v3875_v22 = vadd.f32 %v3874_v60, %v7638_v38  ;;  %v3881_v34 = vadd.f32 %v3880_v32, %v7640_v42  ;;  %v5037_v4 = vrot.slane %v7745_v53, 4  ;;  %v3843_v2 = vunpack.c.h.bf16 %v7735_v41 }
 0x557   : > { %v4979_v17 = vunpack.c.l.bf16 %v4967_v16  ;;  %v4980_v24 = vunpack.c.h.bf16 %v4967_v16  ;;  %v4983_v36 = vunpack.c.l.bf16 %v4969_v62  ;;  %v4984_v12 = vunpack.c.h.bf16 %v4969_v62 }
 0x558   : > { %v3844_v37 = vunpack.c.l.bf16 %v7740_v29  ;;  %v3845_v38 = vunpack.c.h.bf16 %v7740_v29  ;;  %v3855_v42 = vadd.f32 %v7787_v28, %v3842_v6  ;;  %v3866_v32 = vadd.f32 %v7789_v51, %v3843_v2 }
 0x559   : > { %v5003_v60 = vadd.f32 %v4981_v63, %v4979_v17  ;;  %v5014_v30 = vadd.f32 %v4982_v25, %v4980_v24  ;;  %v4985_v23 = vunpack.c.l.bf16 %v4970_v52  ;;  %v4986_v50 = vunpack.c.h.bf16 %v4970_v52 }
 0x55a   : > { %v3876_v59 = vrot.slane %v3875_v22, 2  ;;  %v3882_v11 = vrot.slane %v3881_v34, 2  ;;  %v7881_v45 = vadd.f32 %v3855_v42, %v3844_v37  ;;  %v7883_v16 = vadd.f32 %v3866_v32, %v3845_v38 }
 0x55b   : > { %v5004_v27 = vadd.f32 %v5003_v60, %v4983_v36  ;;  %v5015_v41 = vadd.f32 %v5014_v30, %v4984_v12  ;;  %v4987_v58 = vunpack.c.l.bf16 %v4971_v1  ;;  %v4988_v29 = vunpack.c.h.bf16 %v4971_v1 }
 0x55c   : > { %v3877_v62 = vadd.f32 %v3876_v59, %v3875_v22  ;;  %v3883_v39 = vadd.f32 %v3882_v11, %v3881_v34  ;;  %v5032_v51 = vadd.f32 %v5031_v20, %v7644_v48  ;;  %v5038_v52 = vadd.f32 %v5037_v4, %v7745_v53 }
 0x55d   : > { %v5005_v40 = vadd.f32 %v5004_v27, %v4985_v23  ;;  %v5016_v55 = vadd.f32 %v5015_v41, %v4986_v50  ;;  %v4989_v54 = vunpack.c.l.bf16 %v4972_v18  ;;  %v4990_v47 = vunpack.c.h.bf16 %v4972_v18 }
 0x55e   : > { %v3878_v15 = vrot.slane %v3877_v62, 1  ;;  %v3884_v28 = vrot.slane %v3883_v39, 1  ;;  %v5033_v5 = vrot.slane %v5032_v51, 2  ;;  %v5039_v8 = vrot.slane %v5038_v52, 2 }
 0x55f   : > { %v5006_v46 = vadd.f32 %v5005_v40, %v4987_v58  ;;  %v5017_v21 = vadd.f32 %v5016_v55, %v4988_v29  ;;  %v4991_v19 = vunpack.c.l.bf16 %v4973_v35  ;;  %v4992_v13 = vunpack.c.h.bf16 %v4973_v35  ;;  %v8435_v55 = vld [vmem:[#allocation70_spill] sm:$0xff] }
 0x560   : > { %v3879_v26 = vadd.f32 %v3878_v15, %v3877_v62  ;;  %v3885_v7 = vadd.f32 %v3884_v28, %v3883_v39  ;;  %v5034_v0 = vadd.f32 %v5033_v5, %v5032_v51  ;;  %v5040_v3 = vadd.f32 %v5039_v8, %v5038_v52 }
 0x561   : > { %v5007_v44 = vadd.f32 %v5006_v46, %v4989_v54  ;;  %v5018_v1 = vadd.f32 %v5017_v21, %v4990_v47  ;;  %v4993_v48 = vunpack.c.l.bf16 %v7845_v56  ;;  %v4994_v53 = vunpack.c.h.bf16 %v7845_v56 }
 0x562   : > { %v3886_v33 = vmul.f32 -0.1, %v3879_v26  ;;  %v3887_v9 = vmul.f32 -0.1, %v3885_v7  ;;  %v5035_v63 = vrot.slane %v5034_v0, 1  ;;  %v5041_v25 = vrot.slane %v5040_v3, 1 }
 0x563   : > { %v5008_v14 = vadd.f32 %v5007_v44, %v4991_v19  ;;  %v5019_v18 = vadd.f32 %v5018_v1, %v4992_v13  ;;  %v4995_v22 = vunpack.c.l.bf16 %v7850_v57  ;;  %v4996_v35 = vunpack.c.h.bf16 %v7850_v57 }
 0x564   : > { %v3888_v10 = vmul.f32 1.442695, %v3886_v33  ;;  %v3890_v43 = vmul.f32 1.442695, %v3887_v9  ;;  %v4997_v4 = vunpack.c.l.bf16 %v7855_v61  ;;  %v5036_v6 = vadd.f32 %v5035_v63, %v5034_v0 }
 0x565   : > { %v5009_v34 = vadd.f32 %v5008_v14, %v4993_v48  ;;  %v5020_v20 = vadd.f32 %v5019_v18, %v4994_v53  ;;  %v5042_v2 = vadd.f32 %v5041_v25, %v5040_v3  ;;  %v4998_v17 = vunpack.c.h.bf16 %v7855_v61 }
 0x566   : > { %5660 = vpow2.f32 %v3888_v10  ;;  %v4999_v36 = vunpack.c.l.bf16 %v7860_v31  ;;  %v5043_v12 = vmul.f32 -0.1, %v5036_v6  ;;  %v3868_v38 = vpack.c.bf16 %v7881_v45, %v7881_v45 }
 0x567   : > { %v5010_v56 = vadd.f32 %v5009_v34, %v4995_v22  ;;  %v5021_v24 = vadd.f32 %v5020_v20, %v4996_v35  ;;  %5662 = vpow2.f32 %v3890_v43  ;;  %v5044_v37 = vmul.f32 -0.1, %v5042_v2 }
 0x568   : > { %v5000_v57 = vunpack.c.h.bf16 %v7860_v31  ;;  %v3869_v42 = vpack.c.bf16 %v7883_v16, %v7883_v16  ;;  %v5045_v32 = vmul.f32 1.442695, %v5043_v12  ;;  %v5001_v61 = vunpack.c.l.bf16 %v7865_v49 }
 0x569   : > { %v5011_v60 = vadd.f32 %v5010_v56, %v4997_v4  ;;  %v5022_v30 = vadd.f32 %v5021_v24, %v4998_v17  ;;  %v5047_v23 = vmul.f32 1.442695, %v5044_v37  ;;  %v5002_v50 = vunpack.c.h.bf16 %v7865_v49  ;;  %v8436_v49 = vld [vmem:[#allocation82_spill] sm:$0xff] }
 0x56a   : > { %5664 = vpow2.f32 %v5045_v32  ;;  %v3892_v27 = vunpack.c.l.bf16 %v3868_v38  ;;  %v3893_v31 = vunpack.c.l.bf16 %v3869_v42 }
 0x56b   : > { %v5012_v59 = vadd.f32 %v5011_v60, %v4999_v36  ;;  %v5023_v11 = vadd.f32 %v5022_v30, %v5000_v57  ;;  %5666 = vpow2.f32 %v5047_v23 }
 0x56d   : > { %v5013_v41 = vadd.f32 %v5012_v59, %v5001_v61  ;;  %v5024_v45 = vadd.f32 %v5023_v11, %v5002_v50 }
 0x56f   : > { %v5025_v62 = vpack.c.bf16 %v5013_v41, %v5013_v41  ;;  %v5026_v58 = vpack.c.bf16 %v5024_v45, %v5024_v45 }
 0x570   : > { %v5661_v39 = vpop.eup %5660 }
 0x571   : > { %v5663_v16 = vpop.eup %5662  ;;  %v3894_v29 = vmul.f32 %v5661_v39, %v3892_v27  ;;  %v5049_v28 = vunpack.c.l.bf16 %v5025_v62  ;;  %v5050_v52 = vunpack.c.l.bf16 %v5026_v58 }
 0x572   : > { %v3895_v40 = vmul.f32 %v5663_v16, %v3893_v31 }
 0x573   : > { %v3896_v15 = vadd.f32 %v3894_v29, %v8435_v55 }
 0x574   : > { %v3897_v51 = vadd.f32 %v3895_v40, %v8436_v49  ;;  %v5665_v54 = vpop.eup %5664 }
 0x575   : > { %v5667_v47 = vpop.eup %5666  ;;  %v5051_v46 = vmul.f32 %v5665_v54, %v5049_v28 }
 0x576   : > { %v5052_v21 = vmul.f32 %v5667_v47, %v5050_v52 }
 0x577   : > { %v5053_v26 = vadd.f32 %v5051_v46, %v3896_v15 }
 0x578   : > { %v5054_v7 = vadd.f32 %v5052_v21, %v3897_v51 }
 0x579   : > { %v5055_v5 = vmul.f32 0.25, %v5053_v26 }
 0x57a   : > { %v5056_v8 = vmul.f32 0.25, %v5054_v7 }
 0x57b   : > { %5057 = vst [vmem:[%s259_s11] sm:$0xff] %v5055_v5 }
 0x57c   : > { %5058 = vst [vmem:[%s259_s11 + $0x8] sm:$0xff] %v5056_v8 }
 0x57d   : > { %5816 = shalt.err (!%p5813_p12)
}
 0x57e   : > { %s5817_s9 = scalar_lea.hbm %s7908_s5, 256  ;;  %s5821_s13 = scalar_lea.hbm %s7956_s4, 512 }
 0x57f   : > { %p5818_p3 = scmp.ne.s32.totalorder %s7908_s5, %s5817_s9  ;;  %p5822_p13 = scmp.lt.u32.totalorder %s7908_s5, %s7956_s4 }
 0x580   : > { %p5823_p7 = scmp.lt.u32.totalorder %s5821_s13, %s5817_s9  ;;  %p5825_p10 = scmp.lt.u32.totalorder %s5817_s9, %s7908_s5 }
 0x581   : > { %p5819_p6 = pnand %p5818_p3, %p8437_p1 }
 0x582   : > { %p5824_p9 = por %p5823_p7, %p5822_p13 }
 0x583   : > { %p5820_p2 = pneg %p5819_p6 }
 0x584   : > { %p5826_p4 = por %p5825_p10, %p5824_p9 }
 0x586   : > { %p5827_p0 = pnand %p5826_p4, %p5820_p2 }
 0x588   : > { %5830 = shalt.err (!%p5827_p0)
}
 0x589   : > { %5558 = dma.vmem_to_hbm [thread:$0]  (%p8437_p1), %s7910_s10, 256, %s7908_s5, %s5060_s25  }
 0x58a PF: > { %s5086_s8 = sand.u32 1, %s5865_s15   ;;  %p8438_p8 = scmp.ne.s32.totalorder %s8084_s28, 0 }
 0x58b   : > { %p8439_p5 = scmp.ge.s32.totalorder %s5877_s18, 2  ;;  %s5087_s23 = scalar_lea.sflag [#allocation4], %s5086_s8 }
 0x58d   : > { %p5575_p11 = pnand %p8439_p5, %p8438_p8 }
 0x58f   : > { %5860 = dma.done.wait (!%p5575_p11), %s5087_s23, 256  }
 0x590   : > { %5862 = vsyncadd (!%p5575_p11), %s5087_s23, 4294967040  ;;  %s8440_s18 = sld [smem:[#allocation15_spill]]  ;;  %s8441_s1 = sld [smem:[#allocation16_spill]] }
 0x591   : > { %s8442_s15 = smov %s5869_s16  ;;  %s8443_s16 = smov %s5873_s17 }
 0x596   : > { %p19_p12 = scmp.ge.s32.totalorder %s8440_s18, 4   ;;  %s8444_s17 = smov %s8441_s1 }
 0x598   :  { %21 = sbr.rel (!%p19_p12) target bundleno = 9 (0x9), region = 96 }
 0x59f   :  { %5092 = vsyncpa [#allocation3], 1 }
 0x5a0   :  { %5094 = vsyncpa [#allocation3 + $0x1], 1 }
 0x5a1   :  { %5095 = vsyncpa [#allocation6], 1 }
 0x5a2   :  { %5096 = vsyncpa [#allocation9], 1 }
 0x5a3   :  { %5097 = vsyncpa [#allocation4], 1 }
 0x5a4   :  { %5099 = vsyncpa [#allocation4 + $0x1], 1 }

</bundles_post_ra>
